<compile_context>
chip_gen: v7x
topology: tpu7x:2x2x1
jax: 0.10.0
libtpu: 0.0.40
codegen_flags: <defaults>
</compile_context>

<pallas_src>
import math

import jax
import jax.numpy as jnp
from jax import lax
from jax.experimental import pallas as pl
from jax.experimental.pallas import tpu as pltpu


# ----------------------- small synthetic configuration -----------------------
BATCH = 2
IN_CH = 3
IMG = 32            # image spatial size
PATCH = 8           # patch size -> (32/8)^2 = 16 patches
N_HIDDEN = 32       # stand-in for OWLv2's 768 (== n_hidden of the head)
N_HEADS = 4
HEAD_DIM = N_HIDDEN // N_HEADS
MLP_DIM = 4 * N_HIDDEN
N_LAYERS = 2
N_PATCHES = (IMG // PATCH) ** 2
SEQ = N_PATCHES + 1  # patches + CLS token
EPS = 1e-5
LOGIT_PAD = 128      # lane-dense padded logits width (sliced back to 2 outside)

LAYER_KEYS = ("ln1_g", "ln1_b", "wqkv", "bqkv", "wo", "bo",
              "ln2_g", "ln2_b", "w_fc1", "b_fc1", "w_fc2", "b_fc2")
HEAD_KEYS = ("ln1_g", "ln1_b", "w1", "b1", "ln2_g", "ln2_b", "w2", "b2")


# ------------------------------ in-kernel helpers -----------------------------
def _ln(x, g, b):
    mu = jnp.mean(x, axis=-1, keepdims=True)
    var = jnp.mean(jnp.square(x - mu), axis=-1, keepdims=True)
    return (x - mu) * jax.lax.rsqrt(var + EPS) * g + b


def _gelu(x):
    # TODO(synk): nn.GELU() default is exact-erf; tanh approximation used here.
    return jax.nn.gelu(x, approximate=True)


def _mm(a, w, b=None):
    """bf16 MXU matmul with f32 accumulation (autocast-like)."""
    y = jnp.dot(a.astype(jnp.bfloat16), w.astype(jnp.bfloat16),
                preferred_element_type=jnp.float32)
    return y if b is None else y + b


# ------------------------- the single fused forward kernel --------------------
def _fused_forward_kernel(patches_ref, w_patch_ref, cls_ref, pos_ref,
                          pre_g_ref, pre_b_ref, *args):
    n_layer_refs = N_LAYERS * len(LAYER_KEYS)
    layer_refs = args[:n_layer_refs]
    head_refs = args[n_layer_refs:n_layer_refs + len(HEAD_KEYS)]
    o_ref = args[n_layer_refs + len(HEAD_KEYS)]

    # ---- patch embedding (stride-PATCH conv as matmul) + CLS + pos + pre-LN ----
    patches = patches_ref[0]                                   # [NP, C*P*P] f32
    emb = _mm(patches, w_patch_ref[...])                       # [NP, H]
    tokens = jnp.concatenate([cls_ref[...], emb], axis=0) + pos_ref[...]  # [S, H]
    x = _ln(tokens, pre_g_ref[...], pre_b_ref[...])

    # ---- transformer encoder layers (fully fused, static unroll) ----
    scale = 1.0 / math.sqrt(HEAD_DIM)
    nk = len(LAYER_KEYS)
    for li in range(N_LAYERS):
        r = dict(zip(LAYER_KEYS, layer_refs[li * nk:(li + 1) * nk]))

        # pre-LN self-attention with fused QKV projection (one matmul)
        hn = _ln(x, r["ln1_g"][...], r["ln1_b"][...])
        qkv = _mm(hn, r["wqkv"][...], r["bqkv"][...])          # [S, 3H]

        # split heads with static lane slices, batch all heads in one dot_general
        q_h = jnp.stack([qkv[:, h * HEAD_DIM:(h + 1) * HEAD_DIM]
                         for h in range(N_HEADS)], axis=0)     # [NH, S, HD]
        k_h = jnp.stack([qkv[:, N_HIDDEN + h * HEAD_DIM:N_HIDDEN + (h + 1) * HEAD_DIM]
                         for h in range(N_HEADS)], axis=0)
        v_h = jnp.stack([qkv[:, 2 * N_HIDDEN + h * HEAD_DIM:2 * N_HIDDEN + (h + 1) * HEAD_DIM]
                         for h in range(N_HEADS)], axis=0)

        s = lax.dot_general(q_h.astype(jnp.bfloat16), k_h.astype(jnp.bfloat16),
                            (((2,), (2,)), ((0,), (0,))),
                            preferred_element_type=jnp.float32) * scale   # [NH,S,S]
        s = s - jnp.max(s, axis=-1, keepdims=True)
        p = jnp.exp(s)
        p = p * pl.reciprocal(jnp.sum(p, axis=-1, keepdims=True), approx=True)
        ctx_h = lax.dot_general(p.astype(jnp.bfloat16), v_h.astype(jnp.bfloat16),
                                (((2,), (1,)), ((0,), (0,))),
                                preferred_element_type=jnp.float32)        # [NH,S,HD]
        ctx = jnp.concatenate([ctx_h[h] for h in range(N_HEADS)], axis=-1)  # [S, H]

        x = x + _mm(ctx, r["wo"][...], r["bo"][...])

        # pre-LN MLP
        hn = _ln(x, r["ln2_g"][...], r["ln2_b"][...])
        m = _gelu(_mm(hn, r["w_fc1"][...], r["b_fc1"][...]))
        x = x + _mm(m, r["w_fc2"][...], r["b_fc2"][...])

    # ---- DetectorModelOwl classifier head (dropouts are identity) ----
    h = dict(zip(HEAD_KEYS, head_refs))
    hn = _ln(x, h["ln1_g"][...], h["ln1_b"][...])
    t = _gelu(_mm(hn, h["w1"][...], h["b1"][...]))             # [S, 2H]
    tmax = jnp.max(t, axis=0, keepdims=True)                   # torch x.max(dim=1)
    hn2 = _ln(tmax, h["ln2_g"][...], h["ln2_b"][...])
    logits = _mm(hn2, h["w2"][...], h["b2"][...])              # [1, LOGIT_PAD]
    o_ref[0] = logits                                          # lane-dense store


# --------------------------------- wrapper ------------------------------------
def _bcast_spec(shape):
    n = len(shape)
    return pl.BlockSpec(shape, lambda i, _n=n: (0,) * _n)


def detector_forward(pixel_values, params):
    """DetectorModelOwl.forward with labels=None -> (logits,). One pallas_call."""
    b, c, hi, wi = pixel_values.shape
    gh, gw = hi // PATCH, wi // PATCH
    # im2col: non-overlapping stride-PATCH patches (pure layout, done in XLA)
    patches = pixel_values.reshape(b, c, gh, PATCH, gw, PATCH)
    patches = patches.transpose(0, 2, 4, 1, 3, 5).reshape(
        b, gh * gw, c * PATCH * PATCH)

    flat_inputs, in_specs = [], []

    def add(arr, spec):
        flat_inputs.append(arr)
        in_specs.append(spec)

    add(patches,
        pl.BlockSpec((1, gh * gw, c * PATCH * PATCH), lambda i: (i, 0, 0)))
    add(params["w_patch"], _bcast_spec(params["w_patch"].shape))
    add(params["cls"].reshape(1, N_HIDDEN), _bcast_spec((1, N_HIDDEN)))
    add(params["pos"], _bcast_spec(params["pos"].shape))
    add(params["pre_ln_g"].reshape(1, N_HIDDEN), _bcast_spec((1, N_HIDDEN)))
    add(params["pre_ln_b"].reshape(1, N_HIDDEN), _bcast_spec((1, N_HIDDEN)))

    for lp in params["layers"]:
        # fuse Wq/Wk/Wv into one [H, 3H] weight (3 matmuls -> 1)
        wqkv = jnp.concatenate([lp["wq"], lp["wk"], lp["wv"]], axis=1)
        bqkv = jnp.concatenate([lp["bq"], lp["bk"], lp["bv"]],
                               axis=0).reshape(1, 3 * N_HIDDEN)
        tensors = {
            "ln1_g": lp["ln1_g"].reshape(1, N_HIDDEN),
            "ln1_b": lp["ln1_b"].reshape(1, N_HIDDEN),
            "wqkv": wqkv, "bqkv": bqkv,
            "wo": lp["wo"], "bo": lp["bo"].reshape(1, N_HIDDEN),
            "ln2_g": lp["ln2_g"].reshape(1, N_HIDDEN),
            "ln2_b": lp["ln2_b"].reshape(1, N_HIDDEN),
            "w_fc1": lp["w_fc1"], "b_fc1": lp["b_fc1"].reshape(1, MLP_DIM),
            "w_fc2": lp["w_fc2"], "b_fc2": lp["b_fc2"].reshape(1, N_HIDDEN),
        }
        for k in LAYER_KEYS:
            add(tensors[k], _bcast_spec(tensors[k].shape))

    hp = params["head"]
    w2p = jnp.pad(hp["w2"], ((0, 0), (0, LOGIT_PAD - 2)))      # lane-dense logits
    b2p = jnp.pad(hp["b2"], (0, LOGIT_PAD - 2)).reshape(1, LOGIT_PAD)
    head_tensors = {
        "ln1_g": hp["ln1_g"].reshape(1, N_HIDDEN),
        "ln1_b": hp["ln1_b"].reshape(1, N_HIDDEN),
        "w1": hp["w1"], "b1": hp["b1"].reshape(1, 2 * N_HIDDEN),
        "ln2_g": hp["ln2_g"].reshape(1, 2 * N_HIDDEN),
        "ln2_b": hp["ln2_b"].reshape(1, 2 * N_HIDDEN),
        "w2": w2p, "b2": b2p,
    }
    for k in HEAD_KEYS:
        add(head_tensors[k], _bcast_spec(head_tensors[k].shape))

    out = pl.pallas_call(
        _fused_forward_kernel,
        out_shape=jax.ShapeDtypeStruct((b, 1, LOGIT_PAD), jnp.float32),
        grid=(b,),
        in_specs=in_specs,
        out_specs=pl.BlockSpec((1, 1, LOGIT_PAD), lambda i: (i, 0, 0)),
        compiler_params=pltpu.CompilerParams(
            dimension_semantics=("parallel",)),   # batch -> v7x's 2 TensorCores
    )(*flat_inputs)
    logits = out[:, 0, :2]                         # slice padded lane slab
    return (logits,)


# ------------------------------ parameter init --------------------------------
def init_params(key):
    # TODO(synk): stands in for the frozen pretrained Owlv2VisionModel weights
    # (same architecture family, deterministically initialized, scaled down).
    keys = iter(jax.random.split(key, 64))

    def nrm(shape, scale=0.02):
        return scale * jax.random.normal(next(keys), shape, dtype=jnp.float32)

    ones, zeros = (lambda n: jnp.ones((n,), jnp.float32),
                   lambda n: jnp.zeros((n,), jnp.float32))
    params = {
        "w_patch": nrm((IN_CH * PATCH * PATCH, N_HIDDEN)),
        "cls": nrm((N_HIDDEN,)),
        "pos": nrm((SEQ, N_HIDDEN)),
        "pre_ln_g": ones(N_HIDDEN), "pre_ln_b": zeros(N_HIDDEN),
        "layers": [],
        "head": {   # DetectorModelOwl's own parameters (ln1/linear1/ln2/linear2)
            "ln1_g": ones(N_HIDDEN), "ln1_b": zeros(N_HIDDEN),
            "w1": nrm((N_HIDDEN, 2 * N_HIDDEN)), "b1": zeros(2 * N_HIDDEN),
            "ln2_g": ones(2 * N_HIDDEN), "ln2_b": zeros(2 * N_HIDDEN),
            "w2": nrm((2 * N_HIDDEN, 2)), "b2": zeros(2),
        },
    }
    for _ in range(N_LAYERS):
        params["layers"].append({
            "ln1_g": ones(N_HIDDEN), "ln1_b": zeros(N_HIDDEN),
            "wq": nrm((N_HIDDEN, N_HIDDEN)), "bq": zeros(N_HIDDEN),
            "wk": nrm((N_HIDDEN, N_HIDDEN)), "bk": zeros(N_HIDDEN),
            "wv": nrm((N_HIDDEN, N_HIDDEN)), "bv": zeros(N_HIDDEN),
            "wo": nrm((N_HIDDEN, N_HIDDEN)), "bo": zeros(N_HIDDEN),
            "ln2_g": ones(N_HIDDEN), "ln2_b": zeros(N_HIDDEN),
            "w_fc1": nrm((N_HIDDEN, MLP_DIM)), "b_fc1": zeros(MLP_DIM),
            "w_fc2": nrm((MLP_DIM, N_HIDDEN)), "b_fc2": zeros(N_HIDDEN),
        })
    return params


# ----------------------------------- main --------------------------------------
if __name__ == "__main__":
    key = jax.random.PRNGKey(0)
    pkey, xkey = jax.random.split(key)
    params = init_params(pkey)
    pixel_values = jax.random.normal(xkey, (BATCH, IN_CH, IMG, IMG),
                                     dtype=jnp.float32)
    (logits,) = jax.jit(detector_forward)(pixel_values, params)
    jax.block_until_ready(logits)
    assert logits.shape == (BATCH, 2) and logits.dtype == jnp.float32
    print("KERNEL_OK")
</pallas_src>

<mosaic_0001>
module attributes {stable_mosaic.version = 11 : i64} {
  func.func @_fused_forward_kernel(%arg0: i32, %arg1: memref<1x16x192xf32, #tpu.memory_space<vmem>>, %arg2: memref<192x32xf32, #tpu.memory_space<vmem>>, %arg3: memref<1x32xf32, #tpu.memory_space<vmem>>, %arg4: memref<17x32xf32, #tpu.memory_space<vmem>>, %arg5: memref<1x32xf32, #tpu.memory_space<vmem>>, %arg6: memref<1x32xf32, #tpu.memory_space<vmem>>, %arg7: memref<1x32xf32, #tpu.memory_space<vmem>>, %arg8: memref<1x32xf32, #tpu.memory_space<vmem>>, %arg9: memref<32x96xf32, #tpu.memory_space<vmem>>, %arg10: memref<1x96xf32, #tpu.memory_space<vmem>>, %arg11: memref<32x32xf32, #tpu.memory_space<vmem>>, %arg12: memref<1x32xf32, #tpu.memory_space<vmem>>, %arg13: memref<1x32xf32, #tpu.memory_space<vmem>>, %arg14: memref<1x32xf32, #tpu.memory_space<vmem>>, %arg15: memref<32x128xf32, #tpu.memory_space<vmem>>, %arg16: memref<1x128xf32, #tpu.memory_space<vmem>>, %arg17: memref<128x32xf32, #tpu.memory_space<vmem>>, %arg18: memref<1x32xf32, #tpu.memory_space<vmem>>, %arg19: memref<1x32xf32, #tpu.memory_space<vmem>>, %arg20: memref<1x32xf32, #tpu.memory_space<vmem>>, %arg21: memref<32x96xf32, #tpu.memory_space<vmem>>, %arg22: memref<1x96xf32, #tpu.memory_space<vmem>>, %arg23: memref<32x32xf32, #tpu.memory_space<vmem>>, %arg24: memref<1x32xf32, #tpu.memory_space<vmem>>, %arg25: memref<1x32xf32, #tpu.memory_space<vmem>>, %arg26: memref<1x32xf32, #tpu.memory_space<vmem>>, %arg27: memref<32x128xf32, #tpu.memory_space<vmem>>, %arg28: memref<1x128xf32, #tpu.memory_space<vmem>>, %arg29: memref<128x32xf32, #tpu.memory_space<vmem>>, %arg30: memref<1x32xf32, #tpu.memory_space<vmem>>, %arg31: memref<1x32xf32, #tpu.memory_space<vmem>>, %arg32: memref<1x32xf32, #tpu.memory_space<vmem>>, %arg33: memref<32x64xf32, #tpu.memory_space<vmem>>, %arg34: memref<1x64xf32, #tpu.memory_space<vmem>>, %arg35: memref<1x64xf32, #tpu.memory_space<vmem>>, %arg36: memref<1x64xf32, #tpu.memory_space<vmem>>, %arg37: memref<64x128xf32, #tpu.memory_space<vmem>>, %arg38: memref<1x128xf32, #tpu.memory_space<vmem>>, %arg39: memref<1x1x128xf32, #tpu.memory_space<vmem>>) attributes {dimension_semantics = [#tpu.dimension_semantics<parallel>], iteration_bounds = array<i64: 2>, scalar_prefetch = 0 : i64, scratch_operands = 0 : i64, tpu.core_type = #tpu.core_type<tc>, window_params = [{transform_indices = @transform_0, window_bounds = array<i64: 1, 16, 192>}, {pipeline_mode = #tpu.pipeline_mode<synchronous>, transform_indices = @transform_1, window_bounds = array<i64: 192, 32>}, {pipeline_mode = #tpu.pipeline_mode<synchronous>, transform_indices = @transform_2, window_bounds = array<i64: 1, 32>}, {pipeline_mode = #tpu.pipeline_mode<synchronous>, transform_indices = @transform_3, window_bounds = array<i64: 17, 32>}, {pipeline_mode = #tpu.pipeline_mode<synchronous>, transform_indices = @transform_4, window_bounds = array<i64: 1, 32>}, {pipeline_mode = #tpu.pipeline_mode<synchronous>, transform_indices = @transform_5, window_bounds = array<i64: 1, 32>}, {pipeline_mode = #tpu.pipeline_mode<synchronous>, transform_indices = @transform_6, window_bounds = array<i64: 1, 32>}, {pipeline_mode = #tpu.pipeline_mode<synchronous>, transform_indices = @transform_7, window_bounds = array<i64: 1, 32>}, {pipeline_mode = #tpu.pipeline_mode<synchronous>, transform_indices = @transform_8, window_bounds = array<i64: 32, 96>}, {pipeline_mode = #tpu.pipeline_mode<synchronous>, transform_indices = @transform_9, window_bounds = array<i64: 1, 96>}, {pipeline_mode = #tpu.pipeline_mode<synchronous>, transform_indices = @transform_10, window_bounds = array<i64: 32, 32>}, {pipeline_mode = #tpu.pipeline_mode<synchronous>, transform_indices = @transform_11, window_bounds = array<i64: 1, 32>}, {pipeline_mode = #tpu.pipeline_mode<synchronous>, transform_indices = @transform_12, window_bounds = array<i64: 1, 32>}, {pipeline_mode = #tpu.pipeline_mode<synchronous>, transform_indices = @transform_13, window_bounds = array<i64: 1, 32>}, {pipeline_mode = #tpu.pipeline_mode<synchronous>, transform_indices = @transform_14, window_bounds = array<i64: 32, 128>}, {pipeline_mode = #tpu.pipeline_mode<synchronous>, transform_indices = @transform_15, window_bounds = array<i64: 1, 128>}, {pipeline_mode = #tpu.pipeline_mode<synchronous>, transform_indices = @transform_16, window_bounds = array<i64: 128, 32>}, {pipeline_mode = #tpu.pipeline_mode<synchronous>, transform_indices = @transform_17, window_bounds = array<i64: 1, 32>}, {pipeline_mode = #tpu.pipeline_mode<synchronous>, transform_indices = @transform_18, window_bounds = array<i64: 1, 32>}, {pipeline_mode = #tpu.pipeline_mode<synchronous>, transform_indices = @transform_19, window_bounds = array<i64: 1, 32>}, {pipeline_mode = #tpu.pipeline_mode<synchronous>, transform_indices = @transform_20, window_bounds = array<i64: 32, 96>}, {pipeline_mode = #tpu.pipeline_mode<synchronous>, transform_indices = @transform_21, window_bounds = array<i64: 1, 96>}, {pipeline_mode = #tpu.pipeline_mode<synchronous>, transform_indices = @transform_22, window_bounds = array<i64: 32, 32>}, {pipeline_mode = #tpu.pipeline_mode<synchronous>, transform_indices = @transform_23, window_bounds = array<i64: 1, 32>}, {pipeline_mode = #tpu.pipeline_mode<synchronous>, transform_indices = @transform_24, window_bounds = array<i64: 1, 32>}, {pipeline_mode = #tpu.pipeline_mode<synchronous>, transform_indices = @transform_25, window_bounds = array<i64: 1, 32>}, {pipeline_mode = #tpu.pipeline_mode<synchronous>, transform_indices = @transform_26, window_bounds = array<i64: 32, 128>}, {pipeline_mode = #tpu.pipeline_mode<synchronous>, transform_indices = @transform_27, window_bounds = array<i64: 1, 128>}, {pipeline_mode = #tpu.pipeline_mode<synchronous>, transform_indices = @transform_28, window_bounds = array<i64: 128, 32>}, {pipeline_mode = #tpu.pipeline_mode<synchronous>, transform_indices = @transform_29, window_bounds = array<i64: 1, 32>}, {pipeline_mode = #tpu.pipeline_mode<synchronous>, transform_indices = @transform_30, window_bounds = array<i64: 1, 32>}, {pipeline_mode = #tpu.pipeline_mode<synchronous>, transform_indices = @transform_31, window_bounds = array<i64: 1, 32>}, {pipeline_mode = #tpu.pipeline_mode<synchronous>, transform_indices = @transform_32, window_bounds = array<i64: 32, 64>}, {pipeline_mode = #tpu.pipeline_mode<synchronous>, transform_indices = @transform_33, window_bounds = array<i64: 1, 64>}, {pipeline_mode = #tpu.pipeline_mode<synchronous>, transform_indices = @transform_34, window_bounds = array<i64: 1, 64>}, {pipeline_mode = #tpu.pipeline_mode<synchronous>, transform_indices = @transform_35, window_bounds = array<i64: 1, 64>}, {pipeline_mode = #tpu.pipeline_mode<synchronous>, transform_indices = @transform_36, window_bounds = array<i64: 64, 128>}, {pipeline_mode = #tpu.pipeline_mode<synchronous>, transform_indices = @transform_37, window_bounds = array<i64: 1, 128>}, {transform_indices = @transform_38, window_bounds = array<i64: 1, 1, 128>}]} {
    %c0 = arith.constant 0 : index
    %c0_0 = arith.constant 0 : index
    %c0_1 = arith.constant 0 : index
    %0 = vector.load %arg1[%c0, %c0_0, %c0_1] : memref<1x16x192xf32, #tpu.memory_space<vmem>>, vector<1x16x192xf32>
    %1 = vector.shape_cast %0 : vector<1x16x192xf32> to vector<16x192xf32>
    %c0_2 = arith.constant 0 : index
    %c0_3 = arith.constant 0 : index
    %2 = vector.load %arg2[%c0_2, %c0_3] : memref<192x32xf32, #tpu.memory_space<vmem>>, vector<192x32xf32>
    %3 = arith.truncf %1 : vector<16x192xf32> to vector<16x192xbf16>
    %4 = arith.truncf %2 : vector<192x32xf32> to vector<192x32xbf16>
    %cst = arith.constant dense<0.000000e+00> : vector<16x32xf32>
    %5 = tpu.matmul %3, %4, %cst {dimension_numbers = #tpu.dot_dimension_numbers<[1], [0], [0], [1], [0, 0, 1, 1], [], []>} : vector<16x192xbf16>, vector<192x32xbf16>, vector<16x32xf32> -> vector<16x32xf32>
    %c0_4 = arith.constant 0 : index
    %c0_5 = arith.constant 0 : index
    %6 = vector.load %arg3[%c0_4, %c0_5] : memref<1x32xf32, #tpu.memory_space<vmem>>, vector<1x32xf32>
    %7 = tpu.concatenate %6, %5 in 0 : vector<1x32xf32>, vector<16x32xf32> -> vector<17x32xf32>
    %c0_6 = arith.constant 0 : index
    %c0_7 = arith.constant 0 : index
    %8 = vector.load %arg4[%c0_6, %c0_7] : memref<17x32xf32, #tpu.memory_space<vmem>>, vector<17x32xf32>
    %9 = arith.addf %7, %8 : vector<17x32xf32>
    %c0_8 = arith.constant 0 : index
    %c0_9 = arith.constant 0 : index
    %10 = vector.load %arg5[%c0_8, %c0_9] : memref<1x32xf32, #tpu.memory_space<vmem>>, vector<1x32xf32>
    %c0_10 = arith.constant 0 : index
    %c0_11 = arith.constant 0 : index
    %11 = vector.load %arg6[%c0_10, %c0_11] : memref<1x32xf32, #tpu.memory_space<vmem>>, vector<1x32xf32>
    %cst_12 = arith.constant dense<0.000000e+00> : vector<17xf32>
    %12 = vector.multi_reduction <add>, %9, %cst_12 [1] : vector<17x32xf32> to vector<17xf32>
    %13 = vector.shape_cast %12 : vector<17xf32> to vector<17x1xf32>
    %cst_13 = arith.constant 3.200000e+01 : f32
    %14 = vector.broadcast %cst_13 : f32 to vector<17x1xf32>
    %15 = arith.divf %13, %14 : vector<17x1xf32>
    %16 = vector.broadcast %15 : vector<17x1xf32> to vector<17x32xf32>
    %17 = arith.subf %9, %16 : vector<17x32xf32>
    %18 = arith.mulf %17, %17 : vector<17x32xf32>
    %cst_14 = arith.constant dense<0.000000e+00> : vector<17xf32>
    %19 = vector.multi_reduction <add>, %18, %cst_14 [1] : vector<17x32xf32> to vector<17xf32>
    %20 = vector.shape_cast %19 : vector<17xf32> to vector<17x1xf32>
    %cst_15 = arith.constant 3.200000e+01 : f32
    %21 = vector.broadcast %cst_15 : f32 to vector<17x1xf32>
    %22 = arith.divf %20, %21 : vector<17x1xf32>
    %23 = vector.broadcast %15 : vector<17x1xf32> to vector<17x32xf32>
    %24 = arith.subf %9, %23 : vector<17x32xf32>
    %cst_16 = arith.constant 9.99999974E-6 : f32
    %25 = vector.broadcast %cst_16 : f32 to vector<17x1xf32>
    %26 = arith.addf %22, %25 : vector<17x1xf32>
    %27 = math.rsqrt %26 : vector<17x1xf32>
    %28 = vector.broadcast %27 : vector<17x1xf32> to vector<17x32xf32>
    %29 = arith.mulf %24, %28 : vector<17x32xf32>
    %30 = vector.broadcast %10 : vector<1x32xf32> to vector<17x32xf32>
    %31 = arith.mulf %29, %30 : vector<17x32xf32>
    %32 = vector.broadcast %11 : vector<1x32xf32> to vector<17x32xf32>
    %33 = arith.addf %31, %32 : vector<17x32xf32>
    %c0_17 = arith.constant 0 : index
    %c0_18 = arith.constant 0 : index
    %34 = vector.load %arg7[%c0_17, %c0_18] : memref<1x32xf32, #tpu.memory_space<vmem>>, vector<1x32xf32>
    %c0_19 = arith.constant 0 : index
    %c0_20 = arith.constant 0 : index
    %35 = vector.load %arg8[%c0_19, %c0_20] : memref<1x32xf32, #tpu.memory_space<vmem>>, vector<1x32xf32>
    %cst_21 = arith.constant dense<0.000000e+00> : vector<17xf32>
    %36 = vector.multi_reduction <add>, %33, %cst_21 [1] : vector<17x32xf32> to vector<17xf32>
    %37 = vector.shape_cast %36 : vector<17xf32> to vector<17x1xf32>
    %cst_22 = arith.constant 3.200000e+01 : f32
    %38 = vector.broadcast %cst_22 : f32 to vector<17x1xf32>
    %39 = arith.divf %37, %38 : vector<17x1xf32>
    %40 = vector.broadcast %39 : vector<17x1xf32> to vector<17x32xf32>
    %41 = arith.subf %33, %40 : vector<17x32xf32>
    %42 = arith.mulf %41, %41 : vector<17x32xf32>
    %cst_23 = arith.constant dense<0.000000e+00> : vector<17xf32>
    %43 = vector.multi_reduction <add>, %42, %cst_23 [1] : vector<17x32xf32> to vector<17xf32>
    %44 = vector.shape_cast %43 : vector<17xf32> to vector<17x1xf32>
    %cst_24 = arith.constant 3.200000e+01 : f32
    %45 = vector.broadcast %cst_24 : f32 to vector<17x1xf32>
    %46 = arith.divf %44, %45 : vector<17x1xf32>
    %47 = vector.broadcast %39 : vector<17x1xf32> to vector<17x32xf32>
    %48 = arith.subf %33, %47 : vector<17x32xf32>
    %cst_25 = arith.constant 9.99999974E-6 : f32
    %49 = vector.broadcast %cst_25 : f32 to vector<17x1xf32>
    %50 = arith.addf %46, %49 : vector<17x1xf32>
    %51 = math.rsqrt %50 : vector<17x1xf32>
    %52 = vector.broadcast %51 : vector<17x1xf32> to vector<17x32xf32>
    %53 = arith.mulf %48, %52 : vector<17x32xf32>
    %54 = vector.broadcast %34 : vector<1x32xf32> to vector<17x32xf32>
    %55 = arith.mulf %53, %54 : vector<17x32xf32>
    %56 = vector.broadcast %35 : vector<1x32xf32> to vector<17x32xf32>
    %57 = arith.addf %55, %56 : vector<17x32xf32>
    %c0_26 = arith.constant 0 : index
    %c0_27 = arith.constant 0 : index
    %58 = vector.load %arg9[%c0_26, %c0_27] : memref<32x96xf32, #tpu.memory_space<vmem>>, vector<32x96xf32>
    %c0_28 = arith.constant 0 : index
    %c0_29 = arith.constant 0 : index
    %59 = vector.load %arg10[%c0_28, %c0_29] : memref<1x96xf32, #tpu.memory_space<vmem>>, vector<1x96xf32>
    %60 = arith.truncf %57 : vector<17x32xf32> to vector<17x32xbf16>
    %61 = arith.truncf %58 : vector<32x96xf32> to vector<32x96xbf16>
    %cst_30 = arith.constant dense<0.000000e+00> : vector<17x96xf32>
    %62 = tpu.matmul %60, %61, %cst_30 {dimension_numbers = #tpu.dot_dimension_numbers<[1], [0], [0], [1], [0, 0, 1, 1], [], []>} : vector<17x32xbf16>, vector<32x96xbf16>, vector<17x96xf32> -> vector<17x96xf32>
    %63 = vector.broadcast %59 : vector<1x96xf32> to vector<17x96xf32>
    %64 = arith.addf %62, %63 : vector<17x96xf32>
    %65 = vector.extract_strided_slice %64 {offsets = [0, 0], sizes = [17, 8], strides = [1, 1]} : vector<17x96xf32> to vector<17x8xf32>
    %66 = vector.extract_strided_slice %64 {offsets = [0, 8], sizes = [17, 8], strides = [1, 1]} : vector<17x96xf32> to vector<17x8xf32>
    %67 = vector.extract_strided_slice %64 {offsets = [0, 16], sizes = [17, 8], strides = [1, 1]} : vector<17x96xf32> to vector<17x8xf32>
    %68 = vector.extract_strided_slice %64 {offsets = [0, 24], sizes = [17, 8], strides = [1, 1]} : vector<17x96xf32> to vector<17x8xf32>
    %69 = vector.shape_cast %65 : vector<17x8xf32> to vector<1x17x8xf32>
    %70 = vector.shape_cast %66 : vector<17x8xf32> to vector<1x17x8xf32>
    %71 = vector.shape_cast %67 : vector<17x8xf32> to vector<1x17x8xf32>
    %72 = vector.shape_cast %68 : vector<17x8xf32> to vector<1x17x8xf32>
    %73 = tpu.concatenate %69, %70, %71, %72 in 0 : vector<1x17x8xf32>, vector<1x17x8xf32>, vector<1x17x8xf32>, vector<1x17x8xf32> -> vector<4x17x8xf32>
    %74 = vector.extract_strided_slice %64 {offsets = [0, 32], sizes = [17, 8], strides = [1, 1]} : vector<17x96xf32> to vector<17x8xf32>
    %75 = vector.extract_strided_slice %64 {offsets = [0, 40], sizes = [17, 8], strides = [1, 1]} : vector<17x96xf32> to vector<17x8xf32>
    %76 = vector.extract_strided_slice %64 {offsets = [0, 48], sizes = [17, 8], strides = [1, 1]} : vector<17x96xf32> to vector<17x8xf32>
    %77 = vector.extract_strided_slice %64 {offsets = [0, 56], sizes = [17, 8], strides = [1, 1]} : vector<17x96xf32> to vector<17x8xf32>
    %78 = vector.shape_cast %74 : vector<17x8xf32> to vector<1x17x8xf32>
    %79 = vector.shape_cast %75 : vector<17x8xf32> to vector<1x17x8xf32>
    %80 = vector.shape_cast %76 : vector<17x8xf32> to vector<1x17x8xf32>
    %81 = vector.shape_cast %77 : vector<17x8xf32> to vector<1x17x8xf32>
    %82 = tpu.concatenate %78, %79, %80, %81 in 0 : vector<1x17x8xf32>, vector<1x17x8xf32>, vector<1x17x8xf32>, vector<1x17x8xf32> -> vector<4x17x8xf32>
    %83 = vector.extract_strided_slice %64 {offsets = [0, 64], sizes = [17, 8], strides = [1, 1]} : vector<17x96xf32> to vector<17x8xf32>
    %84 = vector.extract_strided_slice %64 {offsets = [0, 72], sizes = [17, 8], strides = [1, 1]} : vector<17x96xf32> to vector<17x8xf32>
    %85 = vector.extract_strided_slice %64 {offsets = [0, 80], sizes = [17, 8], strides = [1, 1]} : vector<17x96xf32> to vector<17x8xf32>
    %86 = vector.extract_strided_slice %64 {offsets = [0, 88], sizes = [17, 8], strides = [1, 1]} : vector<17x96xf32> to vector<17x8xf32>
    %87 = vector.shape_cast %83 : vector<17x8xf32> to vector<1x17x8xf32>
    %88 = vector.shape_cast %84 : vector<17x8xf32> to vector<1x17x8xf32>
    %89 = vector.shape_cast %85 : vector<17x8xf32> to vector<1x17x8xf32>
    %90 = vector.shape_cast %86 : vector<17x8xf32> to vector<1x17x8xf32>
    %91 = tpu.concatenate %87, %88, %89, %90 in 0 : vector<1x17x8xf32>, vector<1x17x8xf32>, vector<1x17x8xf32>, vector<1x17x8xf32> -> vector<4x17x8xf32>
    %92 = arith.truncf %73 : vector<4x17x8xf32> to vector<4x17x8xbf16>
    %93 = arith.truncf %82 : vector<4x17x8xf32> to vector<4x17x8xbf16>
    %cst_31 = arith.constant dense<0.000000e+00> : vector<4x17x17xf32>
    %94 = tpu.matmul %92, %93, %cst_31 {dimension_numbers = #tpu.dot_dimension_numbers<[2], [2], [1], [1], [0, 0, 0, 1, 1, 1], [0], [0]>} : vector<4x17x8xbf16>, vector<4x17x8xbf16>, vector<4x17x17xf32> -> vector<4x17x17xf32>
    %cst_32 = arith.constant 0.353553385 : f32
    %95 = vector.broadcast %cst_32 : f32 to vector<4x17x17xf32>
    %96 = arith.mulf %94, %95 : vector<4x17x17xf32>
    %cst_33 = arith.constant dense<0xFF800000> : vector<4x17xf32>
    %97 = vector.multi_reduction <maximumf>, %96, %cst_33 [2] : vector<4x17x17xf32> to vector<4x17xf32>
    %98 = vector.shape_cast %97 : vector<4x17xf32> to vector<4x17x1xf32>
    %99 = vector.broadcast %98 : vector<4x17x1xf32> to vector<4x17x17xf32>
    %100 = arith.subf %96, %99 : vector<4x17x17xf32>
    %101 = math.exp %100 : vector<4x17x17xf32>
    %cst_34 = arith.constant dense<0.000000e+00> : vector<4x17xf32>
    %102 = vector.multi_reduction <add>, %101, %cst_34 [2] : vector<4x17x17xf32> to vector<4x17xf32>
    %103 = vector.shape_cast %102 : vector<4x17xf32> to vector<4x17x1xf32>
    %104 = tpu.reciprocal %103 {approx = true} : vector<4x17x1xf32> -> vector<4x17x1xf32>
    %105 = vector.broadcast %104 : vector<4x17x1xf32> to vector<4x17x17xf32>
    %106 = arith.mulf %101, %105 : vector<4x17x17xf32>
    %107 = arith.truncf %106 : vector<4x17x17xf32> to vector<4x17x17xbf16>
    %108 = arith.truncf %91 : vector<4x17x8xf32> to vector<4x17x8xbf16>
    %cst_35 = arith.constant dense<0.000000e+00> : vector<4x17x8xf32>
    %109 = tpu.matmul %107, %108, %cst_35 {dimension_numbers = #tpu.dot_dimension_numbers<[2], [1], [1], [2], [0, 0, 0, 1, 1, 2], [0], [0]>} : vector<4x17x17xbf16>, vector<4x17x8xbf16>, vector<4x17x8xf32> -> vector<4x17x8xf32>
    %110 = vector.extract_strided_slice %109 {offsets = [0, 0, 0], sizes = [1, 17, 8], strides = [1, 1, 1]} : vector<4x17x8xf32> to vector<1x17x8xf32>
    %111 = vector.shape_cast %110 : vector<1x17x8xf32> to vector<17x8xf32>
    %112 = vector.extract_strided_slice %109 {offsets = [1, 0, 0], sizes = [1, 17, 8], strides = [1, 1, 1]} : vector<4x17x8xf32> to vector<1x17x8xf32>
    %113 = vector.shape_cast %112 : vector<1x17x8xf32> to vector<17x8xf32>
    %114 = vector.extract_strided_slice %109 {offsets = [2, 0, 0], sizes = [1, 17, 8], strides = [1, 1, 1]} : vector<4x17x8xf32> to vector<1x17x8xf32>
    %115 = vector.shape_cast %114 : vector<1x17x8xf32> to vector<17x8xf32>
    %116 = vector.extract_strided_slice %109 {offsets = [3, 0, 0], sizes = [1, 17, 8], strides = [1, 1, 1]} : vector<4x17x8xf32> to vector<1x17x8xf32>
    %117 = vector.shape_cast %116 : vector<1x17x8xf32> to vector<17x8xf32>
    %118 = tpu.concatenate %111, %113, %115, %117 in 1 : vector<17x8xf32>, vector<17x8xf32>, vector<17x8xf32>, vector<17x8xf32> -> vector<17x32xf32>
    %c0_36 = arith.constant 0 : index
    %c0_37 = arith.constant 0 : index
    %119 = vector.load %arg11[%c0_36, %c0_37] : memref<32x32xf32, #tpu.memory_space<vmem>>, vector<32x32xf32>
    %c0_38 = arith.constant 0 : index
    %c0_39 = arith.constant 0 : index
    %120 = vector.load %arg12[%c0_38, %c0_39] : memref<1x32xf32, #tpu.memory_space<vmem>>, vector<1x32xf32>
    %121 = arith.truncf %118 : vector<17x32xf32> to vector<17x32xbf16>
    %122 = arith.truncf %119 : vector<32x32xf32> to vector<32x32xbf16>
    %cst_40 = arith.constant dense<0.000000e+00> : vector<17x32xf32>
    %123 = tpu.matmul %121, %122, %cst_40 {dimension_numbers = #tpu.dot_dimension_numbers<[1], [0], [0], [1], [0, 0, 1, 1], [], []>} : vector<17x32xbf16>, vector<32x32xbf16>, vector<17x32xf32> -> vector<17x32xf32>
    %124 = vector.broadcast %120 : vector<1x32xf32> to vector<17x32xf32>
    %125 = arith.addf %123, %124 : vector<17x32xf32>
    %126 = arith.addf %33, %125 : vector<17x32xf32>
    %c0_41 = arith.constant 0 : index
    %c0_42 = arith.constant 0 : index
    %127 = vector.load %arg13[%c0_41, %c0_42] : memref<1x32xf32, #tpu.memory_space<vmem>>, vector<1x32xf32>
    %c0_43 = arith.constant 0 : index
    %c0_44 = arith.constant 0 : index
    %128 = vector.load %arg14[%c0_43, %c0_44] : memref<1x32xf32, #tpu.memory_space<vmem>>, vector<1x32xf32>
    %cst_45 = arith.constant dense<0.000000e+00> : vector<17xf32>
    %129 = vector.multi_reduction <add>, %126, %cst_45 [1] : vector<17x32xf32> to vector<17xf32>
    %130 = vector.shape_cast %129 : vector<17xf32> to vector<17x1xf32>
    %cst_46 = arith.constant 3.200000e+01 : f32
    %131 = vector.broadcast %cst_46 : f32 to vector<17x1xf32>
    %132 = arith.divf %130, %131 : vector<17x1xf32>
    %133 = vector.broadcast %132 : vector<17x1xf32> to vector<17x32xf32>
    %134 = arith.subf %126, %133 : vector<17x32xf32>
    %135 = arith.mulf %134, %134 : vector<17x32xf32>
    %cst_47 = arith.constant dense<0.000000e+00> : vector<17xf32>
    %136 = vector.multi_reduction <add>, %135, %cst_47 [1] : vector<17x32xf32> to vector<17xf32>
    %137 = vector.shape_cast %136 : vector<17xf32> to vector<17x1xf32>
    %cst_48 = arith.constant 3.200000e+01 : f32
    %138 = vector.broadcast %cst_48 : f32 to vector<17x1xf32>
    %139 = arith.divf %137, %138 : vector<17x1xf32>
    %140 = vector.broadcast %132 : vector<17x1xf32> to vector<17x32xf32>
    %141 = arith.subf %126, %140 : vector<17x32xf32>
    %cst_49 = arith.constant 9.99999974E-6 : f32
    %142 = vector.broadcast %cst_49 : f32 to vector<17x1xf32>
    %143 = arith.addf %139, %142 : vector<17x1xf32>
    %144 = math.rsqrt %143 : vector<17x1xf32>
    %145 = vector.broadcast %144 : vector<17x1xf32> to vector<17x32xf32>
    %146 = arith.mulf %141, %145 : vector<17x32xf32>
    %147 = vector.broadcast %127 : vector<1x32xf32> to vector<17x32xf32>
    %148 = arith.mulf %146, %147 : vector<17x32xf32>
    %149 = vector.broadcast %128 : vector<1x32xf32> to vector<17x32xf32>
    %150 = arith.addf %148, %149 : vector<17x32xf32>
    %c0_50 = arith.constant 0 : index
    %c0_51 = arith.constant 0 : index
    %151 = vector.load %arg15[%c0_50, %c0_51] : memref<32x128xf32, #tpu.memory_space<vmem>>, vector<32x128xf32>
    %c0_52 = arith.constant 0 : index
    %c0_53 = arith.constant 0 : index
    %152 = vector.load %arg16[%c0_52, %c0_53] : memref<1x128xf32, #tpu.memory_space<vmem>>, vector<1x128xf32>
    %153 = arith.truncf %150 : vector<17x32xf32> to vector<17x32xbf16>
    %154 = arith.truncf %151 : vector<32x128xf32> to vector<32x128xbf16>
    %cst_54 = arith.constant dense<0.000000e+00> : vector<17x128xf32>
    %155 = tpu.matmul %153, %154, %cst_54 {dimension_numbers = #tpu.dot_dimension_numbers<[1], [0], [0], [1], [0, 0, 1, 1], [], []>} : vector<17x32xbf16>, vector<32x128xbf16>, vector<17x128xf32> -> vector<17x128xf32>
    %156 = vector.broadcast %152 : vector<1x128xf32> to vector<17x128xf32>
    %157 = arith.addf %155, %156 : vector<17x128xf32>
    %158 = arith.mulf %157, %157 : vector<17x128xf32>
    %159 = arith.mulf %157, %158 : vector<17x128xf32>
    %cst_55 = arith.constant 4.471500e-02 : f32
    %160 = vector.broadcast %cst_55 : f32 to vector<17x128xf32>
    %161 = arith.mulf %160, %159 : vector<17x128xf32>
    %162 = arith.addf %157, %161 : vector<17x128xf32>
    %cst_56 = arith.constant 0.797884583 : f32
    %163 = vector.broadcast %cst_56 : f32 to vector<17x128xf32>
    %164 = arith.mulf %163, %162 : vector<17x128xf32>
    %165 = math.tanh %164 : vector<17x128xf32>
    %cst_57 = arith.constant 1.000000e+00 : f32
    %166 = vector.broadcast %cst_57 : f32 to vector<17x128xf32>
    %167 = arith.addf %166, %165 : vector<17x128xf32>
    %cst_58 = arith.constant 5.000000e-01 : f32
    %168 = vector.broadcast %cst_58 : f32 to vector<17x128xf32>
    %169 = arith.mulf %168, %167 : vector<17x128xf32>
    %170 = arith.mulf %157, %169 : vector<17x128xf32>
    %c0_59 = arith.constant 0 : index
    %c0_60 = arith.constant 0 : index
    %171 = vector.load %arg17[%c0_59, %c0_60] : memref<128x32xf32, #tpu.memory_space<vmem>>, vector<128x32xf32>
    %c0_61 = arith.constant 0 : index
    %c0_62 = arith.constant 0 : index
    %172 = vector.load %arg18[%c0_61, %c0_62] : memref<1x32xf32, #tpu.memory_space<vmem>>, vector<1x32xf32>
    %173 = arith.truncf %170 : vector<17x128xf32> to vector<17x128xbf16>
    %174 = arith.truncf %171 : vector<128x32xf32> to vector<128x32xbf16>
    %cst_63 = arith.constant dense<0.000000e+00> : vector<17x32xf32>
    %175 = tpu.matmul %173, %174, %cst_63 {dimension_numbers = #tpu.dot_dimension_numbers<[1], [0], [0], [1], [0, 0, 1, 1], [], []>} : vector<17x128xbf16>, vector<128x32xbf16>, vector<17x32xf32> -> vector<17x32xf32>
    %176 = vector.broadcast %172 : vector<1x32xf32> to vector<17x32xf32>
    %177 = arith.addf %175, %176 : vector<17x32xf32>
    %178 = arith.addf %126, %177 : vector<17x32xf32>
    %c0_64 = arith.constant 0 : index
    %c0_65 = arith.constant 0 : index
    %179 = vector.load %arg19[%c0_64, %c0_65] : memref<1x32xf32, #tpu.memory_space<vmem>>, vector<1x32xf32>
    %c0_66 = arith.constant 0 : index
    %c0_67 = arith.constant 0 : index
    %180 = vector.load %arg20[%c0_66, %c0_67] : memref<1x32xf32, #tpu.memory_space<vmem>>, vector<1x32xf32>
    %cst_68 = arith.constant dense<0.000000e+00> : vector<17xf32>
    %181 = vector.multi_reduction <add>, %178, %cst_68 [1] : vector<17x32xf32> to vector<17xf32>
    %182 = vector.shape_cast %181 : vector<17xf32> to vector<17x1xf32>
    %cst_69 = arith.constant 3.200000e+01 : f32
    %183 = vector.broadcast %cst_69 : f32 to vector<17x1xf32>
    %184 = arith.divf %182, %183 : vector<17x1xf32>
    %185 = vector.broadcast %184 : vector<17x1xf32> to vector<17x32xf32>
    %186 = arith.subf %178, %185 : vector<17x32xf32>
    %187 = arith.mulf %186, %186 : vector<17x32xf32>
    %cst_70 = arith.constant dense<0.000000e+00> : vector<17xf32>
    %188 = vector.multi_reduction <add>, %187, %cst_70 [1] : vector<17x32xf32> to vector<17xf32>
    %189 = vector.shape_cast %188 : vector<17xf32> to vector<17x1xf32>
    %cst_71 = arith.constant 3.200000e+01 : f32
    %190 = vector.broadcast %cst_71 : f32 to vector<17x1xf32>
    %191 = arith.divf %189, %190 : vector<17x1xf32>
    %192 = vector.broadcast %184 : vector<17x1xf32> to vector<17x32xf32>
    %193 = arith.subf %178, %192 : vector<17x32xf32>
    %cst_72 = arith.constant 9.99999974E-6 : f32
    %194 = vector.broadcast %cst_72 : f32 to vector<17x1xf32>
    %195 = arith.addf %191, %194 : vector<17x1xf32>
    %196 = math.rsqrt %195 : vector<17x1xf32>
    %197 = vector.broadcast %196 : vector<17x1xf32> to vector<17x32xf32>
    %198 = arith.mulf %193, %197 : vector<17x32xf32>
    %199 = vector.broadcast %179 : vector<1x32xf32> to vector<17x32xf32>
    %200 = arith.mulf %198, %199 : vector<17x32xf32>
    %201 = vector.broadcast %180 : vector<1x32xf32> to vector<17x32xf32>
    %202 = arith.addf %200, %201 : vector<17x32xf32>
    %c0_73 = arith.constant 0 : index
    %c0_74 = arith.constant 0 : index
    %203 = vector.load %arg21[%c0_73, %c0_74] : memref<32x96xf32, #tpu.memory_space<vmem>>, vector<32x96xf32>
    %c0_75 = arith.constant 0 : index
    %c0_76 = arith.constant 0 : index
    %204 = vector.load %arg22[%c0_75, %c0_76] : memref<1x96xf32, #tpu.memory_space<vmem>>, vector<1x96xf32>
    %205 = arith.truncf %202 : vector<17x32xf32> to vector<17x32xbf16>
    %206 = arith.truncf %203 : vector<32x96xf32> to vector<32x96xbf16>
    %cst_77 = arith.constant dense<0.000000e+00> : vector<17x96xf32>
    %207 = tpu.matmul %205, %206, %cst_77 {dimension_numbers = #tpu.dot_dimension_numbers<[1], [0], [0], [1], [0, 0, 1, 1], [], []>} : vector<17x32xbf16>, vector<32x96xbf16>, vector<17x96xf32> -> vector<17x96xf32>
    %208 = vector.broadcast %204 : vector<1x96xf32> to vector<17x96xf32>
    %209 = arith.addf %207, %208 : vector<17x96xf32>
    %210 = vector.extract_strided_slice %209 {offsets = [0, 0], sizes = [17, 8], strides = [1, 1]} : vector<17x96xf32> to vector<17x8xf32>
    %211 = vector.extract_strided_slice %209 {offsets = [0, 8], sizes = [17, 8], strides = [1, 1]} : vector<17x96xf32> to vector<17x8xf32>
    %212 = vector.extract_strided_slice %209 {offsets = [0, 16], sizes = [17, 8], strides = [1, 1]} : vector<17x96xf32> to vector<17x8xf32>
    %213 = vector.extract_strided_slice %209 {offsets = [0, 24], sizes = [17, 8], strides = [1, 1]} : vector<17x96xf32> to vector<17x8xf32>
    %214 = vector.shape_cast %210 : vector<17x8xf32> to vector<1x17x8xf32>
    %215 = vector.shape_cast %211 : vector<17x8xf32> to vector<1x17x8xf32>
    %216 = vector.shape_cast %212 : vector<17x8xf32> to vector<1x17x8xf32>
    %217 = vector.shape_cast %213 : vector<17x8xf32> to vector<1x17x8xf32>
    %218 = tpu.concatenate %214, %215, %216, %217 in 0 : vector<1x17x8xf32>, vector<1x17x8xf32>, vector<1x17x8xf32>, vector<1x17x8xf32> -> vector<4x17x8xf32>
    %219 = vector.extract_strided_slice %209 {offsets = [0, 32], sizes = [17, 8], strides = [1, 1]} : vector<17x96xf32> to vector<17x8xf32>
    %220 = vector.extract_strided_slice %209 {offsets = [0, 40], sizes = [17, 8], strides = [1, 1]} : vector<17x96xf32> to vector<17x8xf32>
    %221 = vector.extract_strided_slice %209 {offsets = [0, 48], sizes = [17, 8], strides = [1, 1]} : vector<17x96xf32> to vector<17x8xf32>
    %222 = vector.extract_strided_slice %209 {offsets = [0, 56], sizes = [17, 8], strides = [1, 1]} : vector<17x96xf32> to vector<17x8xf32>
    %223 = vector.shape_cast %219 : vector<17x8xf32> to vector<1x17x8xf32>
    %224 = vector.shape_cast %220 : vector<17x8xf32> to vector<1x17x8xf32>
    %225 = vector.shape_cast %221 : vector<17x8xf32> to vector<1x17x8xf32>
    %226 = vector.shape_cast %222 : vector<17x8xf32> to vector<1x17x8xf32>
    %227 = tpu.concatenate %223, %224, %225, %226 in 0 : vector<1x17x8xf32>, vector<1x17x8xf32>, vector<1x17x8xf32>, vector<1x17x8xf32> -> vector<4x17x8xf32>
    %228 = vector.extract_strided_slice %209 {offsets = [0, 64], sizes = [17, 8], strides = [1, 1]} : vector<17x96xf32> to vector<17x8xf32>
    %229 = vector.extract_strided_slice %209 {offsets = [0, 72], sizes = [17, 8], strides = [1, 1]} : vector<17x96xf32> to vector<17x8xf32>
    %230 = vector.extract_strided_slice %209 {offsets = [0, 80], sizes = [17, 8], strides = [1, 1]} : vector<17x96xf32> to vector<17x8xf32>
    %231 = vector.extract_strided_slice %209 {offsets = [0, 88], sizes = [17, 8], strides = [1, 1]} : vector<17x96xf32> to vector<17x8xf32>
    %232 = vector.shape_cast %228 : vector<17x8xf32> to vector<1x17x8xf32>
    %233 = vector.shape_cast %229 : vector<17x8xf32> to vector<1x17x8xf32>
    %234 = vector.shape_cast %230 : vector<17x8xf32> to vector<1x17x8xf32>
    %235 = vector.shape_cast %231 : vector<17x8xf32> to vector<1x17x8xf32>
    %236 = tpu.concatenate %232, %233, %234, %235 in 0 : vector<1x17x8xf32>, vector<1x17x8xf32>, vector<1x17x8xf32>, vector<1x17x8xf32> -> vector<4x17x8xf32>
    %237 = arith.truncf %218 : vector<4x17x8xf32> to vector<4x17x8xbf16>
    %238 = arith.truncf %227 : vector<4x17x8xf32> to vector<4x17x8xbf16>
    %cst_78 = arith.constant dense<0.000000e+00> : vector<4x17x17xf32>
    %239 = tpu.matmul %237, %238, %cst_78 {dimension_numbers = #tpu.dot_dimension_numbers<[2], [2], [1], [1], [0, 0, 0, 1, 1, 1], [0], [0]>} : vector<4x17x8xbf16>, vector<4x17x8xbf16>, vector<4x17x17xf32> -> vector<4x17x17xf32>
    %cst_79 = arith.constant 0.353553385 : f32
    %240 = vector.broadcast %cst_79 : f32 to vector<4x17x17xf32>
    %241 = arith.mulf %239, %240 : vector<4x17x17xf32>
    %cst_80 = arith.constant dense<0xFF800000> : vector<4x17xf32>
    %242 = vector.multi_reduction <maximumf>, %241, %cst_80 [2] : vector<4x17x17xf32> to vector<4x17xf32>
    %243 = vector.shape_cast %242 : vector<4x17xf32> to vector<4x17x1xf32>
    %244 = vector.broadcast %243 : vector<4x17x1xf32> to vector<4x17x17xf32>
    %245 = arith.subf %241, %244 : vector<4x17x17xf32>
    %246 = math.exp %245 : vector<4x17x17xf32>
    %cst_81 = arith.constant dense<0.000000e+00> : vector<4x17xf32>
    %247 = vector.multi_reduction <add>, %246, %cst_81 [2] : vector<4x17x17xf32> to vector<4x17xf32>
    %248 = vector.shape_cast %247 : vector<4x17xf32> to vector<4x17x1xf32>
    %249 = tpu.reciprocal %248 {approx = true} : vector<4x17x1xf32> -> vector<4x17x1xf32>
    %250 = vector.broadcast %249 : vector<4x17x1xf32> to vector<4x17x17xf32>
    %251 = arith.mulf %246, %250 : vector<4x17x17xf32>
    %252 = arith.truncf %251 : vector<4x17x17xf32> to vector<4x17x17xbf16>
    %253 = arith.truncf %236 : vector<4x17x8xf32> to vector<4x17x8xbf16>
    %cst_82 = arith.constant dense<0.000000e+00> : vector<4x17x8xf32>
    %254 = tpu.matmul %252, %253, %cst_82 {dimension_numbers = #tpu.dot_dimension_numbers<[2], [1], [1], [2], [0, 0, 0, 1, 1, 2], [0], [0]>} : vector<4x17x17xbf16>, vector<4x17x8xbf16>, vector<4x17x8xf32> -> vector<4x17x8xf32>
    %255 = vector.extract_strided_slice %254 {offsets = [0, 0, 0], sizes = [1, 17, 8], strides = [1, 1, 1]} : vector<4x17x8xf32> to vector<1x17x8xf32>
    %256 = vector.shape_cast %255 : vector<1x17x8xf32> to vector<17x8xf32>
    %257 = vector.extract_strided_slice %254 {offsets = [1, 0, 0], sizes = [1, 17, 8], strides = [1, 1, 1]} : vector<4x17x8xf32> to vector<1x17x8xf32>
    %258 = vector.shape_cast %257 : vector<1x17x8xf32> to vector<17x8xf32>
    %259 = vector.extract_strided_slice %254 {offsets = [2, 0, 0], sizes = [1, 17, 8], strides = [1, 1, 1]} : vector<4x17x8xf32> to vector<1x17x8xf32>
    %260 = vector.shape_cast %259 : vector<1x17x8xf32> to vector<17x8xf32>
    %261 = vector.extract_strided_slice %254 {offsets = [3, 0, 0], sizes = [1, 17, 8], strides = [1, 1, 1]} : vector<4x17x8xf32> to vector<1x17x8xf32>
    %262 = vector.shape_cast %261 : vector<1x17x8xf32> to vector<17x8xf32>
    %263 = tpu.concatenate %256, %258, %260, %262 in 1 : vector<17x8xf32>, vector<17x8xf32>, vector<17x8xf32>, vector<17x8xf32> -> vector<17x32xf32>
    %c0_83 = arith.constant 0 : index
    %c0_84 = arith.constant 0 : index
    %264 = vector.load %arg23[%c0_83, %c0_84] : memref<32x32xf32, #tpu.memory_space<vmem>>, vector<32x32xf32>
    %c0_85 = arith.constant 0 : index
    %c0_86 = arith.constant 0 : index
    %265 = vector.load %arg24[%c0_85, %c0_86] : memref<1x32xf32, #tpu.memory_space<vmem>>, vector<1x32xf32>
    %266 = arith.truncf %263 : vector<17x32xf32> to vector<17x32xbf16>
    %267 = arith.truncf %264 : vector<32x32xf32> to vector<32x32xbf16>
    %cst_87 = arith.constant dense<0.000000e+00> : vector<17x32xf32>
    %268 = tpu.matmul %266, %267, %cst_87 {dimension_numbers = #tpu.dot_dimension_numbers<[1], [0], [0], [1], [0, 0, 1, 1], [], []>} : vector<17x32xbf16>, vector<32x32xbf16>, vector<17x32xf32> -> vector<17x32xf32>
    %269 = vector.broadcast %265 : vector<1x32xf32> to vector<17x32xf32>
    %270 = arith.addf %268, %269 : vector<17x32xf32>
    %271 = arith.addf %178, %270 : vector<17x32xf32>
    %c0_88 = arith.constant 0 : index
    %c0_89 = arith.constant 0 : index
    %272 = vector.load %arg25[%c0_88, %c0_89] : memref<1x32xf32, #tpu.memory_space<vmem>>, vector<1x32xf32>
    %c0_90 = arith.constant 0 : index
    %c0_91 = arith.constant 0 : index
    %273 = vector.load %arg26[%c0_90, %c0_91] : memref<1x32xf32, #tpu.memory_space<vmem>>, vector<1x32xf32>
    %cst_92 = arith.constant dense<0.000000e+00> : vector<17xf32>
    %274 = vector.multi_reduction <add>, %271, %cst_92 [1] : vector<17x32xf32> to vector<17xf32>
    %275 = vector.shape_cast %274 : vector<17xf32> to vector<17x1xf32>
    %cst_93 = arith.constant 3.200000e+01 : f32
    %276 = vector.broadcast %cst_93 : f32 to vector<17x1xf32>
    %277 = arith.divf %275, %276 : vector<17x1xf32>
    %278 = vector.broadcast %277 : vector<17x1xf32> to vector<17x32xf32>
    %279 = arith.subf %271, %278 : vector<17x32xf32>
    %280 = arith.mulf %279, %279 : vector<17x32xf32>
    %cst_94 = arith.constant dense<0.000000e+00> : vector<17xf32>
    %281 = vector.multi_reduction <add>, %280, %cst_94 [1] : vector<17x32xf32> to vector<17xf32>
    %282 = vector.shape_cast %281 : vector<17xf32> to vector<17x1xf32>
    %cst_95 = arith.constant 3.200000e+01 : f32
    %283 = vector.broadcast %cst_95 : f32 to vector<17x1xf32>
    %284 = arith.divf %282, %283 : vector<17x1xf32>
    %285 = vector.broadcast %277 : vector<17x1xf32> to vector<17x32xf32>
    %286 = arith.subf %271, %285 : vector<17x32xf32>
    %cst_96 = arith.constant 9.99999974E-6 : f32
    %287 = vector.broadcast %cst_96 : f32 to vector<17x1xf32>
    %288 = arith.addf %284, %287 : vector<17x1xf32>
    %289 = math.rsqrt %288 : vector<17x1xf32>
    %290 = vector.broadcast %289 : vector<17x1xf32> to vector<17x32xf32>
    %291 = arith.mulf %286, %290 : vector<17x32xf32>
    %292 = vector.broadcast %272 : vector<1x32xf32> to vector<17x32xf32>
    %293 = arith.mulf %291, %292 : vector<17x32xf32>
    %294 = vector.broadcast %273 : vector<1x32xf32> to vector<17x32xf32>
    %295 = arith.addf %293, %294 : vector<17x32xf32>
    %c0_97 = arith.constant 0 : index
    %c0_98 = arith.constant 0 : index
    %296 = vector.load %arg27[%c0_97, %c0_98] : memref<32x128xf32, #tpu.memory_space<vmem>>, vector<32x128xf32>
    %c0_99 = arith.constant 0 : index
    %c0_100 = arith.constant 0 : index
    %297 = vector.load %arg28[%c0_99, %c0_100] : memref<1x128xf32, #tpu.memory_space<vmem>>, vector<1x128xf32>
    %298 = arith.truncf %295 : vector<17x32xf32> to vector<17x32xbf16>
    %299 = arith.truncf %296 : vector<32x128xf32> to vector<32x128xbf16>
    %cst_101 = arith.constant dense<0.000000e+00> : vector<17x128xf32>
    %300 = tpu.matmul %298, %299, %cst_101 {dimension_numbers = #tpu.dot_dimension_numbers<[1], [0], [0], [1], [0, 0, 1, 1], [], []>} : vector<17x32xbf16>, vector<32x128xbf16>, vector<17x128xf32> -> vector<17x128xf32>
    %301 = vector.broadcast %297 : vector<1x128xf32> to vector<17x128xf32>
    %302 = arith.addf %300, %301 : vector<17x128xf32>
    %303 = arith.mulf %302, %302 : vector<17x128xf32>
    %304 = arith.mulf %302, %303 : vector<17x128xf32>
    %cst_102 = arith.constant 4.471500e-02 : f32
    %305 = vector.broadcast %cst_102 : f32 to vector<17x128xf32>
    %306 = arith.mulf %305, %304 : vector<17x128xf32>
    %307 = arith.addf %302, %306 : vector<17x128xf32>
    %cst_103 = arith.constant 0.797884583 : f32
    %308 = vector.broadcast %cst_103 : f32 to vector<17x128xf32>
    %309 = arith.mulf %308, %307 : vector<17x128xf32>
    %310 = math.tanh %309 : vector<17x128xf32>
    %cst_104 = arith.constant 1.000000e+00 : f32
    %311 = vector.broadcast %cst_104 : f32 to vector<17x128xf32>
    %312 = arith.addf %311, %310 : vector<17x128xf32>
    %cst_105 = arith.constant 5.000000e-01 : f32
    %313 = vector.broadcast %cst_105 : f32 to vector<17x128xf32>
    %314 = arith.mulf %313, %312 : vector<17x128xf32>
    %315 = arith.mulf %302, %314 : vector<17x128xf32>
    %c0_106 = arith.constant 0 : index
    %c0_107 = arith.constant 0 : index
    %316 = vector.load %arg29[%c0_106, %c0_107] : memref<128x32xf32, #tpu.memory_space<vmem>>, vector<128x32xf32>
    %c0_108 = arith.constant 0 : index
    %c0_109 = arith.constant 0 : index
    %317 = vector.load %arg30[%c0_108, %c0_109] : memref<1x32xf32, #tpu.memory_space<vmem>>, vector<1x32xf32>
    %318 = arith.truncf %315 : vector<17x128xf32> to vector<17x128xbf16>
    %319 = arith.truncf %316 : vector<128x32xf32> to vector<128x32xbf16>
    %cst_110 = arith.constant dense<0.000000e+00> : vector<17x32xf32>
    %320 = tpu.matmul %318, %319, %cst_110 {dimension_numbers = #tpu.dot_dimension_numbers<[1], [0], [0], [1], [0, 0, 1, 1], [], []>} : vector<17x128xbf16>, vector<128x32xbf16>, vector<17x32xf32> -> vector<17x32xf32>
    %321 = vector.broadcast %317 : vector<1x32xf32> to vector<17x32xf32>
    %322 = arith.addf %320, %321 : vector<17x32xf32>
    %323 = arith.addf %271, %322 : vector<17x32xf32>
    %c0_111 = arith.constant 0 : index
    %c0_112 = arith.constant 0 : index
    %324 = vector.load %arg31[%c0_111, %c0_112] : memref<1x32xf32, #tpu.memory_space<vmem>>, vector<1x32xf32>
    %c0_113 = arith.constant 0 : index
    %c0_114 = arith.constant 0 : index
    %325 = vector.load %arg32[%c0_113, %c0_114] : memref<1x32xf32, #tpu.memory_space<vmem>>, vector<1x32xf32>
    %cst_115 = arith.constant dense<0.000000e+00> : vector<17xf32>
    %326 = vector.multi_reduction <add>, %323, %cst_115 [1] : vector<17x32xf32> to vector<17xf32>
    %327 = vector.shape_cast %326 : vector<17xf32> to vector<17x1xf32>
    %cst_116 = arith.constant 3.200000e+01 : f32
    %328 = vector.broadcast %cst_116 : f32 to vector<17x1xf32>
    %329 = arith.divf %327, %328 : vector<17x1xf32>
    %330 = vector.broadcast %329 : vector<17x1xf32> to vector<17x32xf32>
    %331 = arith.subf %323, %330 : vector<17x32xf32>
    %332 = arith.mulf %331, %331 : vector<17x32xf32>
    %cst_117 = arith.constant dense<0.000000e+00> : vector<17xf32>
    %333 = vector.multi_reduction <add>, %332, %cst_117 [1] : vector<17x32xf32> to vector<17xf32>
    %334 = vector.shape_cast %333 : vector<17xf32> to vector<17x1xf32>
    %cst_118 = arith.constant 3.200000e+01 : f32
    %335 = vector.broadcast %cst_118 : f32 to vector<17x1xf32>
    %336 = arith.divf %334, %335 : vector<17x1xf32>
    %337 = vector.broadcast %329 : vector<17x1xf32> to vector<17x32xf32>
    %338 = arith.subf %323, %337 : vector<17x32xf32>
    %cst_119 = arith.constant 9.99999974E-6 : f32
    %339 = vector.broadcast %cst_119 : f32 to vector<17x1xf32>
    %340 = arith.addf %336, %339 : vector<17x1xf32>
    %341 = math.rsqrt %340 : vector<17x1xf32>
    %342 = vector.broadcast %341 : vector<17x1xf32> to vector<17x32xf32>
    %343 = arith.mulf %338, %342 : vector<17x32xf32>
    %344 = vector.broadcast %324 : vector<1x32xf32> to vector<17x32xf32>
    %345 = arith.mulf %343, %344 : vector<17x32xf32>
    %346 = vector.broadcast %325 : vector<1x32xf32> to vector<17x32xf32>
    %347 = arith.addf %345, %346 : vector<17x32xf32>
    %c0_120 = arith.constant 0 : index
    %c0_121 = arith.constant 0 : index
    %348 = vector.load %arg33[%c0_120, %c0_121] : memref<32x64xf32, #tpu.memory_space<vmem>>, vector<32x64xf32>
    %c0_122 = arith.constant 0 : index
    %c0_123 = arith.constant 0 : index
    %349 = vector.load %arg34[%c0_122, %c0_123] : memref<1x64xf32, #tpu.memory_space<vmem>>, vector<1x64xf32>
    %350 = arith.truncf %347 : vector<17x32xf32> to vector<17x32xbf16>
    %351 = arith.truncf %348 : vector<32x64xf32> to vector<32x64xbf16>
    %cst_124 = arith.constant dense<0.000000e+00> : vector<17x64xf32>
    %352 = tpu.matmul %350, %351, %cst_124 {dimension_numbers = #tpu.dot_dimension_numbers<[1], [0], [0], [1], [0, 0, 1, 1], [], []>} : vector<17x32xbf16>, vector<32x64xbf16>, vector<17x64xf32> -> vector<17x64xf32>
    %353 = vector.broadcast %349 : vector<1x64xf32> to vector<17x64xf32>
    %354 = arith.addf %352, %353 : vector<17x64xf32>
    %355 = arith.mulf %354, %354 : vector<17x64xf32>
    %356 = arith.mulf %354, %355 : vector<17x64xf32>
    %cst_125 = arith.constant 4.471500e-02 : f32
    %357 = vector.broadcast %cst_125 : f32 to vector<17x64xf32>
    %358 = arith.mulf %357, %356 : vector<17x64xf32>
    %359 = arith.addf %354, %358 : vector<17x64xf32>
    %cst_126 = arith.constant 0.797884583 : f32
    %360 = vector.broadcast %cst_126 : f32 to vector<17x64xf32>
    %361 = arith.mulf %360, %359 : vector<17x64xf32>
    %362 = math.tanh %361 : vector<17x64xf32>
    %cst_127 = arith.constant 1.000000e+00 : f32
    %363 = vector.broadcast %cst_127 : f32 to vector<17x64xf32>
    %364 = arith.addf %363, %362 : vector<17x64xf32>
    %cst_128 = arith.constant 5.000000e-01 : f32
    %365 = vector.broadcast %cst_128 : f32 to vector<17x64xf32>
    %366 = arith.mulf %365, %364 : vector<17x64xf32>
    %367 = arith.mulf %354, %366 : vector<17x64xf32>
    %cst_129 = arith.constant dense<0xFF800000> : vector<64xf32>
    %368 = vector.multi_reduction <maximumf>, %367, %cst_129 [0] : vector<17x64xf32> to vector<64xf32>
    %369 = vector.shape_cast %368 : vector<64xf32> to vector<1x64xf32>
    %c0_130 = arith.constant 0 : index
    %c0_131 = arith.constant 0 : index
    %370 = vector.load %arg35[%c0_130, %c0_131] : memref<1x64xf32, #tpu.memory_space<vmem>>, vector<1x64xf32>
    %c0_132 = arith.constant 0 : index
    %c0_133 = arith.constant 0 : index
    %371 = vector.load %arg36[%c0_132, %c0_133] : memref<1x64xf32, #tpu.memory_space<vmem>>, vector<1x64xf32>
    %cst_134 = arith.constant dense<0.000000e+00> : vector<1xf32>
    %372 = vector.multi_reduction <add>, %369, %cst_134 [1] : vector<1x64xf32> to vector<1xf32>
    %373 = vector.shape_cast %372 : vector<1xf32> to vector<1x1xf32>
    %cst_135 = arith.constant 6.400000e+01 : f32
    %374 = vector.broadcast %cst_135 : f32 to vector<1x1xf32>
    %375 = arith.divf %373, %374 : vector<1x1xf32>
    %376 = vector.broadcast %375 : vector<1x1xf32> to vector<1x64xf32>
    %377 = arith.subf %369, %376 : vector<1x64xf32>
    %378 = arith.mulf %377, %377 : vector<1x64xf32>
    %cst_136 = arith.constant dense<0.000000e+00> : vector<1xf32>
    %379 = vector.multi_reduction <add>, %378, %cst_136 [1] : vector<1x64xf32> to vector<1xf32>
    %380 = vector.shape_cast %379 : vector<1xf32> to vector<1x1xf32>
    %cst_137 = arith.constant 6.400000e+01 : f32
    %381 = vector.broadcast %cst_137 : f32 to vector<1x1xf32>
    %382 = arith.divf %380, %381 : vector<1x1xf32>
    %383 = vector.broadcast %375 : vector<1x1xf32> to vector<1x64xf32>
    %384 = arith.subf %369, %383 : vector<1x64xf32>
    %cst_138 = arith.constant 9.99999974E-6 : f32
    %385 = vector.broadcast %cst_138 : f32 to vector<1x1xf32>
    %386 = arith.addf %382, %385 : vector<1x1xf32>
    %387 = math.rsqrt %386 : vector<1x1xf32>
    %388 = vector.broadcast %387 : vector<1x1xf32> to vector<1x64xf32>
    %389 = arith.mulf %384, %388 : vector<1x64xf32>
    %390 = arith.mulf %389, %370 : vector<1x64xf32>
    %391 = arith.addf %390, %371 : vector<1x64xf32>
    %c0_139 = arith.constant 0 : index
    %c0_140 = arith.constant 0 : index
    %392 = vector.load %arg37[%c0_139, %c0_140] : memref<64x128xf32, #tpu.memory_space<vmem>>, vector<64x128xf32>
    %c0_141 = arith.constant 0 : index
    %c0_142 = arith.constant 0 : index
    %393 = vector.load %arg38[%c0_141, %c0_142] : memref<1x128xf32, #tpu.memory_space<vmem>>, vector<1x128xf32>
    %394 = arith.truncf %391 : vector<1x64xf32> to vector<1x64xbf16>
    %395 = arith.truncf %392 : vector<64x128xf32> to vector<64x128xbf16>
    %cst_143 = arith.constant dense<0.000000e+00> : vector<1x128xf32>
    %396 = tpu.matmul %394, %395, %cst_143 {dimension_numbers = #tpu.dot_dimension_numbers<[1], [0], [0], [1], [0, 0, 1, 1], [], []>} : vector<1x64xbf16>, vector<64x128xbf16>, vector<1x128xf32> -> vector<1x128xf32>
    %397 = arith.addf %396, %393 : vector<1x128xf32>
    %c0_144 = arith.constant 0 : index
    %c0_145 = arith.constant 0 : index
    %c0_146 = arith.constant 0 : index
    %398 = vector.load %arg39[%c0_144, %c0_145, %c0_146] : memref<1x1x128xf32, #tpu.memory_space<vmem>>, vector<1x1x128xf32>
    %399 = vector.shape_cast %398 : vector<1x1x128xf32> to vector<1x128xf32>
    %400 = vector.shape_cast %397 : vector<1x128xf32> to vector<1x1x128xf32>
    tpu.vector_store %arg39[%c0_144, %c0_145, %c0_146], %400 {strides = array<i32>} : memref<1x1x128xf32, #tpu.memory_space<vmem>>, vector<1x1x128xf32>,
    return
  }
  func.func @transform_0(%arg0: i32) -> (i32, i32, i32) {
    %c0_i32 = arith.constant 0 : i32
    %c0_i32_0 = arith.constant 0 : i32
    %c0_i32_1 = arith.constant 0 : i32
    return %arg0, %c0_i32, %c0_i32_0 : i32, i32, i32
  }
  func.func @transform_1(%arg0: i32) -> (i32, i32) {
    %c0_i32 = arith.constant 0 : i32
    %c0_i32_0 = arith.constant 0 : i32
    %c0_i32_1 = arith.constant 0 : i32
    return %c0_i32, %c0_i32_0 : i32, i32
  }
  func.func @transform_2(%arg0: i32) -> (i32, i32) {
    %c0_i32 = arith.constant 0 : i32
    %c0_i32_0 = arith.constant 0 : i32
    %c0_i32_1 = arith.constant 0 : i32
    return %c0_i32, %c0_i32_0 : i32, i32
  }
  func.func @transform_3(%arg0: i32) -> (i32, i32) {
    %c0_i32 = arith.constant 0 : i32
    %c0_i32_0 = arith.constant 0 : i32
    %c0_i32_1 = arith.constant 0 : i32
    return %c0_i32, %c0_i32_0 : i32, i32
  }
  func.func @transform_4(%arg0: i32) -> (i32, i32) {
    %c0_i32 = arith.constant 0 : i32
    %c0_i32_0 = arith.constant 0 : i32
    %c0_i32_1 = arith.constant 0 : i32
    return %c0_i32, %c0_i32_0 : i32, i32
  }
  func.func @transform_5(%arg0: i32) -> (i32, i32) {
    %c0_i32 = arith.constant 0 : i32
    %c0_i32_0 = arith.constant 0 : i32
    %c0_i32_1 = arith.constant 0 : i32
    return %c0_i32, %c0_i32_0 : i32, i32
  }
  func.func @transform_6(%arg0: i32) -> (i32, i32) {
    %c0_i32 = arith.constant 0 : i32
    %c0_i32_0 = arith.constant 0 : i32
    %c0_i32_1 = arith.constant 0 : i32
    return %c0_i32, %c0_i32_0 : i32, i32
  }
  func.func @transform_7(%arg0: i32) -> (i32, i32) {
    %c0_i32 = arith.constant 0 : i32
    %c0_i32_0 = arith.constant 0 : i32
    %c0_i32_1 = arith.constant 0 : i32
    return %c0_i32, %c0_i32_0 : i32, i32
  }
  func.func @transform_8(%arg0: i32) -> (i32, i32) {
    %c0_i32 = arith.constant 0 : i32
    %c0_i32_0 = arith.constant 0 : i32
    %c0_i32_1 = arith.constant 0 : i32
    return %c0_i32, %c0_i32_0 : i32, i32
  }
  func.func @transform_9(%arg0: i32) -> (i32, i32) {
    %c0_i32 = arith.constant 0 : i32
    %c0_i32_0 = arith.constant 0 : i32
    %c0_i32_1 = arith.constant 0 : i32
    return %c0_i32, %c0_i32_0 : i32, i32
  }
  func.func @transform_10(%arg0: i32) -> (i32, i32) {
    %c0_i32 = arith.constant 0 : i32
    %c0_i32_0 = arith.constant 0 : i32
    %c0_i32_1 = arith.constant 0 : i32
    return %c0_i32, %c0_i32_0 : i32, i32
  }
  func.func @transform_11(%arg0: i32) -> (i32, i32) {
    %c0_i32 = arith.constant 0 : i32
    %c0_i32_0 = arith.constant 0 : i32
    %c0_i32_1 = arith.constant 0 : i32
    return %c0_i32, %c0_i32_0 : i32, i32
  }
  func.func @transform_12(%arg0: i32) -> (i32, i32) {
    %c0_i32 = arith.constant 0 : i32
    %c0_i32_0 = arith.constant 0 : i32
    %c0_i32_1 = arith.constant 0 : i32
    return %c0_i32, %c0_i32_0 : i32, i32
  }
  func.func @transform_13(%arg0: i32) -> (i32, i32) {
    %c0_i32 = arith.constant 0 : i32
    %c0_i32_0 = arith.constant 0 : i32
    %c0_i32_1 = arith.constant 0 : i32
    return %c0_i32, %c0_i32_0 : i32, i32
  }
  func.func @transform_14(%arg0: i32) -> (i32, i32) {
    %c0_i32 = arith.constant 0 : i32
    %c0_i32_0 = arith.constant 0 : i32
    %c0_i32_1 = arith.constant 0 : i32
    return %c0_i32, %c0_i32_0 : i32, i32
  }
  func.func @transform_15(%arg0: i32) -> (i32, i32) {
    %c0_i32 = arith.constant 0 : i32
    %c0_i32_0 = arith.constant 0 : i32
    %c0_i32_1 = arith.constant 0 : i32
    return %c0_i32, %c0_i32_0 : i32, i32
  }
  func.func @transform_16(%arg0: i32) -> (i32, i32) {
    %c0_i32 = arith.constant 0 : i32
    %c0_i32_0 = arith.constant 0 : i32
    %c0_i32_1 = arith.constant 0 : i32
    return %c0_i32, %c0_i32_0 : i32, i32
  }
  func.func @transform_17(%arg0: i32) -> (i32, i32) {
    %c0_i32 = arith.constant 0 : i32
    %c0_i32_0 = arith.constant 0 : i32
    %c0_i32_1 = arith.constant 0 : i32
    return %c0_i32, %c0_i32_0 : i32, i32
  }
  func.func @transform_18(%arg0: i32) -> (i32, i32) {
    %c0_i32 = arith.constant 0 : i32
    %c0_i32_0 = arith.constant 0 : i32
    %c0_i32_1 = arith.constant 0 : i32
    return %c0_i32, %c0_i32_0 : i32, i32
  }
  func.func @transform_19(%arg0: i32) -> (i32, i32) {
    %c0_i32 = arith.constant 0 : i32
    %c0_i32_0 = arith.constant 0 : i32
    %c0_i32_1 = arith.constant 0 : i32
    return %c0_i32, %c0_i32_0 : i32, i32
  }
  func.func @transform_20(%arg0: i32) -> (i32, i32) {
    %c0_i32 = arith.constant 0 : i32
    %c0_i32_0 = arith.constant 0 : i32
    %c0_i32_1 = arith.constant 0 : i32
    return %c0_i32, %c0_i32_0 : i32, i32
  }
  func.func @transform_21(%arg0: i32) -> (i32, i32) {
    %c0_i32 = arith.constant 0 : i32
    %c0_i32_0 = arith.constant 0 : i32
    %c0_i32_1 = arith.constant 0 : i32
    return %c0_i32, %c0_i32_0 : i32, i32
  }
  func.func @transform_22(%arg0: i32) -> (i32, i32) {
    %c0_i32 = arith.constant 0 : i32
    %c0_i32_0 = arith.constant 0 : i32
    %c0_i32_1 = arith.constant 0 : i32
    return %c0_i32, %c0_i32_0 : i32, i32
  }
  func.func @transform_23(%arg0: i32) -> (i32, i32) {
    %c0_i32 = arith.constant 0 : i32
    %c0_i32_0 = arith.constant 0 : i32
    %c0_i32_1 = arith.constant 0 : i32
    return %c0_i32, %c0_i32_0 : i32, i32
  }
  func.func @transform_24(%arg0: i32) -> (i32, i32) {
    %c0_i32 = arith.constant 0 : i32
    %c0_i32_0 = arith.constant 0 : i32
    %c0_i32_1 = arith.constant 0 : i32
    return %c0_i32, %c0_i32_0 : i32, i32
  }
  func.func @transform_25(%arg0: i32) -> (i32, i32) {
    %c0_i32 = arith.constant 0 : i32
    %c0_i32_0 = arith.constant 0 : i32
    %c0_i32_1 = arith.constant 0 : i32
    return %c0_i32, %c0_i32_0 : i32, i32
  }
  func.func @transform_26(%arg0: i32) -> (i32, i32) {
    %c0_i32 = arith.constant 0 : i32
    %c0_i32_0 = arith.constant 0 : i32
    %c0_i32_1 = arith.constant 0 : i32
    return %c0_i32, %c0_i32_0 : i32, i32
  }
  func.func @transform_27(%arg0: i32) -> (i32, i32) {
    %c0_i32 = arith.constant 0 : i32
    %c0_i32_0 = arith.constant 0 : i32
    %c0_i32_1 = arith.constant 0 : i32
    return %c0_i32, %c0_i32_0 : i32, i32
  }
  func.func @transform_28(%arg0: i32) -> (i32, i32) {
    %c0_i32 = arith.constant 0 : i32
    %c0_i32_0 = arith.constant 0 : i32
    %c0_i32_1 = arith.constant 0 : i32
    return %c0_i32, %c0_i32_0 : i32, i32
  }
  func.func @transform_29(%arg0: i32) -> (i32, i32) {
    %c0_i32 = arith.constant 0 : i32
    %c0_i32_0 = arith.constant 0 : i32
    %c0_i32_1 = arith.constant 0 : i32
    return %c0_i32, %c0_i32_0 : i32, i32
  }
  func.func @transform_30(%arg0: i32) -> (i32, i32) {
    %c0_i32 = arith.constant 0 : i32
    %c0_i32_0 = arith.constant 0 : i32
    %c0_i32_1 = arith.constant 0 : i32
    return %c0_i32, %c0_i32_0 : i32, i32
  }
  func.func @transform_31(%arg0: i32) -> (i32, i32) {
    %c0_i32 = arith.constant 0 : i32
    %c0_i32_0 = arith.constant 0 : i32
    %c0_i32_1 = arith.constant 0 : i32
    return %c0_i32, %c0_i32_0 : i32, i32
  }
  func.func @transform_32(%arg0: i32) -> (i32, i32) {
    %c0_i32 = arith.constant 0 : i32
    %c0_i32_0 = arith.constant 0 : i32
    %c0_i32_1 = arith.constant 0 : i32
    return %c0_i32, %c0_i32_0 : i32, i32
  }
  func.func @transform_33(%arg0: i32) -> (i32, i32) {
    %c0_i32 = arith.constant 0 : i32
    %c0_i32_0 = arith.constant 0 : i32
    %c0_i32_1 = arith.constant 0 : i32
    return %c0_i32, %c0_i32_0 : i32, i32
  }
  func.func @transform_34(%arg0: i32) -> (i32, i32) {
    %c0_i32 = arith.constant 0 : i32
    %c0_i32_0 = arith.constant 0 : i32
    %c0_i32_1 = arith.constant 0 : i32
    return %c0_i32, %c0_i32_0 : i32, i32
  }
  func.func @transform_35(%arg0: i32) -> (i32, i32) {
    %c0_i32 = arith.constant 0 : i32
    %c0_i32_0 = arith.constant 0 : i32
    %c0_i32_1 = arith.constant 0 : i32
    return %c0_i32, %c0_i32_0 : i32, i32
  }
  func.func @transform_36(%arg0: i32) -> (i32, i32) {
    %c0_i32 = arith.constant 0 : i32
    %c0_i32_0 = arith.constant 0 : i32
    %c0_i32_1 = arith.constant 0 : i32
    return %c0_i32, %c0_i32_0 : i32, i32
  }
  func.func @transform_37(%arg0: i32) -> (i32, i32) {
    %c0_i32 = arith.constant 0 : i32
    %c0_i32_0 = arith.constant 0 : i32
    %c0_i32_1 = arith.constant 0 : i32
    return %c0_i32, %c0_i32_0 : i32, i32
  }
  func.func @transform_38(%arg0: i32) -> (i32, i32, i32) {
    %c0_i32 = arith.constant 0 : i32
    %c0_i32_0 = arith.constant 0 : i32
    %c0_i32_1 = arith.constant 0 : i32
    return %arg0, %c0_i32, %c0_i32_0 : i32, i32, i32
  }
}

</mosaic_0001>

<bundles_post_ra>
// kernel: detector_forward.1
= control target key start
LH: loop header
LB: loop body
LE: loop exit
PB: predicated region body
PF: predicated region fallthrough
CT: control target
= control target key end

     0   :  { %s4859_s6 = smov 1   ;;  %s4860_s10 = smov 2   ;;  %s5907_s0 = inlined_call_operand.smem [shape: u32[39], index: -1, kind: input, shape index: {}] }
   0x1   :  { %s4917_s5 = sld [smem:[%s5907_s0]]   ;;  %s4861_s14 = smov 3  }
   0x2   :  { %s4922_s9 = sld [smem:[%s5907_s0 + %s4859_s6]]   ;;  %s4862_s18 = smov 4  }
   0x3   :  { %s4927_s13 = sld [smem:[%s5907_s0 + %s4860_s10]]   ;;  %s4863_s22 = smov 5  }
   0x4   :  { %s4932_s17 = sld [smem:[%s5907_s0 + %s4861_s14]]   ;;  %s4864_s26 = smov 6  }
   0x5   :  { %s4937_s21 = sld [smem:[%s5907_s0 + %s4862_s18]]   ;;  %s4865_s30 = smov 7  }
   0x6   :  { %s4942_s25 = sld [smem:[%s5907_s0 + %s4863_s22]]   ;;  %s4866_s4 = smov 8  }
   0x7   :  { %5937 = sst [smem:[#allocation5_spill]] %s4917_s5  ;;  %s4867_s10 = smov 9  }
   0x8   :  { %5938 = sst [smem:[#allocation6_spill]] %s4922_s9  ;;  %s4868_s15 = smov 10  }
   0x9   :  { %5939 = sst [smem:[#allocation7_spill]] %s4927_s13  ;;  %s4869_s20 = smov 11  }
   0xa   :  { %s4947_s29 = sld [smem:[%s5907_s0 + %s4864_s26]]   ;;  %s4870_s26 = smov 12  }
   0xb   :  { %s4952_s3 = sld [smem:[%s5907_s0 + %s4865_s30]]   ;;  %s4871_s1 = smov 13  }
   0xc   :  { %s4957_s8 = sld [smem:[%s5907_s0 + %s4866_s4]]   ;;  %s4872_s7 = smov 14  }
   0xd   :  { %s4962_s14 = sld [smem:[%s5907_s0 + %s4867_s10]]   ;;  %s4874_s22 = smov 16  }
   0xe   :  { %s4967_s19 = sld [smem:[%s5907_s0 + %s4868_s15]]   ;;  %s4873_s15 = smov 15  }
   0xf   :  { %s4972_s24 = sld [smem:[%s5907_s0 + %s4869_s20]]   ;;  %s4875_s28 = smov 17  }
  0x10   :  { %s4977_s30 = sld [smem:[%s5907_s0 + %s4870_s26]]  }
  0x11   :  { %5940 = sst [smem:[#allocation8_spill]] %s4952_s3 }
  0x12   :  { %5941 = sst [smem:[#allocation9_spill]] %s4957_s8 }
  0x13   :  { %s4982_s6 = sld [smem:[%s5907_s0 + %s4871_s1]]  }
  0x14   :  { %s4987_s12 = sld [smem:[%s5907_s0 + %s4872_s7]]   ;;  %s4876_s7 = smov 18  }
  0x15   :  { %s4992_s20 = sld [smem:[%s5907_s0 + %s4873_s15]]   ;;  %s4877_s15 = smov 19  }
  0x16   :  { %s4997_s27 = sld [smem:[%s5907_s0 + %s4874_s22]]   ;;  %s4878_s22 = smov 20  }
  0x17   :  { %s5002_s4 = sld [smem:[%s5907_s0 + %s4875_s28]]   ;;  %s4879_s28 = smov 21  }
  0x19   :  { %5942 = sst [smem:[#allocation10_spill]] %s4982_s6 }
  0x1a   :  { %5943 = sst [smem:[#allocation11_spill]] %s4987_s12 }
  0x1b   :  { %5944 = sst [smem:[#allocation12_spill]] %s4992_s20 }
  0x1c   :  { %5945 = sst [smem:[#allocation13_spill]] %s4997_s27 }
  0x1d   :  { %5946 = sst [smem:[#allocation14_spill]] %s5002_s4 }
  0x1e   :  { %s5007_s6 = sld [smem:[%s5907_s0 + %s4876_s7]]   ;;  %s4880_s7 = smov 22  }
  0x1f   :  { %s5012_s20 = sld [smem:[%s5907_s0 + %s4877_s15]]   ;;  %s4881_s15 = smov 23  }
  0x20   :  { %s5017_s27 = sld [smem:[%s5907_s0 + %s4878_s22]]   ;;  %s4882_s22 = smov 24  }
  0x21   :  { %s5022_s4 = sld [smem:[%s5907_s0 + %s4879_s28]]   ;;  %s4883_s28 = smov 25  }
  0x24   :  { %5947 = sst [smem:[#allocation15_spill]] %s5007_s6 }
  0x25   :  { %5948 = sst [smem:[#allocation16_spill]] %s5012_s20 }
  0x26   :  { %5949 = sst [smem:[#allocation17_spill]] %s5017_s27 }
  0x27   :  { %5950 = sst [smem:[#allocation18_spill]] %s5022_s4 }
  0x28   :  { %s5027_s6 = sld [smem:[%s5907_s0 + %s4880_s7]]   ;;  %s4884_s7 = smov 26  }
  0x29   :  { %s5032_s20 = sld [smem:[%s5907_s0 + %s4881_s15]]   ;;  %s4885_s15 = smov 27  }
  0x2a   :  { %s5037_s27 = sld [smem:[%s5907_s0 + %s4882_s22]]   ;;  %s4886_s22 = smov 28  }
  0x2b   :  { %s5042_s4 = sld [smem:[%s5907_s0 + %s4883_s28]]   ;;  %s4887_s28 = smov 29  }
  0x2e   :  { %5951 = sst [smem:[#allocation19_spill]] %s5027_s6 }
  0x2f   :  { %5952 = sst [smem:[#allocation20_spill]] %s5032_s20 }
  0x30   :  { %5953 = sst [smem:[#allocation21_spill]] %s5037_s27 }
  0x31   :  { %5954 = sst [smem:[#allocation22_spill]] %s5042_s4 }
  0x32   :  { %s5047_s6 = sld [smem:[%s5907_s0 + %s4884_s7]]   ;;  %s4888_s7 = smov 30  }
  0x33   :  { %s5052_s20 = sld [smem:[%s5907_s0 + %s4885_s15]]   ;;  %s4889_s15 = smov 31  }
  0x34   :  { %s5057_s27 = sld [smem:[%s5907_s0 + %s4886_s22]]   ;;  %s4890_s22 = smov 32  }
  0x35   :  { %s5062_s4 = sld [smem:[%s5907_s0 + %s4887_s28]]   ;;  %s4891_s28 = smov 33  }
  0x38   :  { %5955 = sst [smem:[#allocation23_spill]] %s5047_s6 }
  0x39   :  { %5956 = sst [smem:[#allocation24_spill]] %s5052_s20 }
  0x3a   :  { %5957 = sst [smem:[#allocation25_spill]] %s5057_s27 }
  0x3b   :  { %5958 = sst [smem:[#allocation26_spill]] %s5062_s4 }
  0x3c   :  { %s5067_s6 = sld [smem:[%s5907_s0 + %s4888_s7]]   ;;  %s4892_s7 = smov 34  }
  0x3d   :  { %s5072_s20 = sld [smem:[%s5907_s0 + %s4889_s15]]   ;;  %s4893_s15 = smov 35  }
  0x3e   :  { %s5077_s27 = sld [smem:[%s5907_s0 + %s4890_s22]]   ;;  %s4894_s22 = smov 36  }
  0x3f   :  { %s5082_s4 = sld [smem:[%s5907_s0 + %s4891_s28]]   ;;  %s4895_s28 = smov 37  }
  0x42   :  { %5959 = sst [smem:[#allocation27_spill]] %s5067_s6 }
  0x43   :  { %5960 = sst [smem:[#allocation28_spill]] %s5072_s20 }
  0x44   :  { %5961 = sst [smem:[#allocation29_spill]] %s5077_s27 }
  0x45   :  { %5962 = sst [smem:[#allocation30_spill]] %s5082_s4 }
  0x46   :  { %s5087_s6 = sld [smem:[%s5907_s0 + %s4892_s7]]   ;;  %s4896_s7 = smov 38  }
  0x47   :  { %s5092_s20 = sld [smem:[%s5907_s0 + %s4893_s15]]  }
  0x48   :  { %s5097_s27 = sld [smem:[%s5907_s0 + %s4894_s22]]  }
  0x49   :  { %s5102_s4 = sld [smem:[%s5907_s0 + %s4895_s28]]  }
  0x4c   :  { %5963 = sst [smem:[#allocation31_spill]] %s5087_s6 }
  0x4d   :  { %s5107_s6 = sld [smem:[%s5907_s0 + %s4896_s7]]  }
  0x4f   :  { %5964 = sst [smem:[#allocation32_spill]] %s5102_s4 }
  0x50   :  { %82 = vsyncpa [#allocation3], 0 }
  0x51   :  { %84 = vsyncpa [#allocation3 + $0x1], 0  ;;  %s5109_s15 = smov 0   ;;  %s5111_s16 = smov 0  }
  0x52   :  { %s5113_s18 = smov 0   ;;  %s5115_s22 = smov 0  }
  0x53 LB: > { %s5965_s12 = sld [smem:[#allocation11_spill]]  ;;  %s5966_s9 = sld [smem:[#allocation6_spill]]  ;;  %s4853_s18 = sphi %s5113_s18, %s6005_s18   ;;  %s4849_s16 = sphi %s5111_s16, %s6004_s16   ;;  %s4845_s15 = sphi %s5109_s15, %s6003_s15   ;;  %s4857_s22 = sphi %s5115_s22, %s6006_s22  }
  0x54   : > { %s5967_s8 = sld [smem:[#allocation9_spill]]  ;;  %s5130_s0 = sadd.s32 4294967295, %s4857_s22  }
  0x55   : > { %s4047_s23 = sadd.s32 4294967294, %s4857_s22   ;;  %s5134_s26 = sadd.s32 1, %s4857_s22  }
  0x56   : > { %s900_s28 = sadd.s32 1, %s4853_s18  ;;  %s897_s1 = ssub.s32 %s4857_s22, %s5134_s26 }
  0x57   : > { %p910_p0 = scmp.ne.s32.totalorder %s4853_s18, %s4849_s16  ;;  %p898_p1 = scmp.eq.s32.totalorder %s897_s1, 0 }
  0x58   : > { %p911_p2 = scmp.eq.s32.totalorder %s5130_s0, 1  ;;  %p916_p3 = scmp.ne.s32.totalorder %s4849_s16, %s4845_s15 }
  0x59   : > { %p917_p4 = scmp.eq.s32.totalorder %s4047_s23, 1  ;;  %p4050_p7 = scmp.ge.s32.totalorder %s4857_s22, 1 }
  0x5a   : > { %s5145_s2 = scalar_select %p898_p1, %s4853_s18, %s900_s28  }
  0x5b   : > { %p5147_p5 = por %p911_p2, %p910_p0  ;;  %p5151_p6 = por %p917_p4, %p916_p3 }
  0x5c   : > { %p1054_p8 = scmp.lt.s32.totalorder %s4857_s22, 3 }
  0x5e   : > { %p1055_p9 = pnand %p4050_p7, %p1054_p8 }
  0x5f   : > { %s5970_s5 = sld [smem:[#allocation5_spill]] (!%p1055_p9)  ;;  %v1157_v0 = vld [vmem:[%s5966_s9] sm:$0xff] (!%p1055_p9)  ;;  %v1158_v1 = vld [vmem:[%s5966_s9 + $0x8] sm:$0xff] (!%p1055_p9)  ;;  %v1159_v2 = vld [vmem:[%s5966_s9 + $0x10] sm:$0xff] (!%p1055_p9)  ;;  %p1147_p10 = scmp.lt.s32.totalorder (!%p1055_p9), %s5130_s0, 1  ;;  %v4897_v3 = vmov (!%p1055_p9), 0  }
  0x60   : > { %1058 = sbr.rel (%p1055_p9) target bundleno = 7217 (0x1c31), region = 172  ;;  %1199 = vmatprep.subr.bf16.mxu0 (!%p1055_p9), %v4897_v3  ;;  %v1183_v4 = vpack.c.bf16 (!%p1055_p9), %v1158_v1, %v1157_v0  ;;  %v1160_v5 = vld [vmem:[%s5966_s9 + $0x18] sm:$0xff] (!%p1055_p9)  ;;  %v1161_v7 = vld [vmem:[%s5966_s9 + $0x20] sm:$0xff] (!%p1055_p9)  ;;  %v1162_v8 = vld [vmem:[%s5966_s9 + $0x28] sm:$0xff] (!%p1055_p9)  ;;  %vm1195_vm0 = vcmask (!%p1055_p9), 523264   ;;  %s5971_s13 = sld [smem:[#allocation7_spill]] (!%p1055_p9) }
  0x61   : > { %v1184_v6 = vpack.c.bf16 (!%p1055_p9), %v1160_v5, %v1159_v2  ;;  %v1185_v9 = vpack.c.bf16 (!%p1055_p9), %v1162_v8, %v1161_v7  ;;  %v1163_v10 = vld [vmem:[%s5966_s9 + $0x30] sm:$0xff] (!%p1055_p9)  ;;  %v1164_v11 = vld [vmem:[%s5966_s9 + $0x38] sm:$0xff] (!%p1055_p9)  ;;  %v1165_v16 = vld [vmem:[%s5966_s9 + $0x40] sm:$0xff] (!%p1055_p9)  ;;  %vm1243_vm1 = vcmask (!%p1055_p9), 1040384   ;;  %vm1259_vm2 = vcmask (!%p1055_p9), 261120   ;;  %s5972_s3 = sld [smem:[#allocation8_spill]] (!%p1055_p9) }
  0x62   : > { %1200 = vmatpush1.bf16.msra.mxu0 (!%p1055_p9), %v1183_v4  ;;  %v1186_v15 = vpack.c.bf16 (!%p1055_p9), %v1164_v11, %v1163_v10  ;;  %v1166_v17 = vld [vmem:[%s5966_s9 + $0x48] sm:$0xff] (!%p1055_p9)  ;;  %v1167_v19 = vld [vmem:[%s5966_s9 + $0x50] sm:$0xff] (!%p1055_p9)  ;;  %v1168_v20 = vld [vmem:[%s5966_s9 + $0x58] sm:$0xff] (!%p1055_p9)  ;;  %vm1266_vm3 = vcmask (!%p1055_p9), 253952   ;;  %s5928_s1 = smov (!%p1055_p9), 120   ;;  %vm1491_vm4 = vcmask (!%p1055_p9), 64512  }
  0x63   : > { %1201 = vmatprep.subr.bf16.mxu0 (!%p1055_p9), %v4897_v3  ;;  %v1187_v18 = vpack.c.bf16 (!%p1055_p9), %v1166_v17, %v1165_v16  ;;  %v1188_v21 = vpack.c.bf16 (!%p1055_p9), %v1168_v20, %v1167_v19  ;;  %v1169_v22 = vld [vmem:[%s5966_s9 + $0x60] sm:$0xff] (!%p1055_p9)  ;;  %v1170_v23 = vld [vmem:[%s5966_s9 + $0x68] sm:$0xff] (!%p1055_p9)  ;;  %v1171_v25 = vld [vmem:[%s5966_s9 + $0x70] sm:$0xff] (!%p1055_p9)  ;;  %vm1769_vm5 = vcmask (!%p1055_p9), 131072   ;;  %vm1762_vm6 = vcmask (!%p1055_p9), 138240   ;;  %s6002_s4 = sld [smem:[#allocation32_spill]] (!%p1055_p9) }
  0x64   : > { %v1189_v24 = vpack.c.bf16 (!%p1055_p9), %v1170_v23, %v1169_v22  ;;  %v1172_v26 = vld [vmem:[%s5966_s9 + $0x78] sm:$0xff] (!%p1055_p9)  ;;  %v1173_v28 = vld [vmem:[%s5966_s9 + $0x80] sm:$0xff] (!%p1055_p9)  ;;  %v1174_v29 = vld [vmem:[%s5966_s9 + $0x88] sm:$0xff] (!%p1055_p9)  ;;  %vm2193_vm7 = vcmask (!%p1055_p9), 130048   ;;  %vm2197_vm8 = vcmask (!%p1055_p9), 195584   ;;  %vm3855_vm9 = vcmask (!%p1055_p9), 516096  }
  0x65   : > { %v1190_v27 = vpack.c.bf16 (!%p1055_p9), %v1172_v26, %v1171_v25  ;;  %v1191_v30 = vpack.c.bf16 (!%p1055_p9), %v1174_v29, %v1173_v28  ;;  %v1175_v31 = vld [vmem:[%s5966_s9 + $0x90] sm:$0xff] (!%p1055_p9)  ;;  %v1176_v32 = vld [vmem:[%s5966_s9 + $0x98] sm:$0xff] (!%p1055_p9)  ;;  %v1177_v34 = vld [vmem:[%s5966_s9 + $0xa0] sm:$0xff] (!%p1055_p9)  ;;  %vm4907_vm10 = vmmov (!%p1055_p9), 0  }
  0x66   : > { %1202 = vmatpush1.bf16.msra.mxu0 (!%p1055_p9), %v1184_v6  ;;  %v1192_v33 = vpack.c.bf16 (!%p1055_p9), %v1176_v32, %v1175_v31  ;;  %v1178_v35 = vld [vmem:[%s5966_s9 + $0xa8] sm:$0xff] (!%p1055_p9)  ;;  %v1179_v37 = vld [vmem:[%s5966_s9 + $0xb0] sm:$0xff] (!%p1055_p9)  ;;  %v1180_v38 = vld [vmem:[%s5966_s9 + $0xb8] sm:$0xff] (!%p1055_p9) }
  0x67   : > { %s1148_s11 = scalar_select %p1147_p10, %s5130_s0, 1  ;;  %1203 = vmatprep.subr.bf16.mxu0 %v4897_v3  ;;  %v1193_v36 = vpack.c.bf16 %v1178_v35, %v1177_v34  ;;  %v1194_v39 = vpack.c.bf16 %v1180_v38, %v1179_v37  ;;  %v1240_v44 = vld [vmem:[%s5971_s13] sm:$0x1]  ;;  %v1253_v49 = vld [vmem:[%s4932_s17 + $0x10] sm:$0x1]  ;;  %v1252_v53 = vld [vmem:[%s4932_s17 + $0x8] sm:$0xff] }
  0x68   : > { %v1251_v47 = vld [vmem:[%s4932_s17] sm:$0xff] }
  0x69   : > { %s4125_s23 = sshll.u32 %s1148_s11, 5  ;;  %v4054_v23 = vld [vmem:[%s4937_s21] ss:$0 sm:$0xff]  ;;  %s5926_s11 = smov 112  }
  0x6a   : > { %s5168_s28 = scalar_lea.vmem %s5970_s5, %s4125_s23  ;;  %1204 = vmatpush1.bf16.msra.mxu0 %v1185_v9  ;;  %v4055_v25 = vld [vmem:[%s4942_s25] ss:$0 sm:$0xff]  ;;  %s5918_s23 = smov 104  }
  0x6b   : > { %v1154_v12 = vld [vmem:[%s5168_s28 + $0x8] sm:$0xff]  ;;  %v1156_v13 = vld [vmem:[%s5168_s28 + $0x18] sm:$0xff]  ;;  %1205 = vmatprep.subr.bf16.mxu0 %v4897_v3  ;;  %v1153_v40 = vld [vmem:[%s5168_s28] sm:$0xff]  ;;  %s5984_s5 = smov 96  }
  0x6c   : > { %v1182_v14 = vpack.c.bf16 %v1156_v13, %v1154_v12  ;;  %v1155_v41 = vld [vmem:[%s5168_s28 + $0x10] sm:$0xff]  ;;  %s5914_s28 = smov 96  }
  0x6d   : > { %v1181_v42 = vpack.c.bf16 %v1155_v41, %v1153_v40 }
  0x6e   : > { %4053 = vmatprep.mubr.msk.bf16.mxu0 %vm1195_vm0, %v1182_v14  ;;  %1206 = vmatpush1.bf16.msra.mxu0 %v1186_v15 }
  0x6f   : > { %1207 = vmatprep.subr.bf16.mxu0 %v4897_v3 }
  0x72   : > { %1208 = vmatpush1.bf16.msra.mxu0 %v1187_v18 }
  0x73   : > { %1209 = vmatprep.subr.bf16.mxu0 %v4897_v3 }
  0x76   : > { %1210 = vmatpush1.bf16.msra.mxu0 %v1188_v21 }
  0x77   : > { %1211 = vmatprep.subr.bf16.mxu0 %v4897_v3 }
  0x7a   : > { %1212 = vmatpush1.bf16.msra.mxu0 %v1189_v24 }
  0x7b   : > { %1213 = vmatprep.subr.bf16.mxu0 %v4897_v3 }
  0x7e   : > { %1214 = vmatpush1.bf16.msra.mxu0 %v1190_v27 }
  0x7f   : > { %1215 = vmatprep.subr.bf16.mxu0 %v4897_v3 }
  0x82   : > { %1216 = vmatpush1.bf16.msra.mxu0 %v1191_v30 }
  0x83   : > { %1217 = vmatprep.subr.bf16.mxu0 %v4897_v3 }
  0x86   : > { %1218 = vmatpush1.bf16.msra.mxu0 %v1192_v33 }
  0x87   : > { %1219 = vmatprep.subr.bf16.mxu0 %v4897_v3 }
  0x8a   : > { %1220 = vmatpush1.bf16.msra.mxu0 %v1193_v36 }
  0x8b   : > { %1221 = vmatprep.subr.bf16.mxu0 %v4897_v3 }
  0x8e   : > { %1222 = vmatpush1.bf16.msra.mxu0 %v1194_v39 }
  0x91   : > { %1232 = vmatmul.mubr.bf16.vlgmr.msra.gmra.mrb[0].mxu0 %v1181_v42 }
 0x164   : > { %v1233_v43 = vpop.f32.mrb[0].mxu0 }
 0x165   : > { %v1244_v45 = vrot.slane %v1233_v43, 7  ;;  %v1235_v46 = vpop.f32.mrb[1].mxu0 }
 0x166   : > { %v1236_v48 = vpop.f32.mrb[2].mxu0 }
 0x167   : > { %v1245_v50 = vrot.slane %v1236_v48, 7  ;;  %v1238_v51 = vpop.f32.mrb[3].mxu0  ;;  %v1250_v52 = vsel %vm1243_vm1, %v1240_v44, %v1244_v45 }
 0x168   : > { %v1254_v54 = vadd.f32 %v1251_v47, %v1250_v52 }
 0x169   : > { %v1256_v55 = vadd.f32 %v1253_v49, %v1245_v50  ;;  %v1246_v56 = vsel %vm1243_vm1, %v1244_v45, %v1245_v50 }
 0x16a   : > { %v1260_v57 = vsel %vm1259_vm2, %v1254_v54, 0.0  ;;  %v1255_v58 = vadd.f32 %v1252_v53, %v1246_v56  ;;  %v1380_v56 = vld [vmem:[%s5967_s8 + $0x10] sm:$0xff] }
 0x16b   : > { %1261 = vadd.xlane.f32.xlu0 %v1260_v57  ;;  %v1267_v59 = vsel %vm1266_vm3, %v1256_v55, 0.0 }
 0x16c   : > { %1268 = vadd.xlane.f32.xlu1 %v1267_v59  ;;  %v1263_v60 = vsel %vm1259_vm2, %v1255_v58, 0.0 }
 0x16f   : > { %1264 = vadd.xlane.f32.xlu0 %v1263_v60 }
 0x1f8   : > { %v1262_v61 = vpop.xlane.xlu0 %1261 }
 0x1f9   : > { %v1271_v62 = vmul.f32 0.03125, %v1262_v61  ;;  %v1269_v63 = vpop.xlane.xlu1 %1268 }
 0x1fa   : > { %v1273_v0 = vmul.f32 0.03125, %v1269_v63 }
 0x1fb   : > { %v1274_v1 = vsub.f32 %v1254_v54, %v1271_v62  ;;  %v1378_v54 = vld [vmem:[%s5967_s8] sm:$0xff] }
 0x1fc   : > { %v1276_v2 = vsub.f32 %v1256_v55, %v1273_v0  ;;  %v1265_v4 = vpop.xlane.xlu0 %1264  ;;  %v1379_v55 = vld [vmem:[%s5967_s8 + $0x8] sm:$0xff] }
 0x1fd   : > { %v1272_v5 = vmul.f32 0.03125, %v1265_v4  ;;  %v1277_v6 = vmul.f32 %v1274_v1, %v1274_v1  ;;  %v1385_v57 = vpack.c.bf16 %v1379_v55, %v1378_v54 }
 0x1fe   : > { %v1279_v9 = vmul.f32 %v1276_v2, %v1276_v2 }
 0x1ff   : > { %v1275_v7 = vsub.f32 %v1255_v58, %v1272_v5  ;;  %v1280_v8 = vsel %vm1259_vm2, %v1277_v6, 0.0  ;;  %v1381_v58 = vld [vmem:[%s5967_s8 + $0x18] sm:$0xff]  ;;  %4243 = vmatprep.subr.bf16.mxu1 %v1385_v57 }
 0x200   : > { %1281 = vadd.xlane.f32.xlu1 %v1280_v8  ;;  %v1286_v11 = vsel %vm1266_vm3, %v1279_v9, 0.0  ;;  %v1386_v59 = vpack.c.bf16 %v1381_v58, %v1380_v56  ;;  %4244 = vmatpush3.bf16.msra.mxu1 %v1385_v57  ;;  %v4056_v8 = vld [vmem:[%s4947_s29] ss:$0 sm:$0xff] }
 0x201   : > { %v1278_v10 = vmul.f32 %v1275_v7, %v1275_v7 }
 0x202   : > { %4245 = vmatprep.subr.bf16.mxu1 %v1386_v59 }
 0x203   : > { %v1283_v12 = vsel %vm1259_vm2, %v1278_v10, 0.0 }
 0x204   : > { %1287 = vadd.xlane.f32.xlu1 %v1286_v11  ;;  %1284 = vadd.xlane.f32.xlu0 %v1283_v12 }
 0x205   : > { %4246 = vmatpush3.bf16.msra.mxu1 %v1386_v59 }
 0x28d   : > { %v1282_v13 = vpop.xlane.xlu1 %1281 }
 0x28e   : > { %v1289_v14 = vmul.f32 0.03125, %v1282_v13 }
 0x290   : > { %v1292_v15 = vadd.f32 1e-05, %v1289_v14  ;;  %v4057_v14 = vld [vmem:[%s5972_s3] ss:$0 sm:$0xff]  ;;  %s5980_s3 = sld [smem:[#allocation18_spill]] }
 0x291   : > { %v1288_v16 = vpop.xlane.xlu1 %1287  ;;  %v1285_v17 = vpop.xlane.xlu0 %1284 }
 0x292   : > { %4643 = vrsqrt.f32 %v1292_v15  ;;  %v1291_v18 = vmul.f32 0.03125, %v1288_v16  ;;  %v1290_v19 = vmul.f32 0.03125, %v1285_v17 }
 0x294   : > { %v1294_v20 = vadd.f32 1e-05, %v1291_v18  ;;  %v1293_v21 = vadd.f32 1e-05, %v1290_v19 }
 0x296   : > { %4645 = vrsqrt.f32 %v1294_v20 }
 0x297   : > { %4647 = vrsqrt.f32 %v1293_v21 }
 0x29c   : > { %v4644_v22 = vpop.eup %4643 }
 0x29d   : > { %v1298_v24 = vmul.f32 %v4644_v22, %v1274_v1  ;;  %v4058_v22 = vld [vmem:[%s4962_s14] ss:$0 sm:$0xff] }
 0x29f   : > { %v1307_v26 = vmul.f32 %v4054_v23, %v1298_v24 }
 0x2a0   : > { %v4646_v27 = vpop.eup %4645 }
 0x2a1   : > { %v4648_v28 = vpop.eup %4647  ;;  %v5217_v29 = vadd.f32 %v4055_v25, %v1307_v26  ;;  %v1300_v30 = vmul.f32 %v4646_v27, %v1276_v2 }
 0x2a2   : > { %v1299_v31 = vmul.f32 %v4648_v28, %v1275_v7 }
 0x2a3   : > { %v1321_v32 = vsel %vm1259_vm2, %v5217_v29, 0.0  ;;  %v1309_v33 = vmul.f32 %v4054_v23, %v1300_v30 }
 0x2a4   : > { %1322 = vadd.xlane.f32.xlu0 %v1321_v32  ;;  %v1308_v34 = vmul.f32 %v4054_v23, %v1299_v31 }
 0x2a5   : > { %v5221_v35 = vadd.f32 %v4055_v25, %v1309_v33 }
 0x2a6   : > { %v5223_v36 = vadd.f32 %v4055_v25, %v1308_v34 }
 0x2a7   : > { %v1327_v37 = vsel %vm1266_vm3, %v5221_v35, 0.0 }
 0x2a8   : > { %1328 = vadd.xlane.f32.xlu0 %v1327_v37  ;;  %v1324_v38 = vsel %vm1259_vm2, %v5223_v36, 0.0 }
 0x2a9   : > { %1325 = vadd.xlane.f32.xlu1 %v1324_v38 }
 0x331   : > { %v1323_v39 = vpop.xlane.xlu0 %1322 }
 0x332   : > { %v1330_v40 = vmul.f32 0.03125, %v1323_v39 }
 0x334   : > { %v1333_v41 = vsub.f32 %v5217_v29, %v1330_v40 }
 0x335   : > { %v1329_v42 = vpop.xlane.xlu0 %1328 }
 0x336   : > { %v1326_v43 = vpop.xlane.xlu1 %1325  ;;  %v1332_v44 = vmul.f32 0.03125, %v1329_v42  ;;  %v1336_v45 = vmul.f32 %v1333_v41, %v1333_v41 }
 0x337   : > { %v1331_v46 = vmul.f32 0.03125, %v1326_v43 }
 0x338   : > { %v1335_v47 = vsub.f32 %v5221_v35, %v1332_v44  ;;  %v1339_v48 = vsel %vm1259_vm2, %v1336_v45, 0.0 }
 0x339   : > { %v1334_v49 = vsub.f32 %v5223_v36, %v1331_v46  ;;  %1340 = vadd.xlane.f32.xlu1 %v1339_v48 }
 0x33a   : > { %v1338_v50 = vmul.f32 %v1335_v47, %v1335_v47 }
 0x33b   : > { %v1337_v51 = vmul.f32 %v1334_v49, %v1334_v49 }
 0x33c   : > { %v1345_v52 = vsel %vm1266_vm3, %v1338_v50, 0.0 }
 0x33d   : > { %v1342_v53 = vsel %vm1259_vm2, %v1337_v51, 0.0  ;;  %1346 = vadd.xlane.f32.xlu1 %v1345_v52 }
 0x33e   : > { %1343 = vadd.xlane.f32.xlu0 %v1342_v53 }
 0x3c6   : > { %v1341_v60 = vpop.xlane.xlu1 %1340 }
 0x3c7   : > { %v1348_v61 = vmul.f32 0.03125, %v1341_v60 }
 0x3c9   : > { %v1351_v62 = vadd.f32 1e-05, %v1348_v61 }
 0x3ca   : > { %v1347_v63 = vpop.xlane.xlu1 %1346 }
 0x3cb   : > { %4649 = vrsqrt.f32 %v1351_v62  ;;  %v1350_v0 = vmul.f32 0.03125, %v1347_v63  ;;  %v1344_v1 = vpop.xlane.xlu0 %1343 }
 0x3cc   : > { %v1349_v2 = vmul.f32 0.03125, %v1344_v1 }
 0x3cd   : > { %v1353_v4 = vadd.f32 1e-05, %v1350_v0 }
 0x3ce   : > { %v1352_v5 = vadd.f32 1e-05, %v1349_v2 }
 0x3cf   : > { %4651 = vrsqrt.f32 %v1353_v4 }
 0x3d0   : > { %4653 = vrsqrt.f32 %v1352_v5 }
 0x3d5   : > { %v4650_v6 = vpop.eup %4649 }
 0x3d6   : > { %v1357_v7 = vmul.f32 %v4650_v6, %v1333_v41 }
 0x3d8   : > { %v1366_v13 = vmul.f32 %v4056_v8, %v1357_v7 }
 0x3d9   : > { %v4652_v9 = vpop.eup %4651 }
 0x3da   : > { %v4654_v10 = vpop.eup %4653  ;;  %v1359_v11 = vmul.f32 %v4652_v9, %v1335_v47  ;;  %v1375_v18 = vadd.f32 %v4057_v14, %v1366_v13 }
 0x3db   : > { %v1358_v12 = vmul.f32 %v4654_v10, %v1334_v49 }
 0x3dc   : > { %v1368_v15 = vmul.f32 %v4056_v8, %v1359_v11 }
 0x3dd   : > { %v1367_v16 = vmul.f32 %v4056_v8, %v1358_v12 }
 0x3de   : > { %v1377_v17 = vadd.f32 %v4057_v14, %v1368_v15 }
 0x3df   : > { %v1376_v19 = vadd.f32 %v4057_v14, %v1367_v16 }
 0x3e0   : > { %v1384_v20 = vpack.c.bf16 %v1377_v17, %v1377_v17 }
 0x3e1   : > { %v1383_v21 = vpack.c.bf16 %v1376_v19, %v1375_v18 }
 0x3e3   : > { %4247 = vmatprep.mubr.msk.bf16.mxu1 %vm1259_vm2, %v1383_v21 }
 0x3e4   : > { %4248 = vmatmul.mubr.msk.bf16.vlgmr.msra.gmra.mrb[0].mxu1 %vm1259_vm2, %v1384_v20 }
 0x4b7   : > { %v4249_v23 = vpop.f32.mrb[0].mxu1 }
 0x4b8   : > { %v1442_v24 = vadd.f32 %v4249_v23, %v4058_v22  ;;  %v1433_v25 = vpop.f32.mrb[1].mxu1 }
 0x4b9   : > { %v4250_v26 = vpop.f32.mrb[2].mxu1  ;;  %v1434_v28 = vadd.f32 %v4058_v22, %v1433_v25 }
 0x4ba   : > { %1454 = vrot.lane.b32.xlu1 %v1442_v24, %s5928_s1  ;;  %v1436_v27 = vpop.f32.mrb[3].mxu1  ;;  %v5256_v33 = vpack.c.bf16 %v1442_v24, %v1442_v24 }
 0x4bb   : > { %v1437_v30 = vadd.f32 %v4058_v22, %v1436_v27 }
 0x4bd   : > { %v4588_v31 = vpack.i.bf16 %v1437_v30, %v1434_v28  ;;  %v5245_v32 = vpack.c.bf16 %v1437_v30, %v1434_v28 }
 0x4bf   : > { %4589 = vrot.lane.b32.xlu1 %v4588_v31, %s5926_s11  ;;  %4584 = vrot.lane.b32.xlu0 %v4588_v31, %s5928_s1  ;;  %s5979_s1 = sld [smem:[#allocation16_spill]] }
 0x4c0   : > { %4255 = vmatprep.mubr.msk.bf16.mxu1 %vm1491_vm4, %v5245_v32 }
 0x4c3   : > { %4594 = vrot.lane.b32.xlu1 %v4588_v31, %s5918_s23  ;;  %1463 = vrot.lane.b32.xlu0 %v1442_v24, %s5926_s11  ;;  %s5978_s11 = sld [smem:[#allocation15_spill]] }
 0x4c7   : > { %1472 = vrot.lane.b32.xlu1 %v1442_v24, %s5918_s23  ;;  %1487 = vrot.lane.b32.xlu0 %v5245_v32, %s5914_s28  ;;  %s5924_s23 = smov 16  }
 0x4cb   : > { %1489 = vrot.lane.b32.xlu1 %v5256_v33, %s5914_s28 }
 0x52c   : > { %v1455_v34 = vpop.permute.xlu1 %1454 }
 0x52d   : > { %v5260_v37 = vpack.c.bf16 %v1455_v34, %v1455_v34 }
 0x52f   : > { %1556 = vrot.lane.b32.xlu1 %v5260_v37, %s5914_s28 }
 0x531   : > { %v4590_v38 = vpop.permute.xlu1 %4589  ;;  %v4585_v39 = vpop.permute.xlu0 %4584 }
 0x532   : > { %v4587_v40 = vunpack.i.h.bf16 %v4585_v39  ;;  %v4586_v41 = vunpack.i.l.bf16 %v4585_v39  ;;  %v4592_v43 = vunpack.i.h.bf16 %v4590_v38  ;;  %v4591_v44 = vunpack.i.l.bf16 %v4590_v38 }
 0x534   : > { %v5264_v42 = vpack.c.bf16 %v4587_v40, %v4586_v41  ;;  %v5270_v52 = vpack.c.bf16 %v4592_v43, %v4591_v44 }
 0x535   : > { %v4595_v45 = vpop.permute.xlu1 %4594  ;;  %v1464_v46 = vpop.permute.xlu0 %1463 }
 0x536   : > { %v4597_v47 = vunpack.i.h.bf16 %v4595_v45  ;;  %v4596_v48 = vunpack.i.l.bf16 %v4595_v45  ;;  %1554 = vrot.lane.b32.xlu0 %v5264_v42, %s5914_s28  ;;  %v5282_v55 = vpack.c.bf16 %v1464_v46, %v1464_v46 }
 0x538   : > { %v5268_v49 = vpack.c.bf16 %v4597_v47, %v4596_v48 }
 0x539   : > { %v1473_v50 = vpop.permute.xlu1 %1472  ;;  %v1488_v51 = vpop.permute.xlu0 %1487 }
 0x53a   : > { %1686 = vrot.lane.b32.xlu1 %v5268_v49, %s5914_s28  ;;  %4279 = vmatprep.mubr.msk.bf16.mxu0 %vm1491_vm4, %v5268_v49  ;;  %v1499_v53 = vsel %vm1491_vm4, %v1488_v51, 0  ;;  %v5280_v54 = vpack.c.bf16 %v1473_v50, %v1473_v50 }
 0x53b   : > { %1620 = vrot.lane.b32.xlu0 %v5270_v52, %s5914_s28  ;;  %4479 = vmatprep.subr.msk.bf16.mxu1 %vm1491_vm4, %v1488_v51 }
 0x53c   : > { %4252 = vmatpush3.bf16.xpose.msra.mxu1 %v1499_v53 }
 0x53d   : > { %v1490_v56 = vpop.permute.xlu1 %1489 }
 0x53e   : > { %1688 = vrot.lane.b32.xlu1 %v5280_v54, %s5914_s28  ;;  %4480 = vmatprep.subr.msk.bf16.mxu1 %vm1491_vm4, %v1490_v56  ;;  %v1502_v57 = vsel %vm1491_vm4, %v1490_v56, 0 }
 0x53f   : > { %1622 = vrot.lane.b32.xlu0 %v5282_v55, %s5914_s28  ;;  %s5916_s28 = smov 64  }
 0x544   : > { %4254 = vmatpush3.bf16.xpose.msra.mxu1 %v1502_v57 }
 0x54b   : > { %4256 = vmatmul.mubr.msk.bf16.vlgmr.msra.gmra.mrb[4].mxu1 %vm1491_vm4, %v5256_v33 }
 0x54c   : > { %4263 = vmatprep.mubr.msk.bf16.mxu1 %vm1491_vm4, %v5264_v42 }
 0x5a1   : > { %v1557_v58 = vpop.permute.xlu1 %1556 }
 0x5a2   : > { %v1568_v0 = vsel %vm1491_vm4, %v1557_v58, 0 }
 0x5a8   : > { %v1555_v59 = vpop.permute.xlu0 %1554 }
 0x5a9   : > { %4481 = vmatprep.subr.msk.bf16.mxu1 %vm1491_vm4, %v1555_v59  ;;  %v1565_v60 = vsel %vm1491_vm4, %v1555_v59, 0 }
 0x5aa   : > { %4260 = vmatpush3.bf16.xpose.msra.mxu1 %v1565_v60 }
 0x5ab   : > { %4482 = vmatprep.subr.msk.bf16.mxu1 %vm1491_vm4, %v1557_v58 }
 0x5ac   : > { %v1687_v61 = vpop.permute.xlu1 %1686 }
 0x5ad   : > { %4485 = vmatprep.subr.msk.bf16.mxu0 %vm1491_vm4, %v1687_v61  ;;  %v1697_v62 = vsel %vm1491_vm4, %v1687_v61, 0  ;;  %v1621_v1 = vpop.permute.xlu0 %1620 }
 0x5ae   : > { %4276 = vmatpush3.bf16.xpose.msra.mxu0 %v1697_v62  ;;  %v1631_v4 = vsel %vm1491_vm4, %v1621_v1, 0 }
 0x5b0   : > { %v1689_v63 = vpop.permute.xlu1 %1688 }
 0x5b1   : > { %4486 = vmatprep.subr.msk.bf16.mxu0 %vm1491_vm4, %v1689_v63  ;;  %v1700_v2 = vsel %vm1491_vm4, %v1689_v63, 0  ;;  %v1623_v5 = vpop.permute.xlu0 %1622 }
 0x5b2   : > { %4262 = vmatpush3.bf16.xpose.msra.mxu1 %v1568_v0  ;;  %v1634_v6 = vsel %vm1491_vm4, %v1623_v5, 0 }
 0x5b3   : > { %4483 = vmatprep.subr.msk.bf16.mxu1 %vm1491_vm4, %v1621_v1 }
 0x5b6   : > { %4278 = vmatpush3.bf16.xpose.msra.mxu0 %v1700_v2 }
 0x5b9   : > { %4264 = vmatmul.mubr.msk.bf16.vlgmr.msra.gmra.mrb[8].mxu1 %vm1491_vm4, %v5260_v37 }
 0x5ba   : > { %4268 = vmatpush3.bf16.xpose.msra.mxu1 %v1631_v4  ;;  %4271 = vmatprep.mubr.msk.bf16.mxu1 %vm1491_vm4, %v5270_v52 }
 0x5bb   : > { %4484 = vmatprep.subr.msk.bf16.mxu1 %vm1491_vm4, %v1623_v5 }
 0x5bd   : > { %4280 = vmatmul.mubr.msk.bf16.vlgmr.msra.gmra.mrb[4].mxu0 %vm1491_vm4, %v5280_v54 }
 0x5c2   : > { %4270 = vmatpush3.bf16.xpose.msra.mxu1 %v1634_v6 }
 0x5c9   : > { %4272 = vmatmul.mubr.msk.bf16.vlgmr.msra.gmra.mrb[12].mxu1 %vm1491_vm4, %v5282_v55 }
 0x61e   : > { %v4257_v7 = vpop.f32.mrb[4].mxu1 }
 0x61f   : > { %v1752_v8 = vmul.f32 0.35355338, %v4257_v7  ;;  %v1538_v9 = vpop.f32.mrb[5].mxu1 }
 0x620   : > { %v4258_v10 = vpop.f32.mrb[6].mxu1  ;;  %v1750_v11 = vmul.f32 0.35355338, %v1538_v9 }
 0x621   : > { %v1541_v12 = vpop.f32.mrb[7].mxu1  ;;  %v1770_v13 = vsel %vm1769_vm5, %v1752_v8, -inf }
 0x622   : > { %v5315_v14 = vmul.f32 0.35355338, %v1541_v12  ;;  %1771 = vmax.xlane.f32.xlu0 %v1770_v13  ;;  %v1763_v16 = vsel %vm1762_vm6, %v1750_v11, -inf }
 0x624   : > { %v1766_v15 = vsel %vm1762_vm6, %v5315_v14, -inf }
 0x625   : > { %1767 = vmax.xlane.f32.xlu1 %v1766_v15 }
 0x626   : > { %1764 = vmax.xlane.f32.xlu0 %v1763_v16 }
 0x68c   : > { %v4265_v17 = vpop.f32.mrb[8].mxu1 }
 0x68d   : > { %v5320_v18 = vmul.f32 0.35355338, %v4265_v17  ;;  %v1604_v19 = vpop.f32.mrb[9].mxu1 }
 0x68e   : > { %v5322_v20 = vmul.f32 0.35355338, %v1604_v19  ;;  %v4266_v21 = vpop.f32.mrb[10].mxu1 }
 0x68f   : > { %v1607_v22 = vpop.f32.mrb[11].mxu1  ;;  %v1779_v23 = vsel %vm1769_vm5, %v5320_v18, -inf }
 0x690   : > { %v5326_v24 = vmul.f32 0.35355338, %v1607_v22  ;;  %1780 = vmax.xlane.f32.xlu1 %v1779_v23  ;;  %v4281_v25 = vpop.f32.mrb[4].mxu0  ;;  %v1773_v26 = vsel %vm1762_vm6, %v5322_v20, -inf }
 0x691   : > { %1774 = vmax.xlane.f32.xlu0 %v1773_v26  ;;  %v1736_v27 = vpop.f32.mrb[5].mxu0  ;;  %v5332_v34 = vmul.f32 0.35355338, %v4281_v25 }
 0x692   : > { %v5330_v28 = vmul.f32 0.35355338, %v1736_v27  ;;  %v4282_v30 = vpop.f32.mrb[6].mxu0  ;;  %v1776_v38 = vsel %vm1762_vm6, %v5326_v24, -inf }
 0x693   : > { %v1739_v31 = vpop.f32.mrb[7].mxu0  ;;  %v1797_v40 = vsel %vm1769_vm5, %v5332_v34, -inf }
 0x694   : > { %v1791_v39 = vsel %vm1762_vm6, %v5330_v28, -inf  ;;  %v5346_v50 = vmul.f32 0.35355338, %v1739_v31 }
 0x695   : > { %1777 = vmax.xlane.f32.xlu0 %v1776_v38  ;;  %1792 = vmax.xlane.f32.xlu1 %v1791_v39  ;;  %v5404_v38 = vsel %vm1243_vm1, 65535, %v4897_v3 }
 0x696   : > { %v1794_v53 = vsel %vm1762_vm6, %v5346_v50, -inf }
 0x699   : > { %1798 = vmax.xlane.f32.xlu1 %v1797_v40 }
 0x69c   : > { %v4273_v41 = vpop.f32.mrb[12].mxu1 }
 0x69d   : > { %v5340_v43 = vmul.f32 0.35355338, %v4273_v41  ;;  %v1670_v44 = vpop.f32.mrb[13].mxu1 }
 0x69e   : > { %v4274_v45 = vpop.f32.mrb[14].mxu1  ;;  %v5342_v46 = vmul.f32 0.35355338, %v1670_v44 }
 0x69f   : > { %v1673_v47 = vpop.f32.mrb[15].mxu1  ;;  %v1788_v48 = vsel %vm1769_vm5, %v5340_v43, -inf }
 0x6a0   : > { %1789 = vmax.xlane.f32.xlu0 %v1788_v48  ;;  %v1782_v51 = vsel %vm1762_vm6, %v5342_v46, -inf  ;;  %v5360_v59 = vmul.f32 0.35355338, %v1673_v47 }
 0x6a2   : > { %v1785_v62 = vsel %vm1762_vm6, %v5360_v59, -inf }
 0x6a4   : > { %1783 = vmax.xlane.f32.xlu0 %v1782_v51 }
 0x6a8   : > { %1795 = vmax.xlane.f32.xlu0 %v1794_v53 }
 0x6aa   : > { %1968 = vrot.lane.b32.xlu1 %v5264_v42, %s5916_s28 }
 0x6ae   : > { %1906 = vrot.lane.b32.xlu1 %v5256_v33, %s5916_s28 }
 0x6af   : > { %v1772_v56 = vpop.xlane.xlu0 %1771 }
 0x6b0   : > { %v1802_v57 = vsub.f32 %v1752_v8, %v1772_v56 }
 0x6b2   : > { %v1816_v60 = vmul.f32 1.442695, %v1802_v57  ;;  %v1768_v0 = vpop.xlane.xlu1 %1767 }
 0x6b3   : > { %v1765_v58 = vpop.xlane.xlu0 %1764  ;;  %v1801_v1 = vsub.f32 %v5315_v14, %v1768_v0 }
 0x6b4   : > { %v1800_v61 = vsub.f32 %v1750_v11, %v1765_v58  ;;  %4655 = vpow2.f32 %v1816_v60 }
 0x6b5   : > { %v1814_v2 = vmul.f32 1.442695, %v1801_v1 }
 0x6b6   : > { %v1812_v42 = vmul.f32 1.442695, %v1800_v61 }
 0x6b8   : > { %4657 = vpow2.f32 %v1812_v42 }
 0x6b9   : > { %4659 = vpow2.f32 %v1814_v2 }
 0x6be   : > { %1904 = vrot.lane.b32.xlu0 %v5245_v32, %s5916_s28  ;;  %v5364_v33 = vpop.eup %4655 }
 0x6bf   : > { %v1842_v32 = vsel %vm1769_vm5, %v5364_v33, 0.0 }
 0x6c2   : > { %2030 = vrot.lane.b32.xlu0 %v5270_v52, %s5916_s28  ;;  %v5368_v52 = vpop.eup %4657 }
 0x6c3   : > { %v1836_v63 = vsel %vm1762_vm6, %v5368_v52, 0.0  ;;  %v5377_v4 = vpop.eup %4659 }
 0x6c4   : > { %v1839_v5 = vsel %vm1762_vm6, %v5377_v4, 0.0 }
 0x6d2   : > { %1786 = vmax.xlane.f32.xlu1 %v1785_v62 }
 0x6e1   : > { %1843 = vadd.xlane.f32.xlu0 %v1842_v32 }
 0x6e3   : > { %1970 = vrot.lane.b32.xlu1 %v5260_v37, %s5916_s28 }
 0x6e5   : > { %1837 = vadd.xlane.f32.xlu0 %v1836_v63 }
 0x6e7   : > { %2092 = vrot.lane.b32.xlu1 %v5268_v49, %s5916_s28 }
 0x70b   : > { %1840 = vadd.xlane.f32.xlu1 %v1839_v5 }
 0x71d   : > { %v1781_v6 = vpop.xlane.xlu1 %1780 }
 0x71e   : > { %v1805_v37 = vsub.f32 %v5320_v18, %v1781_v6  ;;  %v1775_v7 = vpop.xlane.xlu0 %1774 }
 0x71f   : > { %v1803_v11 = vsub.f32 %v5322_v20, %v1775_v7 }
 0x720   : > { %v1822_v8 = vmul.f32 1.442695, %v1805_v37 }
 0x721   : > { %v1818_v15 = vmul.f32 1.442695, %v1803_v11 }
 0x722   : > { %4661 = vpow2.f32 %v1822_v8  ;;  %v1778_v9 = vpop.xlane.xlu0 %1777  ;;  %v1793_v10 = vpop.xlane.xlu1 %1792 }
 0x723   : > { %v1804_v49 = vsub.f32 %v5326_v24, %v1778_v9  ;;  %v1809_v16 = vsub.f32 %v5330_v28, %v1793_v10 }
 0x725   : > { %v1820_v12 = vmul.f32 1.442695, %v1804_v49  ;;  %v1830_v21 = vmul.f32 1.442695, %v1809_v16 }
 0x726   : > { %v1799_v13 = vpop.xlane.xlu1 %1798 }
 0x727   : > { %4663 = vpow2.f32 %v1820_v12  ;;  %v1811_v14 = vsub.f32 %v5332_v34, %v1799_v13 }
 0x729   : > { %v1834_v17 = vmul.f32 1.442695, %v1811_v14 }
 0x72a   : > { %v1969_v19 = vpop.permute.xlu1 %1968 }
 0x72b   : > { %4665 = vpow2.f32 %v1834_v17  ;;  %4291 = vmatprep.subr.bf16.mxu0 %v1969_v19 }
 0x72c   : > { %v5386_v18 = vpop.eup %4661  ;;  %4292 = vmatpush3.bf16.msra.mxu0 %v1969_v19  ;;  %4667 = vpow2.f32 %v1818_v15 }
 0x72d   : > { %v1790_v22 = vpop.xlane.xlu0 %1789  ;;  %v1851_v20 = vsel %vm1769_vm5, %v5386_v18, 0.0  ;;  %4669 = vpow2.f32 %v1830_v21 }
 0x72e   : > { %1852 = vadd.xlane.f32.xlu1 %v1851_v20  ;;  %v1808_v26 = vsub.f32 %v5340_v43, %v1790_v22  ;;  %v1907_v39 = vpop.permute.xlu1 %1906 }
 0x72f   : > { %v1918_v45 = vand.u32 %v5404_v38, %v1907_v39 }
 0x730   : > { %v1828_v40 = vmul.f32 1.442695, %v1808_v26 }
 0x731   : > { %v5390_v23 = vpop.eup %4663  ;;  %v1784_v24 = vpop.xlane.xlu0 %1783 }
 0x732   : > { %v1848_v25 = vsel %vm1762_vm6, %v5390_v23, 0.0  ;;  %v1806_v41 = vsub.f32 %v5342_v46, %v1784_v24 }
 0x733   : > { %1849 = vadd.xlane.f32.xlu0 %v1848_v25 }
 0x734   : > { %v1824_v3 = vmul.f32 1.442695, %v1806_v41 }
 0x735   : > { %v5395_v27 = vpop.eup %4665  ;;  %v1796_v28 = vpop.xlane.xlu0 %1795 }
 0x736   : > { %v1810_v30 = vsub.f32 %v5346_v50, %v1796_v28  ;;  %v1869_v31 = vsel %vm1769_vm5, %v5395_v27, 0.0  ;;  %v5400_v34 = vpop.eup %4667 }
 0x737   : > { %1870 = vadd.xlane.f32.xlu1 %v1869_v31  ;;  %v1845_v47 = vsel %vm1762_vm6, %v5400_v34, 0.0  ;;  %v5410_v48 = vpop.eup %4669 }
 0x738   : > { %v1832_v43 = vmul.f32 1.442695, %v1810_v30  ;;  %v1863_v50 = vsel %vm1762_vm6, %v5410_v48, 0.0 }
 0x739   : > { %v1905_v44 = vpop.permute.xlu0 %1904 }
 0x73a   : > { %4671 = vpow2.f32 %v1832_v43  ;;  %4283 = vmatprep.subr.bf16.mxu1 %v1905_v44 }
 0x73b   : > { %1846 = vadd.xlane.f32.xlu1 %v1845_v47  ;;  %4284 = vmatpush3.bf16.msra.mxu1 %v1905_v44  ;;  %4673 = vpow2.f32 %v1828_v40 }
 0x73c   : > { %4285 = vmatprep.subr.bf16.mxu1 %v1918_v45  ;;  %4675 = vpow2.f32 %v1824_v3 }
 0x73d   : > { %v2031_v46 = vpop.permute.xlu0 %2030 }
 0x73f   : > { %1864 = vadd.xlane.f32.xlu1 %v1863_v50  ;;  %4286 = vmatpush3.bf16.msra.mxu1 %v1918_v45 }
 0x740   : > { %4299 = vmatprep.subr.bf16.mxu1 %v2031_v46 }
 0x744   : > { %v5414_v51 = vpop.eup %4671 }
 0x745   : > { %v1866_v53 = vsel %vm1762_vm6, %v5414_v51, 0.0  ;;  %v5418_v56 = vpop.eup %4673 }
 0x746   : > { %1867 = vadd.xlane.f32.xlu0 %v1866_v53  ;;  %v1860_v57 = vsel %vm1769_vm5, %v5418_v56, 0.0  ;;  %v5422_v58 = vpop.eup %4675 }
 0x747   : > { %v1854_v60 = vsel %vm1762_vm6, %v5422_v58, 0.0 }
 0x74a   : > { %1861 = vadd.xlane.f32.xlu0 %v1860_v57 }
 0x74e   : > { %1855 = vadd.xlane.f32.xlu0 %v1854_v60 }
 0x75f   : > { %v1787_v61 = vpop.xlane.xlu1 %1786 }
 0x760   : > { %v1807_v62 = vsub.f32 %v5360_v59, %v1787_v61 }
 0x762   : > { %v1826_v42 = vmul.f32 1.442695, %v1807_v62 }
 0x763   : > { %v1971_v32 = vpop.permute.xlu1 %1970 }
 0x764   : > { %4677 = vpow2.f32 %v1826_v42  ;;  %v1980_v63 = vand.u32 %v1971_v32, %v5404_v38  ;;  %2032 = vrot.lane.b32.xlu0 %v5282_v55, %s5916_s28 }
 0x766   : > { %4293 = vmatprep.subr.bf16.mxu0 %v1980_v63 }
 0x767   : > { %4294 = vmatpush3.bf16.msra.mxu0 %v1980_v63  ;;  %v2093_v0 = vpop.permute.xlu1 %2092 }
 0x768   : > { %4307 = vmatprep.subr.bf16.mxu0 %v2093_v0 }
 0x76e   : > { %v5430_v1 = vpop.eup %4677  ;;  %v1844_v59 = vpop.xlane.xlu0 %1843 }
 0x76f   : > { %v1857_v2 = vsel %vm1762_vm6, %v5430_v1, 0.0  ;;  %4679 = vrcp.f32 %v1844_v59 }
 0x770   : > { %1858 = vadd.xlane.f32.xlu1 %v1857_v2 }
 0x772   : > { %v1838_v5 = vpop.xlane.xlu0 %1837 }
 0x773   : > { %4681 = vrcp.f32 %v1838_v5 }
 0x779   : > { %v4680_v55 = vpop.eup %4679 }
 0x77a   : > { %v1886_v8 = vmul.f32 %v4680_v55, %v5364_v33 }
 0x77c   : > { %v1897_v11 = vpack.c.bf16 %v1886_v8, %v1886_v8 }
 0x77d   : > { %v4682_v37 = vpop.eup %4681 }
 0x77e   : > { %v1884_v9 = vmul.f32 %v4682_v37, %v5368_v52  ;;  %v2203_v37 = vld [vmem:[%s4967_s19 + $0x10] sm:$0xff] }
 0x781   : > { %2094 = vrot.lane.b32.xlu1 %v5280_v54, %s5916_s28  ;;  %s5920_s28 = smov 8  }
 0x798   : > { %v1841_v6 = vpop.xlane.xlu1 %1840 }
 0x799   : > { %4683 = vrcp.f32 %v1841_v6 }
 0x7a3   : > { %v4684_v7 = vpop.eup %4683 }
 0x7a4   : > { %v1885_v10 = vmul.f32 %v4684_v7, %v5377_v4  ;;  %v2204_v7 = vld [vmem:[%s4967_s19 + $0x18] sm:$0xff] }
 0x7a6   : > { %v1896_v49 = vpack.c.bf16 %v1885_v10, %v1884_v9  ;;  %v2209_v9 = vpack.c.bf16 %v2204_v7, %v2203_v37  ;;  %v2334_v7 = vld [vmem:[%s5965_s12 + $0x10] sm:$0xff] }
 0x7a8   : > { %4287 = vmatprep.mubr.msk.bf16.mxu1 %vm1762_vm6, %v1896_v49 }
 0x7a9   : > { %4288 = vmatmul.mubr.msk.bf16.vlgmr.msra.gmra.mrb[16].mxu1 %vm1762_vm6, %v1897_v11 }
 0x7aa   : > { %4300 = vmatpush3.bf16.msra.mxu1 %v2031_v46 }
 0x7bb   : > { %v1853_v54 = vpop.xlane.xlu1 %1852 }
 0x7bc   : > { %4685 = vrcp.f32 %v1853_v54 }
 0x7c0   : > { %v1850_v12 = vpop.xlane.xlu0 %1849 }
 0x7c1   : > { %4687 = vrcp.f32 %v1850_v12 }
 0x7c4   : > { %v1871_v13 = vpop.xlane.xlu1 %1870 }
 0x7c6   : > { %v4686_v33 = vpop.eup %4685 }
 0x7c7   : > { %v1889_v4 = vmul.f32 %v4686_v33, %v5386_v18 }
 0x7c8   : > { %v1847_v14 = vpop.xlane.xlu1 %1846 }
 0x7c9   : > { %4689 = vrcp.f32 %v1847_v14  ;;  %v1899_v24 = vpack.c.bf16 %v1889_v4, %v1889_v4 }
 0x7cb   : > { %v4688_v16 = vpop.eup %4687 }
 0x7cc   : > { %v1865_v15 = vpop.xlane.xlu1 %1864  ;;  %v1888_v21 = vmul.f32 %v4688_v16, %v5390_v23 }
 0x7cd   : > { %4691 = vrcp.f32 %v1865_v15 }
 0x7d3   : > { %v4690_v52 = vpop.eup %4689  ;;  %v1868_v17 = vpop.xlane.xlu0 %1867 }
 0x7d4   : > { %4693 = vrcp.f32 %v1868_v17  ;;  %v1887_v19 = vmul.f32 %v4690_v52, %v5400_v34 }
 0x7d5   : > { %4695 = vrcp.f32 %v1871_v13 }
 0x7d6   : > { %v1898_v22 = vpack.c.bf16 %v1888_v21, %v1887_v19 }
 0x7d7   : > { %v1862_v20 = vpop.xlane.xlu0 %1861  ;;  %v4692_v26 = vpop.eup %4691 }
 0x7d8   : > { %4295 = vmatprep.mubr.msk.bf16.mxu0 %vm1762_vm6, %v1898_v22  ;;  %v1893_v18 = vmul.f32 %v4692_v26, %v5410_v48  ;;  %4697 = vrcp.f32 %v1862_v20 }
 0x7d9   : > { %4296 = vmatmul.mubr.msk.bf16.vlgmr.msra.gmra.mrb[8].mxu0 %vm1762_vm6, %v1899_v24 }
 0x7da   : > { %4308 = vmatpush3.bf16.msra.mxu0 %v2093_v0  ;;  %v2201_v0 = vld [vmem:[%s4967_s19] sm:$0xff] }
 0x7db   : > { %v1856_v25 = vpop.xlane.xlu0 %1855 }
 0x7dc   : > { %4699 = vrcp.f32 %v1856_v25 }
 0x7de   : > { %v4694_v28 = vpop.eup %4693 }
 0x7df   : > { %v2033_v30 = vpop.permute.xlu0 %2032  ;;  %v1894_v31 = vmul.f32 %v4694_v28, %v5414_v51  ;;  %v4696_v40 = vpop.eup %4695 }
 0x7e0   : > { %v2042_v34 = vand.u32 %v2033_v30, %v5404_v38  ;;  %v1895_v43 = vmul.f32 %v4696_v40, %v5395_v27 }
 0x7e1   : > { %v1902_v39 = vpack.c.bf16 %v1894_v31, %v1893_v18 }
 0x7e2   : > { %4301 = vmatprep.subr.bf16.mxu1 %v2042_v34  ;;  %v4698_v45 = vpop.eup %4697  ;;  %v1903_v48 = vpack.c.bf16 %v1895_v43, %v1895_v43 }
 0x7e3   : > { %4302 = vmatpush3.bf16.msra.mxu1 %v2042_v34  ;;  %4311 = vmatprep.mubr.msk.bf16.mxu0 %vm1762_vm6, %v1902_v39  ;;  %v1892_v50 = vmul.f32 %v4698_v45, %v5418_v56 }
 0x7e5   : > { %v1901_v57 = vpack.c.bf16 %v1892_v50, %v1892_v50 }
 0x7e6   : > { %v4700_v47 = vpop.eup %4699 }
 0x7e7   : > { %v1890_v46 = vmul.f32 %v4700_v47, %v5422_v58 }
 0x7fd   : > { %v1859_v23 = vpop.xlane.xlu1 %1858 }
 0x7fe   : > { %4701 = vrcp.f32 %v1859_v23 }
 0x801   : > { %v2095_v41 = vpop.permute.xlu1 %2094 }
 0x802   : > { %v2104_v44 = vand.u32 %v2095_v41, %v5404_v38  ;;  %v4077_v41 = vld [vmem:[%s4972_s24] ss:$0 sm:$0xff] }
 0x804   : > { %4309 = vmatprep.subr.bf16.mxu0 %v2104_v44 }
 0x805   : > { %4310 = vmatpush3.bf16.msra.mxu0 %v2104_v44 }
 0x808   : > { %v4702_v3 = vpop.eup %4701  ;;  %4312 = vmatmul.mubr.msk.bf16.vlgmr.msra.gmra.mrb[12].mxu0 %vm1762_vm6, %v1903_v48 }
 0x809   : > { %v1891_v51 = vmul.f32 %v4702_v3, %v5430_v1  ;;  %v2202_v1 = vld [vmem:[%s4967_s19 + $0x8] sm:$0xff] }
 0x80a   : > { %v2208_v59 = vpack.c.bf16 %v2202_v1, %v2201_v0 }
 0x80b   : > { %v1900_v53 = vpack.c.bf16 %v1891_v51, %v1890_v46 }
 0x80c   : > { %4315 = vmatprep.subr.bf16.mxu1 %v2208_v59 }
 0x80d   : > { %4303 = vmatprep.mubr.msk.bf16.mxu1 %vm1762_vm6, %v1900_v53 }
 0x80e   : > { %4304 = vmatmul.mubr.msk.bf16.vlgmr.msra.gmra.mrb[20].mxu1 %vm1762_vm6, %v1901_v57 }
 0x80f   : > { %4316 = vmatpush3.bf16.msra.mxu1 %v2208_v59 }
 0x810   : > { %4317 = vmatprep.subr.bf16.mxu1 %v2209_v9 }
 0x813   : > { %4318 = vmatpush3.bf16.msra.mxu1 %v2209_v9 }
 0x87c   : > { %v4289_v27 = vpop.f32.mrb[16].mxu1 }
 0x87d   : > { %v1954_v60 = vpop.f32.mrb[17].mxu1 }
 0x87e   : > { %v4290_v61 = vpop.f32.mrb[18].mxu1 }
 0x87f   : > { %v1957_v62 = vpop.f32.mrb[19].mxu1 }
 0x8ac   : > { %v4297_v42 = vpop.f32.mrb[8].mxu0 }
 0x8ad   : > { %2161 = vrot.lane.b32.xlu1 %v4297_v42, %s5920_s28  ;;  %v2016_v56 = vpop.f32.mrb[9].mxu0 }
 0x8ae   : > { %v4298_v58 = vpop.f32.mrb[10].mxu0 }
 0x8af   : > { %v2019_v32 = vpop.f32.mrb[11].mxu0 }
 0x8b0   : > { %v4598_v63 = vpack.i.bf16 %v2019_v32, %v2016_v56 }
 0x8b2   : > { %4599 = vrot.lane.b32.xlu0 %v4598_v63, %s5920_s28  ;;  %s5922_s28 = smov 24  }
 0x8db   : > { %v4313_v2 = vpop.f32.mrb[12].mxu0 }
 0x8dc   : > { %v2140_v5 = vpop.f32.mrb[13].mxu0 }
 0x8dd   : > { %v4314_v6 = vpop.f32.mrb[14].mxu0 }
 0x8de   : > { %v2143_v55 = vpop.f32.mrb[15].mxu0  ;;  %v2332_v6 = vld [vmem:[%s5965_s12] sm:$0xff] }
 0x8df   : > { %v4608_v8 = vpack.i.bf16 %v2143_v55, %v2140_v5  ;;  %v2333_v55 = vld [vmem:[%s5965_s12 + $0x8] sm:$0xff] }
 0x8e0   : > { %v2339_v37 = vpack.c.bf16 %v2333_v55, %v2332_v6 }
 0x8e1   : > { %v4305_v10 = vpop.f32.mrb[20].mxu1 }
 0x8e2   : > { %2173 = vrot.lane.b32.xlu1 %v4305_v10, %s5924_s23  ;;  %v2078_v49 = vpop.f32.mrb[21].mxu1  ;;  %4323 = vmatprep.subr.bf16.mxu0 %v2339_v37 }
 0x8e3   : > { %v4306_v11 = vpop.f32.mrb[22].mxu1  ;;  %4324 = vmatpush3.bf16.msra.mxu0 %v2339_v37 }
 0x8e4   : > { %v2081_v54 = vpop.f32.mrb[23].mxu1 }
 0x8e5   : > { %v4603_v12 = vpack.i.bf16 %v2081_v54, %v2078_v49 }
 0x8e6   : > { %2185 = vrot.lane.b32.xlu1 %v4313_v2, %s5922_s28 }
 0x8e7   : > { %4604 = vrot.lane.b32.xlu0 %v4603_v12, %s5924_s23  ;;  %s5974_s23 = sld [smem:[#allocation13_spill]] }
 0x8eb   : > { %4609 = vrot.lane.b32.xlu0 %v4608_v8, %s5922_s28  ;;  %v2335_v8 = vld [vmem:[%s5965_s12 + $0x18] sm:$0xff]  ;;  %s5973_s28 = sld [smem:[#allocation10_spill]] }
 0x8ec   : > { %v2340_v9 = vpack.c.bf16 %v2335_v8, %v2334_v7 }
 0x8ee   : > { %4325 = vmatprep.subr.bf16.mxu0 %v2340_v9 }
 0x8ef   : > { %4326 = vmatpush3.bf16.msra.mxu0 %v2340_v9 }
 0x91f   : > { %v2162_v13 = vpop.permute.xlu1 %2161 }
 0x920   : > { %v2192_v21 = vsel %vm1491_vm4, %v4289_v27, %v2162_v13 }
 0x924   : > { %v4600_v14 = vpop.permute.xlu0 %4599 }
 0x925   : > { %v4602_v33 = vunpack.i.h.bf16 %v4600_v14  ;;  %v4601_v52 = vunpack.i.l.bf16 %v4600_v14 }
 0x927   : > { %v2191_v22 = vsel %vm1491_vm4, %v1957_v62, %v4602_v33  ;;  %v2190_v24 = vsel %vm1491_vm4, %v1954_v60, %v4601_v52 }
 0x954   : > { %v2174_v15 = vpop.permute.xlu1 %2173 }
 0x955   : > { %v2196_v25 = vsel %vm2193_vm7, %v2192_v21, %v2174_v15 }
 0x958   : > { %v2186_v19 = vpop.permute.xlu1 %2185 }
 0x959   : > { %v4605_v16 = vpop.permute.xlu0 %4604  ;;  %v2200_v30 = vsel %vm2197_vm8, %v2196_v25, %v2186_v19 }
 0x95a   : > { %v4607_v4 = vunpack.i.h.bf16 %v4605_v16  ;;  %v4606_v17 = vunpack.i.l.bf16 %v4605_v16  ;;  %v2207_v40 = vpack.c.bf16 %v2200_v30, %v2200_v30 }
 0x95c   : > { %v2194_v18 = vsel %vm2193_vm7, %v2190_v24, %v4606_v17  ;;  %v2195_v31 = vsel %vm2193_vm7, %v2191_v22, %v4607_v4  ;;  %v4080_v4 = vld [vmem:[%s4977_s30] ss:$0 sm:$0xff] }
 0x95d   : > { %v4610_v20 = vpop.permute.xlu0 %4609  ;;  %v4081_v24 = vld [vmem:[%s5973_s28] ss:$0 sm:$0xff]  ;;  %s5975_s28 = sld [smem:[#allocation12_spill]] }
 0x95e   : > { %v4612_v26 = vunpack.i.h.bf16 %v4610_v20  ;;  %v4611_v28 = vunpack.i.l.bf16 %v4610_v20 }
 0x960   : > { %v2198_v34 = vsel %vm2197_vm8, %v2194_v18, %v4611_v28  ;;  %v2199_v39 = vsel %vm2197_vm8, %v2195_v31, %v4612_v26 }
 0x961   : > { %v2206_v23 = vpack.c.bf16 %v2199_v39, %v2198_v34  ;;  %v2428_v39 = vld [vmem:[%s5974_s23] sm:$0xff] }
 0x963   : > { %4319 = vmatprep.mubr.msk.bf16.mxu1 %vm1259_vm2, %v2206_v23  ;;  %v2429_v23 = vld [vmem:[%s5974_s23 + $0x8] sm:$0xff] }
 0x964   : > { %4320 = vmatmul.mubr.msk.bf16.vlgmr.msra.gmra.mrb[24].mxu1 %vm1259_vm2, %v2207_v40  ;;  %v2447_v40 = vpack.c.bf16 %v2429_v23, %v2428_v39 }
 0x966   : > { %4331 = vmatprep.subr.bf16.mxu1 %v2447_v40 }
 0x967   : > { %4332 = vmatpush3.bf16.msra.mxu1 %v2447_v40 }
 0xa37   : > { %v4321_v43 = vpop.f32.mrb[24].mxu1 }
 0xa38   : > { %v2256_v44 = vpop.f32.mrb[25].mxu1  ;;  %v2265_v45 = vadd.f32 %v4321_v43, %v4077_v41  ;;  %v2431_v43 = vld [vmem:[%s5974_s23 + $0x18] sm:$0xff] }
 0xa39   : > { %v2257_v47 = vadd.f32 %v4077_v41, %v2256_v44  ;;  %v4322_v48 = vpop.f32.mrb[26].mxu1 }
 0xa3a   : > { %v2259_v3 = vpop.f32.mrb[27].mxu1  ;;  %v5484_v51 = vadd.f32 %v2265_v45, %v5221_v35  ;;  %v2432_v45 = vld [vmem:[%s5974_s23 + $0x20] sm:$0xff] }
 0xa3b   : > { %v5481_v50 = vadd.f32 %v2257_v47, %v5217_v29  ;;  %v2260_v46 = vadd.f32 %v4077_v41, %v2259_v3  ;;  %v2430_v41 = vld [vmem:[%s5974_s23 + $0x10] sm:$0xff]  ;;  %v2433_v47 = vld [vmem:[%s5974_s23 + $0x28] sm:$0xff] }
 0xa3c   : > { %v2281_v60 = vsel %vm1266_vm3, %v5484_v51, 0.0  ;;  %v2448_v44 = vpack.c.bf16 %v2431_v43, %v2430_v41  ;;  %v2449_v48 = vpack.c.bf16 %v2433_v47, %v2432_v45  ;;  %v2434_v3 = vld [vmem:[%s5974_s23 + $0x30] sm:$0xff] }
 0xa3d   : > { %v5487_v53 = vadd.f32 %v2260_v46, %v5223_v36  ;;  %v2275_v57 = vsel %vm1259_vm2, %v5481_v50, 0.0  ;;  %v2435_v46 = vld [vmem:[%s5974_s23 + $0x38] sm:$0xff] }
 0xa3e   : > { %2276 = vadd.xlane.f32.xlu0 %v2275_v57  ;;  %4333 = vmatprep.subr.bf16.mxu1 %v2448_v44  ;;  %v2450_v57 = vpack.c.bf16 %v2435_v46, %v2434_v3 }
 0xa3f   : > { %v2278_v27 = vsel %vm1259_vm2, %v5487_v53, 0.0  ;;  %4334 = vmatpush3.bf16.msra.mxu1 %v2448_v44 }
 0xa40   : > { %2279 = vadd.xlane.f32.xlu1 %v2278_v27  ;;  %4335 = vmatprep.subr.bf16.mxu1 %v2449_v48  ;;  %v2436_v27 = vld [vmem:[%s5974_s23 + $0x40] sm:$0xff] }
 0xa42   : > { %2282 = vadd.xlane.f32.xlu0 %v2281_v60  ;;  %v2437_v60 = vld [vmem:[%s5974_s23 + $0x48] sm:$0xff] }
 0xa43   : > { %4336 = vmatpush3.bf16.msra.mxu1 %v2449_v48 }
 0xa44   : > { %4337 = vmatprep.subr.bf16.mxu1 %v2450_v57 }
 0xa47   : > { %4338 = vmatpush3.bf16.msra.mxu1 %v2450_v57 }
 0xacb   : > { %v2277_v29 = vpop.xlane.xlu0 %2276 }
 0xacc   : > { %v2284_v61 = vmul.f32 0.03125, %v2277_v29  ;;  %v2438_v29 = vld [vmem:[%s5974_s23 + $0x50] sm:$0xff] }
 0xacd   : > { %v2280_v62 = vpop.xlane.xlu1 %2279 }
 0xace   : > { %v2287_v35 = vsub.f32 %v5481_v50, %v2284_v61  ;;  %v2285_v36 = vmul.f32 0.03125, %v2280_v62  ;;  %v2451_v61 = vpack.c.bf16 %v2437_v60, %v2436_v27  ;;  %v2439_v62 = vld [vmem:[%s5974_s23 + $0x58] sm:$0xff] }
 0xacf   : > { %v2283_v42 = vpop.xlane.xlu0 %2282 }
 0xad0   : > { %v2288_v56 = vsub.f32 %v5487_v53, %v2285_v36  ;;  %v2286_v58 = vmul.f32 0.03125, %v2283_v42  ;;  %v2290_v32 = vmul.f32 %v2287_v35, %v2287_v35  ;;  %4339 = vmatprep.subr.bf16.mxu1 %v2451_v61  ;;  %v2440_v36 = vld [vmem:[%s5974_s23 + $0x60] sm:$0xff]  ;;  %v2441_v42 = vld [vmem:[%s5974_s23 + $0x68] sm:$0xff] }
 0xad1   : > { %4340 = vmatpush3.bf16.msra.mxu1 %v2451_v61 }
 0xad2   : > { %v2289_v63 = vsub.f32 %v5484_v51, %v2286_v58  ;;  %v2293_v0 = vsel %vm1259_vm2, %v2290_v32, 0.0  ;;  %v2291_v1 = vmul.f32 %v2288_v56, %v2288_v56  ;;  %v2442_v58 = vld [vmem:[%s5974_s23 + $0x70] sm:$0xff]  ;;  %v2443_v32 = vld [vmem:[%s5974_s23 + $0x78] sm:$0xff] }
 0xad3   : > { %2294 = vadd.xlane.f32.xlu0 %v2293_v0  ;;  %v4082_v0 = vld [vmem:[%s5975_s28] ss:$0 sm:$0xff]  ;;  %s5976_s28 = sld [smem:[#allocation14_spill]] }
 0xad4   : > { %v2292_v2 = vmul.f32 %v2289_v63, %v2289_v63  ;;  %v2296_v59 = vsel %vm1259_vm2, %v2291_v1, 0.0 }
 0xad6   : > { %v2299_v5 = vsel %vm1266_vm3, %v2292_v2, 0.0 }
 0xad7   : > { %2297 = vadd.xlane.f32.xlu0 %v2296_v59  ;;  %2300 = vadd.xlane.f32.xlu1 %v2299_v5 }
 0xad9   : > { %v4085_v23 = vld [vmem:[%s5976_s28] ss:$0 sm:$0xff]  ;;  %s5977_s28 = sld [smem:[#allocation17_spill]] }
 0xb60   : > { %v2295_v10 = vpop.xlane.xlu0 %2294 }
 0xb61   : > { %v2302_v49 = vmul.f32 0.03125, %v2295_v10 }
 0xb63   : > { %v2305_v11 = vadd.f32 1e-05, %v2302_v49 }
 0xb64   : > { %v2301_v54 = vpop.xlane.xlu1 %2300  ;;  %v2298_v12 = vpop.xlane.xlu0 %2297 }
 0xb65   : > { %4703 = vrsqrt.f32 %v2305_v11  ;;  %v2304_v13 = vmul.f32 0.03125, %v2301_v54  ;;  %v2303_v14 = vmul.f32 0.03125, %v2298_v12 }
 0xb67   : > { %v2307_v15 = vadd.f32 1e-05, %v2304_v13  ;;  %v2306_v33 = vadd.f32 1e-05, %v2303_v14 }
 0xb69   : > { %4705 = vrsqrt.f32 %v2307_v15 }
 0xb6a   : > { %4707 = vrsqrt.f32 %v2306_v33 }
 0xb6f   : > { %v4704_v16 = vpop.eup %4703 }
 0xb70   : > { %v2311_v52 = vmul.f32 %v4704_v16, %v2287_v35  ;;  %v2452_v35 = vpack.c.bf16 %v2439_v62, %v2438_v29 }
 0xb72   : > { %v2320_v20 = vmul.f32 %v4080_v4, %v2311_v52  ;;  %4341 = vmatprep.subr.bf16.mxu1 %v2452_v35 }
 0xb73   : > { %v4706_v17 = vpop.eup %4705  ;;  %4342 = vmatpush3.bf16.msra.mxu1 %v2452_v35 }
 0xb74   : > { %v4708_v19 = vpop.eup %4707  ;;  %v2313_v21 = vmul.f32 %v4706_v17, %v2289_v63  ;;  %v2329_v30 = vadd.f32 %v4081_v24, %v2320_v20  ;;  %v2454_v63 = vpack.c.bf16 %v2443_v32, %v2442_v58 }
 0xb75   : > { %v2312_v22 = vmul.f32 %v4708_v19, %v2288_v56  ;;  %v2453_v56 = vpack.c.bf16 %v2441_v42, %v2440_v36 }
 0xb76   : > { %v2322_v25 = vmul.f32 %v4080_v4, %v2313_v21 }
 0xb77   : > { %v2321_v26 = vmul.f32 %v4080_v4, %v2312_v22  ;;  %4343 = vmatprep.subr.bf16.mxu1 %v2453_v56 }
 0xb78   : > { %v2331_v28 = vadd.f32 %v4081_v24, %v2322_v25  ;;  %4344 = vmatpush3.bf16.msra.mxu1 %v2453_v56 }
 0xb79   : > { %v2330_v18 = vadd.f32 %v4081_v24, %v2321_v26  ;;  %4345 = vmatprep.subr.bf16.mxu1 %v2454_v63 }
 0xb7a   : > { %v2338_v31 = vpack.c.bf16 %v2331_v28, %v2331_v28 }
 0xb7b   : > { %v2337_v34 = vpack.c.bf16 %v2330_v18, %v2329_v30 }
 0xb7c   : > { %4346 = vmatpush3.bf16.msra.mxu1 %v2454_v63 }
 0xb7d   : > { %4327 = vmatprep.mubr.msk.bf16.mxu0 %vm1259_vm2, %v2337_v34 }
 0xb7e   : > { %4328 = vmatmul.mubr.msk.bf16.vlgmr.msra.gmra.mrb[16].mxu0 %vm1259_vm2, %v2338_v31 }
 0xc51   : > { %v4329_v1 = vpop.f32.mrb[16].mxu0 }
 0xc52   : > { %v2396_v2 = vadd.f32 %v4329_v1, %v4082_v0  ;;  %v2387_v59 = vpop.f32.mrb[17].mxu0 }
 0xc53   : > { %v2388_v5 = vadd.f32 %v4082_v0, %v2387_v59  ;;  %v4330_v6 = vpop.f32.mrb[18].mxu0  ;;  %v2571_v59 = vld [vmem:[%s5977_s28] sm:$0xff] }
 0xc54   : > { %v2403_v55 = vmul.f32 %v2396_v2, %v2396_v2  ;;  %v2390_v37 = vpop.f32.mrb[19].mxu0 }
 0xc55   : > { %v2401_v7 = vmul.f32 %v2388_v5, %v2388_v5  ;;  %v2391_v8 = vadd.f32 %v4082_v0, %v2390_v37  ;;  %v2574_v37 = vld [vmem:[%s5977_s28 + $0x18] sm:$0xff] }
 0xc56   : > { %v2406_v9 = vmul.f32 %v2403_v55, %v2396_v2  ;;  %v2573_v55 = vld [vmem:[%s5977_s28 + $0x10] sm:$0xff] }
 0xc57   : > { %v2404_v10 = vmul.f32 %v2401_v7, %v2388_v5  ;;  %v2402_v49 = vmul.f32 %v2391_v8, %v2391_v8  ;;  %v2579_v7 = vpack.c.bf16 %v2574_v37, %v2573_v55 }
 0xc58   : > { %v2409_v11 = vmul.f32 0.044715, %v2406_v9 }
 0xc59   : > { %v2407_v54 = vmul.f32 0.044715, %v2404_v10  ;;  %v2405_v12 = vmul.f32 %v2402_v49, %v2391_v8 }
 0xc5a   : > { %v2412_v13 = vadd.f32 %v2409_v11, %v2396_v2 }
 0xc5b   : > { %v2410_v14 = vadd.f32 %v2407_v54, %v2388_v5  ;;  %v2408_v15 = vmul.f32 0.044715, %v2405_v12 }
 0xc5c   : > { %v2415_v33 = vmul.f32 0.7978846, %v2412_v13 }
 0xc5d   : > { %v2413_v16 = vmul.f32 0.7978846, %v2410_v14  ;;  %v2411_v52 = vadd.f32 %v2408_v15, %v2391_v8 }
 0xc5e   : > { %4709 = vtanh.f32 %v2415_v33  ;;  %v4086_v33 = vld [vmem:[%s5978_s11] ss:$0 sm:$0xff]  ;;  %s5981_s11 = smov 120  }
 0xc5f   : > { %4711 = vtanh.f32 %v2413_v16  ;;  %v2414_v4 = vmul.f32 0.7978846, %v2411_v52 }
 0xc61   : > { %4713 = vtanh.f32 %v2414_v4 }
 0xc68   : > { %v4710_v17 = vpop.eup %4709 }
 0xc69   : > { %v4712_v19 = vpop.eup %4711  ;;  %v2421_v21 = vadd.f32 1.0, %v4710_v17 }
 0xc6a   : > { %v2419_v22 = vadd.f32 1.0, %v4712_v19 }
 0xc6b   : > { %v4714_v20 = vpop.eup %4713  ;;  %v2424_v24 = vmul.f32 0.5, %v2421_v21  ;;  %v4087_v21 = vld [vmem:[%s5979_s1] ss:$0 sm:$0xff]  ;;  %s5982_s1 = smov 112  }
 0xc6c   : > { %v2420_v25 = vadd.f32 1.0, %v4714_v20  ;;  %v2422_v26 = vmul.f32 0.5, %v2419_v22 }
 0xc6d   : > { %v2427_v30 = vmul.f32 %v2424_v24, %v2396_v2 }
 0xc6e   : > { %v2423_v28 = vmul.f32 0.5, %v2420_v25  ;;  %v2425_v18 = vmul.f32 %v2422_v26, %v2388_v5  ;;  %v2572_v5 = vld [vmem:[%s5977_s28 + $0x8] sm:$0xff] }
 0xc6f   : > { %v2446_v39 = vpack.c.bf16 %v2427_v30, %v2427_v30  ;;  %v2578_v6 = vpack.c.bf16 %v2572_v5, %v2571_v59 }
 0xc70   : > { %v2426_v31 = vmul.f32 %v2423_v28, %v2391_v8 }
 0xc71   : > { %4351 = vmatprep.subr.bf16.mxu0 %v2578_v6 }
 0xc72   : > { %v2445_v34 = vpack.c.bf16 %v2426_v31, %v2425_v18  ;;  %4352 = vmatpush3.bf16.msra.mxu0 %v2578_v6  ;;  %v4088_v31 = vld [vmem:[%s5980_s3] ss:$0 sm:$0xff]  ;;  %s5983_s3 = smov 104  }
 0xc73   : > { %4353 = vmatprep.subr.bf16.mxu0 %v2579_v7 }
 0xc74   : > { %4347 = vmatprep.mubr.bf16.mxu1 %v2445_v34 }
 0xc75   : > { %4348 = vmatmul.mubr.bf16.vlgmr.msra.gmra.mrb[28].mxu1 %v2446_v39 }
 0xc76   : > { %4354 = vmatpush3.bf16.msra.mxu0 %v2579_v7 }
 0xd48   : > { %v4349_v40 = vpop.f32.mrb[28].mxu1 }
 0xd49   : > { %v2495_v41 = vpop.f32.mrb[29].mxu1  ;;  %v2504_v43 = vadd.f32 %v4349_v40, %v4085_v23 }
 0xd4a   : > { %v2496_v44 = vadd.f32 %v4085_v23, %v2495_v41  ;;  %v4350_v45 = vpop.f32.mrb[30].mxu1 }
 0xd4b   : > { %v2498_v47 = vpop.f32.mrb[31].mxu1  ;;  %v5531_v46 = vadd.f32 %v2504_v43, %v5484_v51 }
 0xd4c   : > { %v5528_v48 = vadd.f32 %v2496_v44, %v5481_v50  ;;  %v2499_v3 = vadd.f32 %v4085_v23, %v2498_v47 }
 0xd4d   : > { %v2520_v29 = vsel %vm1266_vm3, %v5531_v46, 0.0 }
 0xd4e   : > { %v5534_v57 = vadd.f32 %v2499_v3, %v5487_v53  ;;  %v2514_v27 = vsel %vm1259_vm2, %v5528_v48, 0.0 }
 0xd4f   : > { %2515 = vadd.xlane.f32.xlu0 %v2514_v27 }
 0xd50   : > { %v2517_v60 = vsel %vm1259_vm2, %v5534_v57, 0.0 }
 0xd51   : > { %2518 = vadd.xlane.f32.xlu1 %v2517_v60 }
 0xd53   : > { %2521 = vadd.xlane.f32.xlu0 %v2520_v29 }
 0xddc   : > { %v2516_v50 = vpop.xlane.xlu0 %2515 }
 0xddd   : > { %v2523_v61 = vmul.f32 0.03125, %v2516_v50 }
 0xdde   : > { %v2519_v62 = vpop.xlane.xlu1 %2518 }
 0xddf   : > { %v2526_v51 = vsub.f32 %v5528_v48, %v2523_v61  ;;  %v2524_v53 = vmul.f32 0.03125, %v2519_v62 }
 0xde0   : > { %v2522_v35 = vpop.xlane.xlu0 %2521 }
 0xde1   : > { %v2527_v36 = vsub.f32 %v5534_v57, %v2524_v53  ;;  %v2525_v42 = vmul.f32 0.03125, %v2522_v35  ;;  %v2529_v56 = vmul.f32 %v2526_v51, %v2526_v51 }
 0xde3   : > { %v2528_v58 = vsub.f32 %v5531_v46, %v2525_v42  ;;  %v2532_v32 = vsel %vm1259_vm2, %v2529_v56, 0.0  ;;  %v2530_v63 = vmul.f32 %v2527_v36, %v2527_v36 }
 0xde4   : > { %2533 = vadd.xlane.f32.xlu1 %v2532_v32 }
 0xde5   : > { %v2535_v0 = vsel %vm1259_vm2, %v2530_v63, 0.0  ;;  %v2531_v1 = vmul.f32 %v2528_v58, %v2528_v58 }
 0xde6   : > { %2536 = vadd.xlane.f32.xlu0 %v2535_v0 }
 0xde7   : > { %v2538_v2 = vsel %vm1266_vm3, %v2531_v1, 0.0 }
 0xde8   : > { %2539 = vadd.xlane.f32.xlu1 %v2538_v2 }
 0xe71   : > { %v2534_v8 = vpop.xlane.xlu1 %2533 }
 0xe72   : > { %v2541_v9 = vmul.f32 0.03125, %v2534_v8 }
 0xe73   : > { %v2537_v10 = vpop.xlane.xlu0 %2536 }
 0xe74   : > { %v2544_v49 = vadd.f32 1e-05, %v2541_v9  ;;  %v2542_v11 = vmul.f32 0.03125, %v2537_v10 }
 0xe75   : > { %v2540_v54 = vpop.xlane.xlu1 %2539 }
 0xe76   : > { %4715 = vrsqrt.f32 %v2544_v49  ;;  %v2545_v12 = vadd.f32 1e-05, %v2542_v11  ;;  %v2543_v13 = vmul.f32 0.03125, %v2540_v54 }
 0xe78   : > { %4717 = vrsqrt.f32 %v2545_v12  ;;  %v2546_v14 = vadd.f32 1e-05, %v2543_v13 }
 0xe7a   : > { %4719 = vrsqrt.f32 %v2546_v14 }
 0xe80   : > { %v4716_v15 = vpop.eup %4715 }
 0xe81   : > { %v2550_v16 = vmul.f32 %v4716_v15, %v2526_v51 }
 0xe82   : > { %v4718_v52 = vpop.eup %4717 }
 0xe83   : > { %v2551_v4 = vmul.f32 %v4718_v52, %v2527_v36  ;;  %v2559_v17 = vmul.f32 %v4086_v33, %v2550_v16 }
 0xe84   : > { %v4720_v19 = vpop.eup %4719 }
 0xe85   : > { %v2552_v22 = vmul.f32 %v4720_v19, %v2528_v58  ;;  %v2560_v20 = vmul.f32 %v4086_v33, %v2551_v4  ;;  %v2568_v24 = vadd.f32 %v4087_v21, %v2559_v17 }
 0xe87   : > { %v2569_v25 = vadd.f32 %v4087_v21, %v2560_v20  ;;  %v2561_v26 = vmul.f32 %v4086_v33, %v2552_v22 }
 0xe89   : > { %v2576_v28 = vpack.c.bf16 %v2569_v25, %v2568_v24  ;;  %v2570_v30 = vadd.f32 %v4087_v21, %v2561_v26 }
 0xe8b   : > { %4355 = vmatprep.mubr.msk.bf16.mxu0 %vm1259_vm2, %v2576_v28  ;;  %v2577_v18 = vpack.c.bf16 %v2570_v30, %v2570_v30 }
 0xe8d   : > { %4356 = vmatmul.mubr.msk.bf16.vlgmr.msra.gmra.mrb[20].mxu0 %vm1259_vm2, %v2577_v18 }
 0xf60   : > { %v4357_v34 = vpop.f32.mrb[20].mxu0 }
 0xf61   : > { %v2635_v39 = vadd.f32 %v4357_v34, %v4088_v31  ;;  %v2626_v23 = vpop.f32.mrb[21].mxu0 }
 0xf62   : > { %v4358_v40 = vpop.f32.mrb[22].mxu0  ;;  %v2627_v43 = vadd.f32 %v4088_v31, %v2626_v23 }
 0xf63   : > { %2647 = vrot.lane.b32.xlu1 %v2635_v39, %s5981_s11  ;;  %v2629_v41 = vpop.f32.mrb[23].mxu0  ;;  %v5569_v3 = vpack.c.bf16 %v2635_v39, %v2635_v39 }
 0xf64   : > { %v2630_v44 = vadd.f32 %v4088_v31, %v2629_v41 }
 0xf66   : > { %v4618_v45 = vpack.i.bf16 %v2630_v44, %v2627_v43  ;;  %v5558_v47 = vpack.c.bf16 %v2630_v44, %v2627_v43 }
 0xf68   : > { %4619 = vrot.lane.b32.xlu1 %v4618_v45, %s5982_s1  ;;  %4614 = vrot.lane.b32.xlu0 %v4618_v45, %s5981_s11  ;;  %s5986_s11 = sld [smem:[#allocation19_spill]] }
 0xf69   : > { %4363 = vmatprep.mubr.msk.bf16.mxu0 %vm1491_vm4, %v5558_v47 }
 0xf6c   : > { %4624 = vrot.lane.b32.xlu1 %v4618_v45, %s5983_s3  ;;  %2656 = vrot.lane.b32.xlu0 %v2635_v39, %s5982_s1  ;;  %s5987_s1 = smov 8  }
 0xf70   : > { %2665 = vrot.lane.b32.xlu1 %v2635_v39, %s5983_s3  ;;  %2680 = vrot.lane.b32.xlu0 %v5558_v47, %s5984_s5  ;;  %s5988_s3 = smov 16  }
 0xf74   : > { %2682 = vrot.lane.b32.xlu1 %v5569_v3, %s5984_s5 }
 0xfd5   : > { %v2648_v27 = vpop.permute.xlu1 %2647 }
 0xfd6   : > { %v5573_v60 = vpack.c.bf16 %v2648_v27, %v2648_v27 }
 0xfd8   : > { %2748 = vrot.lane.b32.xlu1 %v5573_v60, %s5984_s5 }
 0xfda   : > { %v4620_v29 = vpop.permute.xlu1 %4619  ;;  %v4615_v50 = vpop.permute.xlu0 %4614 }
 0xfdb   : > { %v4622_v61 = vunpack.i.h.bf16 %v4620_v29  ;;  %v4621_v62 = vunpack.i.l.bf16 %v4620_v29  ;;  %v4617_v51 = vunpack.i.h.bf16 %v4615_v50  ;;  %v4616_v53 = vunpack.i.l.bf16 %v4615_v50 }
 0xfdd   : > { %v5577_v35 = vpack.c.bf16 %v4622_v61, %v4621_v62  ;;  %v5579_v36 = vpack.c.bf16 %v4617_v51, %v4616_v53 }
 0xfde   : > { %v4625_v42 = vpop.permute.xlu1 %4624  ;;  %v2657_v56 = vpop.permute.xlu0 %2656 }
 0xfdf   : > { %v4627_v58 = vunpack.i.h.bf16 %v4625_v42  ;;  %v4626_v32 = vunpack.i.l.bf16 %v4625_v42  ;;  %4379 = vmatprep.mubr.msk.bf16.mxu1 %vm1491_vm4, %v5577_v35  ;;  %2746 = vrot.lane.b32.xlu0 %v5579_v36, %s5984_s5  ;;  %v5593_v59 = vpack.c.bf16 %v2657_v56, %v2657_v56 }
 0xfe1   : > { %v5585_v63 = vpack.c.bf16 %v4627_v58, %v4626_v32 }
 0xfe2   : > { %v2666_v0 = vpop.permute.xlu1 %2665  ;;  %v2681_v1 = vpop.permute.xlu0 %2680 }
 0xfe3   : > { %v2691_v2 = vsel %vm1491_vm4, %v2681_v1, 0  ;;  %2878 = vrot.lane.b32.xlu1 %v5585_v63, %s5984_s5  ;;  %2812 = vrot.lane.b32.xlu0 %v5577_v35, %s5984_s5  ;;  %v5595_v5 = vpack.c.bf16 %v2666_v0, %v2666_v0 }
 0xfe4   : > { %4487 = vmatprep.subr.msk.bf16.mxu0 %vm1491_vm4, %v2681_v1 }
 0xfe5   : > { %4360 = vmatpush3.bf16.xpose.msra.mxu0 %v2691_v2 }
 0xfe6   : > { %v2683_v6 = vpop.permute.xlu1 %2682 }
 0xfe7   : > { %2880 = vrot.lane.b32.xlu1 %v5595_v5, %s5984_s5  ;;  %2814 = vrot.lane.b32.xlu0 %v5593_v59, %s5984_s5  ;;  %v2694_v55 = vsel %vm1491_vm4, %v2683_v6, 0  ;;  %s5985_s5 = smov 64  }
 0xfe8   : > { %4488 = vmatprep.subr.msk.bf16.mxu0 %vm1491_vm4, %v2683_v6 }
 0xfed   : > { %4362 = vmatpush3.bf16.xpose.msra.mxu0 %v2694_v55 }
 0xff4   : > { %4364 = vmatmul.mubr.msk.bf16.vlgmr.msra.gmra.mrb[24].mxu0 %vm1491_vm4, %v5569_v3 }
 0xff5   : > { %4371 = vmatprep.mubr.msk.bf16.mxu0 %vm1491_vm4, %v5579_v36 }
0x104a   : > { %v2749_v8 = vpop.permute.xlu1 %2748 }
0x104b   : > { %v2760_v11 = vsel %vm1491_vm4, %v2749_v8, 0 }
0x1051   : > { %v2747_v37 = vpop.permute.xlu0 %2746 }
0x1052   : > { %v2757_v7 = vsel %vm1491_vm4, %v2747_v37, 0  ;;  %4489 = vmatprep.subr.msk.bf16.mxu0 %vm1491_vm4, %v2747_v37 }
0x1053   : > { %4368 = vmatpush3.bf16.xpose.msra.mxu0 %v2757_v7 }
0x1054   : > { %4490 = vmatprep.subr.msk.bf16.mxu0 %vm1491_vm4, %v2749_v8 }
0x1055   : > { %v2813_v9 = vpop.permute.xlu0 %2812  ;;  %v2879_v54 = vpop.permute.xlu1 %2878 }
0x1056   : > { %v2823_v10 = vsel %vm1491_vm4, %v2813_v9, 0  ;;  %4491 = vmatprep.subr.msk.bf16.mxu1 %vm1491_vm4, %v2813_v9  ;;  %v2889_v13 = vsel %vm1491_vm4, %v2879_v54, 0 }
0x1057   : > { %4376 = vmatpush3.bf16.xpose.msra.mxu1 %v2823_v10 }
0x1059   : > { %v2815_v49 = vpop.permute.xlu0 %2814  ;;  %v2881_v14 = vpop.permute.xlu1 %2880 }
0x105a   : > { %4492 = vmatprep.subr.msk.bf16.mxu1 %vm1491_vm4, %v2815_v49  ;;  %v2826_v12 = vsel %vm1491_vm4, %v2815_v49, 0  ;;  %v2892_v15 = vsel %vm1491_vm4, %v2881_v14, 0 }
0x105b   : > { %4370 = vmatpush3.bf16.xpose.msra.mxu0 %v2760_v11 }
0x105c   : > { %4493 = vmatprep.subr.msk.bf16.mxu0 %vm1491_vm4, %v2879_v54 }
0x105f   : > { %4378 = vmatpush3.bf16.xpose.msra.mxu1 %v2826_v12 }
0x1062   : > { %4372 = vmatmul.mubr.msk.bf16.vlgmr.msra.gmra.mrb[28].mxu0 %vm1491_vm4, %v5573_v60 }
0x1063   : > { %4384 = vmatpush3.bf16.xpose.msra.mxu0 %v2889_v13  ;;  %4387 = vmatprep.mubr.msk.bf16.mxu0 %vm1491_vm4, %v5585_v63 }
0x1064   : > { %4494 = vmatprep.subr.msk.bf16.mxu0 %vm1491_vm4, %v2881_v14 }
0x1066   : > { %4380 = vmatmul.mubr.msk.bf16.vlgmr.msra.gmra.mrb[32].mxu1 %vm1491_vm4, %v5593_v59 }
0x106b   : > { %4386 = vmatpush3.bf16.xpose.msra.mxu0 %v2892_v15 }
0x1072   : > { %4388 = vmatmul.mubr.msk.bf16.vlgmr.msra.gmra.mrb[32].mxu0 %vm1491_vm4, %v5595_v5 }
0x10c7   : > { %v4365_v33 = vpop.f32.mrb[24].mxu0 }
0x10c8   : > { %v2944_v16 = vmul.f32 0.35355338, %v4365_v33  ;;  %v2730_v52 = vpop.f32.mrb[25].mxu0 }
0x10c9   : > { %v4366_v4 = vpop.f32.mrb[26].mxu0  ;;  %v2942_v17 = vmul.f32 0.35355338, %v2730_v52 }
0x10ca   : > { %v2733_v19 = vpop.f32.mrb[27].mxu0  ;;  %v2960_v21 = vsel %vm1769_vm5, %v2944_v16, -inf }
0x10cb   : > { %v2943_v22 = vmul.f32 0.35355338, %v2733_v19  ;;  %2961 = vmax.xlane.f32.xlu0 %v2960_v21  ;;  %v2954_v24 = vsel %vm1762_vm6, %v2942_v17, -inf }
0x10cd   : > { %v2957_v20 = vsel %vm1762_vm6, %v2943_v22, -inf }
0x10ce   : > { %2958 = vmax.xlane.f32.xlu1 %v2957_v20 }
0x10cf   : > { %2955 = vmax.xlane.f32.xlu0 %v2954_v24 }
0x1135   : > { %v4373_v25 = vpop.f32.mrb[28].mxu0 }
0x1136   : > { %v5630_v26 = vmul.f32 0.35355338, %v4373_v25  ;;  %v2796_v28 = vpop.f32.mrb[29].mxu0 }
0x1137   : > { %v5632_v30 = vmul.f32 0.35355338, %v2796_v28  ;;  %v4374_v18 = vpop.f32.mrb[30].mxu0 }
0x1138   : > { %v2799_v31 = vpop.f32.mrb[31].mxu0  ;;  %v2969_v34 = vsel %vm1769_vm5, %v5630_v26, -inf }
0x1139   : > { %v4381_v39 = vpop.f32.mrb[32].mxu1  ;;  %2970 = vmax.xlane.f32.xlu1 %v2969_v34  ;;  %v2963_v23 = vsel %vm1762_vm6, %v5632_v30, -inf  ;;  %v5640_v45 = vmul.f32 0.35355338, %v2799_v31 }
0x113a   : > { %v2862_v40 = vpop.f32.mrb[33].mxu1  ;;  %2964 = vmax.xlane.f32.xlu0 %v2963_v23  ;;  %v5645_v61 = vmul.f32 0.35355338, %v4381_v39 }
0x113b   : > { %v5638_v41 = vmul.f32 0.35355338, %v2862_v40  ;;  %v4382_v43 = vpop.f32.mrb[34].mxu1  ;;  %v2966_v62 = vsel %vm1762_vm6, %v5640_v45, -inf }
0x113c   : > { %v2865_v44 = vpop.f32.mrb[35].mxu1  ;;  %v2978_v53 = vsel %vm1769_vm5, %v5645_v61, -inf }
0x113d   : > { %v2949_v27 = vmul.f32 0.35355338, %v2865_v44  ;;  %v2972_v29 = vsel %vm1762_vm6, %v5638_v41, -inf }
0x113e   : > { %2973 = vmax.xlane.f32.xlu0 %v2972_v29 }
0x113f   : > { %v2975_v50 = vsel %vm1762_vm6, %v2949_v27, -inf }
0x1140   : > { %2976 = vmax.xlane.f32.xlu1 %v2975_v50 }
0x1142   : > { %2967 = vmax.xlane.f32.xlu0 %v2966_v62 }
0x1145   : > { %v4389_v51 = vpop.f32.mrb[32].mxu0 }
0x1146   : > { %2979 = vmax.xlane.f32.xlu0 %v2978_v53  ;;  %v2928_v42 = vpop.f32.mrb[33].mxu0  ;;  %v5653_v0 = vmul.f32 0.35355338, %v4389_v51 }
0x1147   : > { %v5651_v56 = vmul.f32 0.35355338, %v2928_v42  ;;  %v4390_v58 = vpop.f32.mrb[34].mxu0 }
0x1148   : > { %v2931_v32 = vpop.f32.mrb[35].mxu0  ;;  %v2987_v55 = vsel %vm1769_vm5, %v5653_v0, -inf }
0x1149   : > { %v5655_v1 = vmul.f32 0.35355338, %v2931_v32  ;;  %v2981_v2 = vsel %vm1762_vm6, %v5651_v56, -inf }
0x114a   : > { %2982 = vmax.xlane.f32.xlu1 %v2981_v2 }
0x114b   : > { %v2984_v6 = vsel %vm1762_vm6, %v5655_v1, -inf }
0x114c   : > { %2985 = vmax.xlane.f32.xlu0 %v2984_v6 }
0x114e   : > { %2988 = vmax.xlane.f32.xlu1 %v2987_v55 }
0x1158   : > { %v2962_v37 = vpop.xlane.xlu0 %2961 }
0x1159   : > { %v2992_v7 = vsub.f32 %v2944_v16, %v2962_v37 }
0x115b   : > { %v3006_v9 = vmul.f32 1.442695, %v2992_v7  ;;  %v2959_v10 = vpop.xlane.xlu1 %2958 }
0x115c   : > { %v2956_v8 = vpop.xlane.xlu0 %2955  ;;  %v2991_v49 = vsub.f32 %v2943_v22, %v2959_v10 }
0x115d   : > { %4721 = vpow2.f32 %v3006_v9 }
0x115f   : > { %3096 = vrot.lane.b32.xlu1 %v5569_v3, %s5985_s5  ;;  %v2990_v3 = vsub.f32 %v2942_v17, %v2956_v8 }
0x1162   : > { %3094 = vrot.lane.b32.xlu0 %v5558_v47, %s5985_s5  ;;  %v3002_v47 = vmul.f32 1.442695, %v2990_v3 }
0x1163   : > { %3156 = vrot.lane.b32.xlu1 %v5579_v36, %s5985_s5  ;;  %v3004_v36 = vmul.f32 1.442695, %v2991_v49 }
0x1164   : > { %4723 = vpow2.f32 %v3002_v47 }
0x1165   : > { %4725 = vpow2.f32 %v3004_v36 }
0x1166   : > { %3218 = vrot.lane.b32.xlu0 %v5577_v35, %s5985_s5 }
0x1167   : > { %3158 = vrot.lane.b32.xlu1 %v5573_v60, %s5985_s5  ;;  %v5675_v11 = vpop.eup %4721 }
0x1168   : > { %v3032_v60 = vsel %vm1769_vm5, %v5675_v11, 0.0 }
0x116b   : > { %3280 = vrot.lane.b32.xlu1 %v5585_v63, %s5985_s5 }
0x116e   : > { %v5679_v35 = vpop.eup %4723 }
0x116f   : > { %v3026_v63 = vsel %vm1762_vm6, %v5679_v35, 0.0  ;;  %v5683_v54 = vpop.eup %4725 }
0x1170   : > { %v3029_v12 = vsel %vm1762_vm6, %v5683_v54, 0.0 }
0x1185   : > { %3033 = vadd.xlane.f32.xlu0 %v3032_v60 }
0x1189   : > { %3027 = vadd.xlane.f32.xlu0 %v3026_v63 }
0x118f   : > { %3030 = vadd.xlane.f32.xlu1 %v3029_v12 }
0x11c6   : > { %v2971_v13 = vpop.xlane.xlu1 %2970 }
0x11c7   : > { %v2995_v14 = vsub.f32 %v5630_v26, %v2971_v13  ;;  %v2965_v15 = vpop.xlane.xlu0 %2964 }
0x11c8   : > { %v2993_v33 = vsub.f32 %v5632_v30, %v2965_v15 }
0x11c9   : > { %v3012_v16 = vmul.f32 1.442695, %v2995_v14 }
0x11ca   : > { %v3008_v52 = vmul.f32 1.442695, %v2993_v33 }
0x11cb   : > { %4727 = vpow2.f32 %v3012_v16  ;;  %v2974_v4 = vpop.xlane.xlu0 %2973 }
0x11cc   : > { %4729 = vpow2.f32 %v3008_v52  ;;  %v2996_v20 = vsub.f32 %v5638_v41, %v2974_v4 }
0x11cd   : > { %v2977_v17 = vpop.xlane.xlu1 %2976 }
0x11ce   : > { %v2997_v19 = vsub.f32 %v2949_v27, %v2977_v17  ;;  %v3014_v26 = vmul.f32 1.442695, %v2996_v20 }
0x11cf   : > { %v2968_v21 = vpop.xlane.xlu0 %2967 }
0x11d0   : > { %v3016_v22 = vmul.f32 1.442695, %v2997_v19  ;;  %v2994_v30 = vsub.f32 %v5640_v45, %v2968_v21 }
0x11d2   : > { %4731 = vpow2.f32 %v3016_v22  ;;  %v3010_v41 = vmul.f32 1.442695, %v2994_v30 }
0x11d3   : > { %v2980_v24 = vpop.xlane.xlu0 %2979 }
0x11d4   : > { %v2998_v25 = vsub.f32 %v5645_v61, %v2980_v24 }
0x11d5   : > { %v5691_v28 = vpop.eup %4727 }
0x11d6   : > { %v3018_v18 = vmul.f32 1.442695, %v2998_v25  ;;  %v3041_v31 = vsel %vm1769_vm5, %v5691_v28, 0.0  ;;  %v5696_v34 = vpop.eup %4729 }
0x11d7   : > { %3042 = vadd.xlane.f32.xlu1 %v3041_v31  ;;  %v2983_v39 = vpop.xlane.xlu1 %2982  ;;  %v3035_v44 = vsel %vm1762_vm6, %v5696_v34, 0.0 }
0x11d8   : > { %4733 = vpow2.f32 %v3018_v18  ;;  %v2999_v23 = vsub.f32 %v5651_v56, %v2983_v39 }
0x11d9   : > { %v2986_v40 = vpop.xlane.xlu0 %2985  ;;  %4735 = vpow2.f32 %v3014_v26 }
0x11da   : > { %v3000_v43 = vsub.f32 %v5655_v1, %v2986_v40  ;;  %v3020_v50 = vmul.f32 1.442695, %v2999_v23  ;;  %4737 = vpow2.f32 %v3010_v41 }
0x11db   : > { %3036 = vadd.xlane.f32.xlu1 %v3035_v44  ;;  %v2989_v45 = vpop.xlane.xlu1 %2988 }
0x11dc   : > { %v5702_v27 = vpop.eup %4731  ;;  %v3001_v29 = vsub.f32 %v5653_v0, %v2989_v45  ;;  %v3022_v51 = vmul.f32 1.442695, %v3000_v43 }
0x11dd   : > { %v3095_v61 = vpop.permute.xlu0 %3094  ;;  %v3047_v62 = vsel %vm1762_vm6, %v5702_v27, 0.0 }
0x11de   : > { %v3024_v53 = vmul.f32 1.442695, %v3001_v29  ;;  %4391 = vmatprep.subr.bf16.mxu1 %v3095_v61 }
0x11df   : > { %3048 = vadd.xlane.f32.xlu1 %v3047_v62  ;;  %v3097_v42 = vpop.permute.xlu1 %3096  ;;  %4392 = vmatpush3.bf16.msra.mxu1 %v3095_v61 }
0x11e0   : > { %4739 = vpow2.f32 %v3024_v53  ;;  %v3106_v56 = vand.u32 %v3097_v42, %v5404_v38 }
0x11e1   : > { %4741 = vpow2.f32 %v3020_v50  ;;  %v3219_v58 = vpop.permute.xlu0 %3218 }
0x11e2   : > { %v5708_v32 = vpop.eup %4733  ;;  %4743 = vpow2.f32 %v3022_v51  ;;  %4393 = vmatprep.subr.bf16.mxu1 %v3106_v56  ;;  %4407 = vmatprep.subr.bf16.mxu0 %v3219_v58 }
0x11e3   : > { %v3157_v0 = vpop.permute.xlu1 %3156  ;;  %4394 = vmatpush3.bf16.msra.mxu1 %v3106_v56  ;;  %4408 = vmatpush3.bf16.msra.mxu0 %v3219_v58  ;;  %v3050_v1 = vsel %vm1769_vm5, %v5708_v32, 0.0  ;;  %v5712_v2 = vpop.eup %4735 }
0x11e4   : > { %3051 = vadd.xlane.f32.xlu0 %v3050_v1  ;;  %4399 = vmatprep.subr.bf16.mxu1 %v3157_v0  ;;  %v3044_v6 = vsel %vm1762_vm6, %v5712_v2, 0.0  ;;  %v5716_v55 = vpop.eup %4737 }
0x11e5   : > { %v3038_v9 = vsel %vm1762_vm6, %v5716_v55, 0.0 }
0x11e7   : > { %v3159_v49 = vpop.permute.xlu1 %3158 }
0x11e8   : > { %3045 = vadd.xlane.f32.xlu0 %v3044_v6  ;;  %v3168_v4 = vand.u32 %v3159_v49, %v5404_v38 }
0x11ea   : > { %v5718_v37 = vpop.eup %4739 }
0x11eb   : > { %v5720_v7 = vpop.eup %4741  ;;  %v3059_v8 = vsel %vm1769_vm5, %v5718_v37, 0.0  ;;  %v5736_v60 = vpop.permute.xlu1 %3280 }
0x11ec   : > { %v5726_v3 = vpop.eup %4743  ;;  %3060 = vadd.xlane.f32.xlu1 %v3059_v8  ;;  %3039 = vadd.xlane.f32.xlu0 %v3038_v9  ;;  %v3053_v10 = vsel %vm1762_vm6, %v5720_v7, 0.0  ;;  %v3387_v9 = vld [vmem:[%s5986_s11] sm:$0xff] }
0x11ed   : > { %v3056_v47 = vsel %vm1762_vm6, %v5726_v3, 0.0 }
0x11f0   : > { %3054 = vadd.xlane.f32.xlu1 %v3053_v10  ;;  %3057 = vadd.xlane.f32.xlu0 %v3056_v47 }
0x1201   : > { %3282 = vrot.lane.b32.xlu1 %v5595_v5, %s5985_s5 }
0x1206   : > { %3220 = vrot.lane.b32.xlu0 %v5593_v59, %s5985_s5  ;;  %s5989_s5 = smov 24  }
0x1212   : > { %v3034_v36 = vpop.xlane.xlu0 %3033 }
0x1213   : > { %4745 = vrcp.f32 %v3034_v36 }
0x1216   : > { %v3028_v63 = vpop.xlane.xlu0 %3027 }
0x1217   : > { %4747 = vrcp.f32 %v3028_v63 }
0x121c   : > { %v3031_v12 = vpop.xlane.xlu1 %3030 }
0x121d   : > { %4749 = vrcp.f32 %v3031_v12  ;;  %v4746_v13 = vpop.eup %4745  ;;  %v3389_v12 = vld [vmem:[%s5986_s11 + $0x10] sm:$0xff] }
0x121e   : > { %v3076_v33 = vmul.f32 %v4746_v13, %v5675_v11  ;;  %v3390_v13 = vld [vmem:[%s5986_s11 + $0x18] sm:$0xff] }
0x1220   : > { %v3087_v59 = vpack.c.bf16 %v3076_v33, %v3076_v33 }
0x1221   : > { %v4748_v14 = vpop.eup %4747 }
0x1222   : > { %v3074_v16 = vmul.f32 %v4748_v14, %v5679_v35 }
0x1227   : > { %v4750_v15 = vpop.eup %4749 }
0x1228   : > { %v3075_v5 = vmul.f32 %v4750_v15, %v5683_v54  ;;  %v3395_v15 = vpack.c.bf16 %v3390_v13, %v3389_v12 }
0x122a   : > { %v3086_v52 = vpack.c.bf16 %v3075_v5, %v3074_v16 }
0x122c   : > { %4395 = vmatprep.mubr.msk.bf16.mxu1 %vm1762_vm6, %v3086_v52 }
0x122d   : > { %4396 = vmatmul.mubr.msk.bf16.vlgmr.msra.gmra.mrb[36].mxu1 %vm1762_vm6, %v3087_v59 }
0x122e   : > { %4400 = vmatpush3.bf16.msra.mxu1 %v3157_v0 }
0x122f   : > { %4401 = vmatprep.subr.bf16.mxu1 %v3168_v4 }
0x1232   : > { %4402 = vmatpush3.bf16.msra.mxu1 %v3168_v4 }
0x1233   : > { %4415 = vmatprep.subr.bf16.mxu1 %v5736_v60 }
0x1264   : > { %v3043_v17 = vpop.xlane.xlu1 %3042 }
0x1268   : > { %v3037_v19 = vpop.xlane.xlu1 %3036 }
0x126c   : > { %v3049_v11 = vpop.xlane.xlu1 %3048 }
0x126d   : > { %4751 = vrcp.f32 %v3049_v11 }
0x1271   : > { %v3052_v21 = vpop.xlane.xlu0 %3051 }
0x1272   : > { %4753 = vrcp.f32 %v3052_v21 }
0x1275   : > { %v3046_v35 = vpop.xlane.xlu0 %3045 }
0x1276   : > { %4755 = vrcp.f32 %v3046_v35 }
0x1277   : > { %4757 = vrcp.f32 %v3043_v17  ;;  %v4752_v25 = vpop.eup %4751 }
0x1278   : > { %4759 = vrcp.f32 %v3037_v19  ;;  %v3081_v39 = vmul.f32 %v4752_v25, %v5702_v27 }
0x1279   : > { %v3061_v54 = vpop.xlane.xlu1 %3060  ;;  %v3040_v22 = vpop.xlane.xlu0 %3039 }
0x127a   : > { %4761 = vrcp.f32 %v3040_v22 }
0x127c   : > { %v4754_v26 = vpop.eup %4753 }
0x127d   : > { %v3055_v20 = vpop.xlane.xlu1 %3054  ;;  %v3058_v24 = vpop.xlane.xlu0 %3057  ;;  %v3082_v40 = vmul.f32 %v4754_v26, %v5708_v32 }
0x127e   : > { %4763 = vrcp.f32 %v3055_v20 }
0x127f   : > { %4765 = vrcp.f32 %v3058_v24  ;;  %v3091_v50 = vpack.c.bf16 %v3082_v40, %v3082_v40 }
0x1280   : > { %v4756_v30 = vpop.eup %4755  ;;  %4767 = vrcp.f32 %v3061_v54 }
0x1281   : > { %v3221_v18 = vpop.permute.xlu0 %3220  ;;  %v3080_v31 = vmul.f32 %v4756_v30, %v5712_v2  ;;  %v4758_v23 = vpop.eup %4757 }
0x1282   : > { %v3230_v41 = vand.u32 %v3221_v18, %v5404_v38  ;;  %v4760_v43 = vpop.eup %4759  ;;  %v3079_v29 = vmul.f32 %v4758_v23, %v5691_v28  ;;  %v3283_v51 = vpop.permute.xlu1 %3282 }
0x1283   : > { %v3090_v44 = vpack.c.bf16 %v3081_v39, %v3080_v31  ;;  %v3077_v61 = vmul.f32 %v4760_v43, %v5696_v34  ;;  %v3292_v0 = vand.u32 %v3283_v51, %v5404_v38 }
0x1284   : > { %4409 = vmatprep.subr.bf16.mxu0 %v3230_v41  ;;  %v4762_v45 = vpop.eup %4761  ;;  %v3089_v56 = vpack.c.bf16 %v3079_v29, %v3079_v29 }
0x1285   : > { %4410 = vmatpush3.bf16.msra.mxu0 %v3230_v41  ;;  %4411 = vmatprep.mubr.msk.bf16.mxu0 %vm1762_vm6, %v3090_v44  ;;  %v3078_v62 = vmul.f32 %v4762_v45, %v5716_v55 }
0x1287   : > { %v3088_v53 = vpack.c.bf16 %v3078_v62, %v3077_v61 }
0x1288   : > { %v4764_v27 = vpop.eup %4763  ;;  %4412 = vmatmul.mubr.msk.bf16.vlgmr.msra.gmra.mrb[36].mxu0 %vm1762_vm6, %v3091_v50 }
0x1289   : > { %v4766_v42 = vpop.eup %4765  ;;  %v3083_v58 = vmul.f32 %v4764_v27, %v5720_v7  ;;  %4403 = vmatprep.mubr.msk.bf16.mxu1 %vm1762_vm6, %v3088_v53 }
0x128a   : > { %v4768_v32 = vpop.eup %4767  ;;  %v3084_v28 = vmul.f32 %v4766_v42, %v5726_v3  ;;  %4404 = vmatmul.mubr.msk.bf16.vlgmr.msra.gmra.mrb[40].mxu1 %vm1762_vm6, %v3089_v56  ;;  %v3388_v3 = vld [vmem:[%s5986_s11 + $0x8] sm:$0xff] }
0x128b   : > { %4416 = vmatpush3.bf16.msra.mxu1 %v5736_v60  ;;  %v3085_v1 = vmul.f32 %v4768_v32, %v5718_v37  ;;  %v3394_v47 = vpack.c.bf16 %v3388_v3, %v3387_v9 }
0x128c   : > { %v3092_v34 = vpack.c.bf16 %v3084_v28, %v3083_v58  ;;  %4417 = vmatprep.subr.bf16.mxu1 %v3292_v0 }
0x128d   : > { %v3093_v2 = vpack.c.bf16 %v3085_v1, %v3085_v1  ;;  %4423 = vmatprep.subr.bf16.mxu0 %v3394_v47 }
0x128e   : > { %4419 = vmatprep.mubr.msk.bf16.mxu1 %vm1762_vm6, %v3092_v34  ;;  %4424 = vmatpush3.bf16.msra.mxu0 %v3394_v47 }
0x128f   : > { %4418 = vmatpush3.bf16.msra.mxu1 %v3292_v0  ;;  %4425 = vmatprep.subr.bf16.mxu0 %v3395_v15 }
0x1292   : > { %4420 = vmatmul.mubr.msk.bf16.vlgmr.msra.gmra.mrb[44].mxu1 %vm1762_vm6, %v3093_v2  ;;  %4426 = vmatpush3.bf16.msra.mxu0 %v3395_v15 }
0x1300   : > { %v4397_v6 = vpop.f32.mrb[36].mxu1 }
0x1301   : > { %v3142_v55 = vpop.f32.mrb[37].mxu1 }
0x1302   : > { %v4398_v7 = vpop.f32.mrb[38].mxu1 }
0x1303   : > { %v3145_v38 = vpop.f32.mrb[39].mxu1 }
0x135b   : > { %v4413_v8 = vpop.f32.mrb[36].mxu0 }
0x135c   : > { %v3266_v10 = vpop.f32.mrb[37].mxu0 }
0x135d   : > { %v4414_v49 = vpop.f32.mrb[38].mxu0  ;;  %v4405_v37 = vpop.f32.mrb[40].mxu1 }
0x135e   : > { %v3269_v36 = vpop.f32.mrb[39].mxu0  ;;  %3349 = vrot.lane.b32.xlu1 %v4405_v37, %s5987_s1  ;;  %v3204_v60 = vpop.f32.mrb[41].mxu1 }
0x135f   : > { %v4633_v63 = vpack.i.bf16 %v3269_v36, %v3266_v10  ;;  %v4406_v14 = vpop.f32.mrb[42].mxu1 }
0x1360   : > { %v3207_v33 = vpop.f32.mrb[43].mxu1 }
0x1361   : > { %v4628_v16 = vpack.i.bf16 %v3207_v33, %v3204_v60 }
0x1362   : > { %3361 = vrot.lane.b32.xlu1 %v4413_v8, %s5988_s3 }
0x1363   : > { %4629 = vrot.lane.b32.xlu0 %v4628_v16, %s5987_s1  ;;  %s5990_s1 = sld [smem:[#allocation20_spill]] }
0x1365   : > { %v4421_v5 = vpop.f32.mrb[44].mxu1 }
0x1366   : > { %v3328_v52 = vpop.f32.mrb[45].mxu1  ;;  %3373 = vrot.lane.b32.xlu1 %v4421_v5, %s5989_s5 }
0x1367   : > { %v4422_v59 = vpop.f32.mrb[46].mxu1  ;;  %4634 = vrot.lane.b32.xlu0 %v4633_v63, %s5988_s3  ;;  %s5991_s3 = sld [smem:[#allocation23_spill]] }
0x1368   : > { %v3331_v4 = vpop.f32.mrb[47].mxu1 }
0x1369   : > { %v4638_v17 = vpack.i.bf16 %v3331_v4, %v3328_v52  ;;  %v4107_v62 = vld [vmem:[%s5990_s1] ss:$0 sm:$0xff]  ;;  %s5993_s1 = sld [smem:[#allocation22_spill]] }
0x136b   : > { %4639 = vrot.lane.b32.xlu0 %v4638_v17, %s5989_s5  ;;  %s5992_s5 = sld [smem:[#allocation21_spill]] }
0x136d   : > { %v3518_v63 = vld [vmem:[%s5991_s3] sm:$0xff]  ;;  %v3519_v12 = vld [vmem:[%s5991_s3 + $0x8] sm:$0xff]  ;;  %v3520_v14 = vld [vmem:[%s5991_s3 + $0x10] sm:$0xff] }
0x136e   : > { %v3525_v13 = vpack.c.bf16 %v3519_v12, %v3518_v63  ;;  %v3521_v15 = vld [vmem:[%s5991_s3 + $0x18] sm:$0xff]  ;;  %s5994_s3 = sld [smem:[#allocation25_spill]] }
0x136f   : > { %v3526_v33 = vpack.c.bf16 %v3521_v15, %v3520_v14 }
0x1370   : > { %4431 = vmatprep.subr.bf16.mxu1 %v3525_v13 }
0x1371   : > { %4432 = vmatpush3.bf16.msra.mxu1 %v3525_v13 }
0x1372   : > { %4433 = vmatprep.subr.bf16.mxu1 %v3526_v33 }
0x1375   : > { %4434 = vmatpush3.bf16.msra.mxu1 %v3526_v33 }
0x13d0   : > { %v3350_v19 = vpop.permute.xlu1 %3349 }
0x13d1   : > { %v3380_v25 = vsel %vm1491_vm4, %v4397_v6, %v3350_v19 }
0x13d4   : > { %v3362_v21 = vpop.permute.xlu1 %3361 }
0x13d5   : > { %v4630_v11 = vpop.permute.xlu0 %4629  ;;  %v3383_v30 = vsel %vm2193_vm7, %v3380_v25, %v3362_v21 }
0x13d6   : > { %v4632_v54 = vunpack.i.h.bf16 %v4630_v11  ;;  %v4631_v22 = vunpack.i.l.bf16 %v4630_v11 }
0x13d8   : > { %v3374_v26 = vpop.permute.xlu1 %3373  ;;  %v3379_v31 = vsel %vm1491_vm4, %v3145_v38, %v4632_v54  ;;  %v3378_v39 = vsel %vm1491_vm4, %v3142_v55, %v4631_v22  ;;  %v4110_v22 = vld [vmem:[%s5992_s5] ss:$0 sm:$0xff]  ;;  %s5995_s5 = sld [smem:[#allocation24_spill]] }
0x13d9   : > { %v4635_v35 = vpop.permute.xlu0 %4634  ;;  %v3386_v41 = vsel %vm2197_vm8, %v3383_v30, %v3374_v26 }
0x13da   : > { %v4637_v20 = vunpack.i.h.bf16 %v4635_v35  ;;  %v4636_v24 = vunpack.i.l.bf16 %v4635_v35  ;;  %v3393_v61 = vpack.c.bf16 %v3386_v41, %v3386_v41 }
0x13dc   : > { %v3381_v43 = vsel %vm2193_vm7, %v3378_v39, %v4636_v24  ;;  %v3382_v44 = vsel %vm2193_vm7, %v3379_v31, %v4637_v20 }
0x13dd   : > { %v4640_v18 = vpop.permute.xlu0 %4639 }
0x13de   : > { %v4642_v23 = vunpack.i.h.bf16 %v4640_v18  ;;  %v4641_v40 = vunpack.i.l.bf16 %v4640_v18  ;;  %v4111_v18 = vld [vmem:[%s5993_s1] ss:$0 sm:$0xff]  ;;  %s5996_s1 = sld [smem:[#allocation26_spill]] }
0x13e0   : > { %v3384_v45 = vsel %vm2197_vm8, %v3381_v43, %v4641_v40  ;;  %v3385_v29 = vsel %vm2197_vm8, %v3382_v44, %v4642_v23 }
0x13e1   : > { %v3392_v50 = vpack.c.bf16 %v3385_v29, %v3384_v45  ;;  %v3614_v45 = vld [vmem:[%s5994_s3] sm:$0xff]  ;;  %v3615_v29 = vld [vmem:[%s5994_s3 + $0x8] sm:$0xff] }
0x13e3   : > { %4427 = vmatprep.mubr.msk.bf16.mxu0 %vm1259_vm2, %v3392_v50  ;;  %v3633_v50 = vpack.c.bf16 %v3615_v29, %v3614_v45 }
0x13e4   : > { %4428 = vmatmul.mubr.msk.bf16.vlgmr.msra.gmra.mrb[40].mxu0 %vm1259_vm2, %v3393_v61  ;;  %v3616_v61 = vld [vmem:[%s5994_s3 + $0x10] sm:$0xff]  ;;  %v4115_v45 = vld [vmem:[%s5996_s1] ss:$0 sm:$0xff]  ;;  %s5998_s1 = sld [smem:[#allocation27_spill]] }
0x13e5   : > { %4439 = vmatprep.subr.bf16.mxu0 %v3633_v50 }
0x13e6   : > { %4440 = vmatpush3.bf16.msra.mxu0 %v3633_v50 }
0x14b7   : > { %v4429_v27 = vpop.f32.mrb[40].mxu0 }
0x14b8   : > { %v3442_v51 = vpop.f32.mrb[41].mxu0  ;;  %v3451_v53 = vadd.f32 %v4429_v27, %v4107_v62 }
0x14b9   : > { %v3443_v42 = vadd.f32 %v4107_v62, %v3442_v51  ;;  %v4430_v56 = vpop.f32.mrb[42].mxu0  ;;  %v3618_v51 = vld [vmem:[%s5994_s3 + $0x20] sm:$0xff] }
0x14ba   : > { %v3445_v58 = vpop.f32.mrb[43].mxu0  ;;  %v5789_v0 = vadd.f32 %v3451_v53, %v5531_v46  ;;  %v3619_v53 = vld [vmem:[%s5994_s3 + $0x28] sm:$0xff]  ;;  %v3620_v56 = vld [vmem:[%s5994_s3 + $0x30] sm:$0xff] }
0x14bb   : > { %v5786_v32 = vadd.f32 %v3443_v42, %v5528_v48  ;;  %v3446_v28 = vadd.f32 %v4107_v62, %v3445_v58  ;;  %v3617_v62 = vld [vmem:[%s5994_s3 + $0x18] sm:$0xff]  ;;  %v3635_v42 = vpack.c.bf16 %v3619_v53, %v3618_v51 }
0x14bc   : > { %v3467_v6 = vsel %vm1266_vm3, %v5789_v0, 0.0  ;;  %v3634_v27 = vpack.c.bf16 %v3617_v62, %v3616_v61  ;;  %v3621_v58 = vld [vmem:[%s5994_s3 + $0x38] sm:$0xff] }
0x14bd   : > { %v5792_v34 = vadd.f32 %v3446_v28, %v5534_v57  ;;  %v3461_v1 = vsel %vm1259_vm2, %v5786_v32, 0.0  ;;  %v3636_v28 = vpack.c.bf16 %v3621_v58, %v3620_v56 }
0x14be   : > { %3462 = vadd.xlane.f32.xlu0 %v3461_v1  ;;  %4441 = vmatprep.subr.bf16.mxu0 %v3634_v27  ;;  %v3622_v1 = vld [vmem:[%s5994_s3 + $0x40] sm:$0xff] }
0x14bf   : > { %v3464_v2 = vsel %vm1259_vm2, %v5792_v34, 0.0  ;;  %4442 = vmatpush3.bf16.msra.mxu0 %v3634_v27 }
0x14c0   : > { %3465 = vadd.xlane.f32.xlu1 %v3464_v2  ;;  %4443 = vmatprep.subr.bf16.mxu0 %v3635_v42  ;;  %v3623_v2 = vld [vmem:[%s5994_s3 + $0x48] sm:$0xff] }
0x14c2   : > { %3468 = vadd.xlane.f32.xlu0 %v3467_v6  ;;  %v3624_v6 = vld [vmem:[%s5994_s3 + $0x50] sm:$0xff] }
0x14c3   : > { %4444 = vmatpush3.bf16.msra.mxu0 %v3635_v42 }
0x14c4   : > { %4445 = vmatprep.subr.bf16.mxu0 %v3636_v28 }
0x14c7   : > { %4446 = vmatpush3.bf16.msra.mxu0 %v3636_v28 }
0x154b   : > { %v3463_v48 = vpop.xlane.xlu0 %3462 }
0x154c   : > { %v3470_v55 = vmul.f32 0.03125, %v3463_v48  ;;  %v3637_v48 = vpack.c.bf16 %v3623_v2, %v3622_v1 }
0x154d   : > { %v3466_v7 = vpop.xlane.xlu1 %3465 }
0x154e   : > { %v3473_v46 = vsub.f32 %v5786_v32, %v3470_v55  ;;  %v3471_v57 = vmul.f32 0.03125, %v3466_v7  ;;  %v3625_v55 = vld [vmem:[%s5994_s3 + $0x58] sm:$0xff]  ;;  %4447 = vmatprep.subr.bf16.mxu0 %v3637_v48 }
0x154f   : > { %v3469_v38 = vpop.xlane.xlu0 %3468  ;;  %v3638_v7 = vpack.c.bf16 %v3625_v55, %v3624_v6  ;;  %4448 = vmatpush3.bf16.msra.mxu0 %v3637_v48 }
0x1550   : > { %v3474_v8 = vsub.f32 %v5792_v34, %v3471_v57  ;;  %v3472_v9 = vmul.f32 0.03125, %v3469_v38  ;;  %v3476_v3 = vmul.f32 %v3473_v46, %v3473_v46  ;;  %v3627_v57 = vld [vmem:[%s5994_s3 + $0x68] sm:$0xff] }
0x1551   : > { %4449 = vmatprep.subr.bf16.mxu0 %v3638_v7 }
0x1552   : > { %v3475_v10 = vsub.f32 %v5789_v0, %v3472_v9  ;;  %v3479_v47 = vsel %vm1259_vm2, %v3476_v3, 0.0  ;;  %v3477_v49 = vmul.f32 %v3474_v8, %v3474_v8  ;;  %v3629_v9 = vld [vmem:[%s5994_s3 + $0x78] sm:$0xff] }
0x1553   : > { %3480 = vadd.xlane.f32.xlu0 %v3479_v47  ;;  %4450 = vmatpush3.bf16.msra.mxu0 %v3638_v7 }
0x1554   : > { %v3478_v37 = vmul.f32 %v3475_v10, %v3475_v10  ;;  %v3482_v36 = vsel %vm1259_vm2, %v3477_v49, 0.0 }
0x1556   : > { %v3485_v60 = vsel %vm1266_vm3, %v3478_v37, 0.0 }
0x1557   : > { %3483 = vadd.xlane.f32.xlu0 %v3482_v36  ;;  %3486 = vadd.xlane.f32.xlu1 %v3485_v60 }
0x15e0   : > { %v3481_v16 = vpop.xlane.xlu0 %3480 }
0x15e1   : > { %v3488_v5 = vmul.f32 0.03125, %v3481_v16 }
0x15e3   : > { %v3491_v52 = vadd.f32 1e-05, %v3488_v5 }
0x15e4   : > { %v3487_v59 = vpop.xlane.xlu1 %3486  ;;  %v3484_v4 = vpop.xlane.xlu0 %3483 }
0x15e5   : > { %4769 = vrsqrt.f32 %v3491_v52  ;;  %v3490_v17 = vmul.f32 0.03125, %v3487_v59  ;;  %v3489_v19 = vmul.f32 0.03125, %v3484_v4 }
0x15e7   : > { %v3493_v11 = vadd.f32 1e-05, %v3490_v17  ;;  %v3492_v21 = vadd.f32 1e-05, %v3489_v19 }
0x15e9   : > { %4771 = vrsqrt.f32 %v3493_v11 }
0x15ea   : > { %4773 = vrsqrt.f32 %v3492_v21 }
0x15ef   : > { %v4770_v35 = vpop.eup %4769 }
0x15f0   : > { %v3497_v54 = vmul.f32 %v4770_v35, %v3473_v46  ;;  %v3626_v46 = vld [vmem:[%s5994_s3 + $0x60] sm:$0xff] }
0x15f1   : > { %v3639_v38 = vpack.c.bf16 %v3627_v57, %v3626_v46 }
0x15f2   : > { %v3506_v30 = vmul.f32 %v4110_v22, %v3497_v54 }
0x15f3   : > { %v4772_v20 = vpop.eup %4771  ;;  %4451 = vmatprep.subr.bf16.mxu0 %v3639_v38 }
0x15f4   : > { %v4774_v24 = vpop.eup %4773  ;;  %v3499_v25 = vmul.f32 %v4772_v20, %v3475_v10  ;;  %v3515_v40 = vadd.f32 %v4111_v18, %v3506_v30  ;;  %4452 = vmatpush3.bf16.msra.mxu0 %v3639_v38  ;;  %v4112_v10 = vld [vmem:[%s5995_s5] ss:$0 sm:$0xff]  ;;  %s5997_s5 = sld [smem:[#allocation29_spill]] }
0x15f5   : > { %v3498_v26 = vmul.f32 %v4774_v24, %v3474_v8  ;;  %v3628_v8 = vld [vmem:[%s5994_s3 + $0x70] sm:$0xff]  ;;  %s5999_s3 = sld [smem:[#allocation28_spill]] }
0x15f6   : > { %v3508_v31 = vmul.f32 %v4110_v22, %v3499_v25  ;;  %v3640_v3 = vpack.c.bf16 %v3629_v9, %v3628_v8 }
0x15f7   : > { %v3507_v39 = vmul.f32 %v4110_v22, %v3498_v26 }
0x15f8   : > { %v3517_v23 = vadd.f32 %v4111_v18, %v3508_v31  ;;  %4453 = vmatprep.subr.bf16.mxu0 %v3640_v3 }
0x15f9   : > { %v3516_v41 = vadd.f32 %v4111_v18, %v3507_v39  ;;  %4454 = vmatpush3.bf16.msra.mxu0 %v3640_v3 }
0x15fa   : > { %v3524_v43 = vpack.c.bf16 %v3517_v23, %v3517_v23 }
0x15fb   : > { %v3523_v44 = vpack.c.bf16 %v3516_v41, %v3515_v40 }
0x15fd   : > { %4435 = vmatprep.mubr.msk.bf16.mxu1 %vm1259_vm2, %v3523_v44 }
0x15fe   : > { %4436 = vmatmul.mubr.msk.bf16.vlgmr.msra.gmra.mrb[48].mxu1 %vm1259_vm2, %v3524_v43 }
0x16d1   : > { %v4437_v47 = vpop.f32.mrb[48].mxu1 }
0x16d2   : > { %v3582_v49 = vadd.f32 %v4437_v47, %v4112_v10  ;;  %v3573_v37 = vpop.f32.mrb[49].mxu1 }
0x16d3   : > { %v3574_v36 = vadd.f32 %v4112_v10, %v3573_v37  ;;  %v4438_v60 = vpop.f32.mrb[50].mxu1  ;;  %v3758_v37 = vld [vmem:[%s5997_s5 + $0x8] sm:$0xff] }
0x16d4   : > { %v3589_v63 = vmul.f32 %v3582_v49, %v3582_v49  ;;  %v3576_v12 = vpop.f32.mrb[51].mxu1  ;;  %v3759_v60 = vld [vmem:[%s5997_s5 + $0x10] sm:$0xff] }
0x16d5   : > { %v3587_v13 = vmul.f32 %v3574_v36, %v3574_v36  ;;  %v3577_v14 = vadd.f32 %v4112_v10, %v3576_v12 }
0x16d6   : > { %v3592_v15 = vmul.f32 %v3589_v63, %v3582_v49  ;;  %v3760_v63 = vld [vmem:[%s5997_s5 + $0x18] sm:$0xff] }
0x16d7   : > { %v3590_v33 = vmul.f32 %v3587_v13, %v3574_v36  ;;  %v3588_v16 = vmul.f32 %v3577_v14, %v3577_v14  ;;  %v3765_v12 = vpack.c.bf16 %v3760_v63, %v3759_v60 }
0x16d8   : > { %v3595_v5 = vmul.f32 0.044715, %v3592_v15 }
0x16d9   : > { %v3593_v52 = vmul.f32 0.044715, %v3590_v33  ;;  %v3591_v59 = vmul.f32 %v3588_v16, %v3577_v14 }
0x16da   : > { %v3598_v4 = vadd.f32 %v3595_v5, %v3582_v49 }
0x16db   : > { %v3596_v17 = vadd.f32 %v3593_v52, %v3574_v36  ;;  %v3594_v19 = vmul.f32 0.044715, %v3591_v59 }
0x16dc   : > { %v3601_v11 = vmul.f32 0.7978846, %v3598_v4 }
0x16dd   : > { %v3599_v21 = vmul.f32 0.7978846, %v3596_v17  ;;  %v3597_v35 = vadd.f32 %v3594_v19, %v3577_v14  ;;  %v4116_v19 = vld [vmem:[%s5998_s1] ss:$0 sm:$0xff]  ;;  %s4122_s1 = sshll.u32 %s5130_s0, 4  ;;  %s4908_s0 = smov [#allocation2]  }
0x16de   : > { %4775 = vtanh.f32 %v3601_v11  ;;  %s5869_s11 = scalar_lea.hbm %s5107_s6, %s4122_s1 }
0x16df   : > { %4777 = vtanh.f32 %v3599_v21  ;;  %v3600_v54 = vmul.f32 0.7978846, %v3597_v35 }
0x16e1   : > { %4779 = vtanh.f32 %v3600_v54 }
0x16e8   : > { %v4776_v22 = vpop.eup %4775 }
0x16e9   : > { %v4778_v20 = vpop.eup %4777  ;;  %v3607_v24 = vadd.f32 1.0, %v4776_v22 }
0x16ea   : > { %v3605_v25 = vadd.f32 1.0, %v4778_v20  ;;  %v4117_v20 = vld [vmem:[%s5999_s3] ss:$0 sm:$0xff]  ;;  %s6001_s3 = sld [smem:[#allocation31_spill]] }
0x16eb   : > { %v4780_v26 = vpop.eup %4779  ;;  %v3610_v30 = vmul.f32 0.5, %v3607_v24 }
0x16ec   : > { %v3606_v18 = vadd.f32 1.0, %v4780_v26  ;;  %v3608_v31 = vmul.f32 0.5, %v3605_v25 }
0x16ed   : > { %v3613_v23 = vmul.f32 %v3610_v30, %v3582_v49  ;;  %v3757_v49 = vld [vmem:[%s5997_s5] sm:$0xff]  ;;  %s6000_s5 = sld [smem:[#allocation30_spill]] }
0x16ee   : > { %v3609_v39 = vmul.f32 0.5, %v3606_v18  ;;  %v3611_v40 = vmul.f32 %v3608_v31, %v3574_v36  ;;  %v3764_v36 = vpack.c.bf16 %v3758_v37, %v3757_v49 }
0x16ef   : > { %v3632_v44 = vpack.c.bf16 %v3613_v23, %v3613_v23 }
0x16f0   : > { %v3612_v41 = vmul.f32 %v3609_v39, %v3577_v14  ;;  %4459 = vmatprep.subr.bf16.mxu1 %v3764_v36 }
0x16f1   : > { %4460 = vmatpush3.bf16.msra.mxu1 %v3764_v36 }
0x16f2   : > { %v3631_v43 = vpack.c.bf16 %v3612_v41, %v3611_v40  ;;  %4461 = vmatprep.subr.bf16.mxu1 %v3765_v12 }
0x16f3   : > { %v4118_v40 = vld [vmem:[%s6000_s5] ss:$0 sm:$0xff]  ;;  %s1145_s5 = sand.u32 1, %s4849_s16  }
0x16f4   : > { %4455 = vmatprep.mubr.bf16.mxu0 %v3631_v43  ;;  %s1146_s8 = scalar_lea.vmem [#allocation2], %s1145_s5 }
0x16f5   : > { %4456 = vmatmul.mubr.bf16.vlgmr.msra.gmra.mrb[44].mxu0 %v3632_v44  ;;  %4462 = vmatpush3.bf16.msra.mxu1 %v3765_v12  ;;  %s3954_s9 = sshll.u32 %s1146_s8, 4  ;;  %s5871_s9 = int_to_ptr.vmem [resolvable:$true] %s3954_s9 }
0x16f6   : > { %s4795_s12 = scalar_lea.vmem %s5871_s9, 16 }
0x16f7   : > { %p4796_p11 = scmp.ne.s32.totalorder %s5871_s9, %s4795_s12 }
0x16f9   : > { %p4797_p12 = pnand %p4796_p11, %p5147_p5 }
0x16fb   : > { %p4798_p13 = pneg %p4797_p12 }
0x17c8   : > { %v4457_v29 = vpop.f32.mrb[44].mxu0 }
0x17c9   : > { %v3681_v50 = vpop.f32.mrb[45].mxu0  ;;  %v3690_v61 = vadd.f32 %v4457_v29, %v4115_v45 }
0x17ca   : > { %v3682_v62 = vadd.f32 %v4115_v45, %v3681_v50  ;;  %v4458_v27 = vpop.f32.mrb[46].mxu0 }
0x17cb   : > { %v3684_v51 = vpop.f32.mrb[47].mxu0  ;;  %v3697_v56 = vadd.f32 %v3690_v61, %v5789_v0 }
0x17cc   : > { %v3695_v53 = vadd.f32 %v3682_v62, %v5786_v32  ;;  %v3685_v42 = vadd.f32 %v4115_v45, %v3684_v51 }
0x17cd   : > { %v3706_v2 = vsel %vm1266_vm3, %v3697_v56, 0.0 }
0x17ce   : > { %v3696_v58 = vadd.f32 %v3685_v42, %v5792_v34  ;;  %v3700_v28 = vsel %vm1259_vm2, %v3695_v53, 0.0 }
0x17cf   : > { %3701 = vadd.xlane.f32.xlu0 %v3700_v28 }
0x17d0   : > { %v3703_v1 = vsel %vm1259_vm2, %v3696_v58, 0.0 }
0x17d1   : > { %3704 = vadd.xlane.f32.xlu1 %v3703_v1 }
0x17d3   : > { %3707 = vadd.xlane.f32.xlu0 %v3706_v2 }
0x185c   : > { %v3702_v6 = vpop.xlane.xlu0 %3701 }
0x185d   : > { %v3709_v48 = vmul.f32 0.03125, %v3702_v6 }
0x185e   : > { %v3705_v55 = vpop.xlane.xlu1 %3704 }
0x185f   : > { %v3712_v7 = vsub.f32 %v3695_v53, %v3709_v48  ;;  %v3710_v32 = vmul.f32 0.03125, %v3705_v55 }
0x1860   : > { %v3708_v46 = vpop.xlane.xlu0 %3707 }
0x1861   : > { %v3713_v0 = vsub.f32 %v3696_v58, %v3710_v32  ;;  %v3711_v34 = vmul.f32 0.03125, %v3708_v46  ;;  %v3715_v57 = vmul.f32 %v3712_v7, %v3712_v7 }
0x1863   : > { %v3714_v38 = vsub.f32 %v3697_v56, %v3711_v34  ;;  %v3718_v8 = vsel %vm1259_vm2, %v3715_v57, 0.0  ;;  %v3716_v9 = vmul.f32 %v3713_v0, %v3713_v0 }
0x1864   : > { %3719 = vadd.xlane.f32.xlu1 %v3718_v8 }
0x1865   : > { %v3721_v3 = vsel %vm1259_vm2, %v3716_v9, 0.0  ;;  %v3717_v10 = vmul.f32 %v3714_v38, %v3714_v38 }
0x1866   : > { %3722 = vadd.xlane.f32.xlu0 %v3721_v3 }
0x1867   : > { %v3724_v47 = vsel %vm1266_vm3, %v3717_v10, 0.0 }
0x1868   : > { %3725 = vadd.xlane.f32.xlu1 %v3724_v47 }
0x18f1   : > { %v3720_v13 = vpop.xlane.xlu1 %3719 }
0x18f2   : > { %v3727_v14 = vmul.f32 0.03125, %v3720_v13 }
0x18f3   : > { %v3723_v15 = vpop.xlane.xlu0 %3722 }
0x18f4   : > { %v3730_v33 = vadd.f32 1e-05, %v3727_v14  ;;  %v3728_v16 = vmul.f32 0.03125, %v3723_v15 }
0x18f5   : > { %v3726_v5 = vpop.xlane.xlu1 %3725 }
0x18f6   : > { %4781 = vrsqrt.f32 %v3730_v33  ;;  %v3731_v52 = vadd.f32 1e-05, %v3728_v16  ;;  %v3729_v59 = vmul.f32 0.03125, %v3726_v5 }
0x18f8   : > { %4783 = vrsqrt.f32 %v3731_v52  ;;  %v3732_v4 = vadd.f32 1e-05, %v3729_v59 }
0x18fa   : > { %4785 = vrsqrt.f32 %v3732_v4 }
0x1900   : > { %v4782_v17 = vpop.eup %4781 }
0x1901   : > { %v3736_v11 = vmul.f32 %v4782_v17, %v3712_v7 }
0x1902   : > { %v4784_v21 = vpop.eup %4783 }
0x1903   : > { %v3737_v35 = vmul.f32 %v4784_v21, %v3713_v0  ;;  %v3745_v54 = vmul.f32 %v4116_v19, %v3736_v11 }
0x1904   : > { %v4786_v22 = vpop.eup %4785 }
0x1905   : > { %v3738_v24 = vmul.f32 %v4786_v22, %v3714_v38  ;;  %v3746_v25 = vmul.f32 %v4116_v19, %v3737_v35  ;;  %v3754_v26 = vadd.f32 %v4117_v20, %v3745_v54  ;;  %v3883_v35 = vld [vmem:[%s5097_s27] sm:$0xff]  ;;  %v3884_v54 = vld [vmem:[%s5097_s27 + $0x8] sm:$0xff] }
0x1906   : > { %v3893_v22 = vpack.c.bf16 %v3884_v54, %v3883_v35 }
0x1907   : > { %v3755_v30 = vadd.f32 %v4117_v20, %v3746_v25  ;;  %v3747_v18 = vmul.f32 %v4116_v19, %v3738_v24  ;;  %v3885_v24 = vld [vmem:[%s5097_s27 + $0x10] sm:$0xff]  ;;  %v3886_v25 = vld [vmem:[%s5097_s27 + $0x18] sm:$0xff] }
0x1909   : > { %v3762_v31 = vpack.c.bf16 %v3755_v30, %v3754_v26  ;;  %v3756_v39 = vadd.f32 %v4117_v20, %v3747_v18  ;;  %v4906_v20 = vmov 0.0   ;;  %v3894_v26 = vpack.c.bf16 %v3886_v25, %v3885_v24  ;;  %v3887_v30 = vld [vmem:[%s5097_s27 + $0x20] sm:$0xff]  ;;  %v3888_v18 = vld [vmem:[%s5097_s27 + $0x28] sm:$0xff] }
0x190a   : > { %4467 = vmatprep.subr.bf16.mxu1 %v4906_v20 }
0x190b   : > { %4463 = vmatprep.mubr.msk.bf16.mxu1 %vm1259_vm2, %v3762_v31  ;;  %v3763_v23 = vpack.c.bf16 %v3756_v39, %v3756_v39  ;;  %v3895_v31 = vpack.c.bf16 %v3888_v18, %v3887_v30  ;;  %v3889_v39 = vld [vmem:[%s5097_s27 + $0x30] sm:$0xff] }
0x190d   : > { %4464 = vmatmul.mubr.msk.bf16.vlgmr.msra.gmra.mrb[52].mxu1 %vm1259_vm2, %v3763_v23  ;;  %v3890_v23 = vld [vmem:[%s5097_s27 + $0x38] sm:$0xff] }
0x190e   : > { %4468 = vmatpush3.bf16.msra.mxu1 %v3893_v22  ;;  %4475 = vmatprep.mubr.msk.bf16.mxu1 %vm4907_vm10, %v4906_v20 }
0x190f   : > { %4469 = vmatprep.subr.bf16.mxu1 %v4906_v20 }
0x1912   : > { %4470 = vmatpush3.bf16.msra.mxu1 %v3894_v26 }
0x1913   : > { %4471 = vmatprep.subr.bf16.mxu1 %v4906_v20 }
0x1916   : > { %4472 = vmatpush3.bf16.msra.mxu1 %v3895_v31 }
0x1917   : > { %4473 = vmatprep.subr.bf16.mxu1 %v4906_v20 }
0x19e0   : > { %v4465_v41 = vpop.f32.mrb[52].mxu1 }
0x19e1   : > { %v3821_v43 = vadd.f32 %v4465_v41, %v4118_v40  ;;  %v3812_v44 = vpop.f32.mrb[53].mxu1 }
0x19e2   : > { %v3813_v45 = vadd.f32 %v4118_v40, %v3812_v44  ;;  %v4466_v29 = vpop.f32.mrb[54].mxu1 }
0x19e3   : > { %v3828_v50 = vmul.f32 %v3821_v43, %v3821_v43  ;;  %v3815_v61 = vpop.f32.mrb[55].mxu1  ;;  %v3865_v29 = vld [vmem:[%s6001_s3] sm:$0x1]  ;;  %s3942_s3 = scalar_lea.sflag [#allocation3], %s1145_s5 }
0x19e4   : > { %v3826_v62 = vmul.f32 %v3813_v45, %v3813_v45  ;;  %v3816_v27 = vadd.f32 %v4118_v40, %v3815_v61  ;;  %v3896_v40 = vpack.c.bf16 %v3890_v23, %v3889_v39  ;;  %v3866_v61 = vld [vmem:[%s5092_s20] sm:$0x1] }
0x19e5   : > { %v3831_v51 = vmul.f32 %v3828_v50, %v3821_v43 }
0x19e6   : > { %v3829_v53 = vmul.f32 %v3826_v62, %v3813_v45  ;;  %v3827_v42 = vmul.f32 %v3816_v27, %v3816_v27  ;;  %4474 = vmatpush3.bf16.msra.mxu1 %v3896_v40 }
0x19e7   : > { %v3834_v56 = vmul.f32 0.044715, %v3831_v51 }
0x19e8   : > { %v3832_v58 = vmul.f32 0.044715, %v3829_v53  ;;  %v3830_v28 = vmul.f32 %v3827_v42, %v3816_v27  ;;  %v3891_v53 = vld [vmem:[%s6002_s4] sm:$0x1]  ;;  %s4799_s4 = sshll.u32 %s4908_s0, 4  ;;  %s4800_s4 = int_to_ptr.vmem [resolvable:$false] %s4799_s4 }
0x19e9   : > { %v3837_v1 = vadd.f32 %v3834_v56, %v3821_v43  ;;  %s4801_s13 = scalar_lea.vmem %s4800_s4, 32  ;;  %p4802_p0 = scmp.lt.s32.totalorder %s5871_s9, %s4800_s4 }
0x19ea   : > { %v3835_v2 = vadd.f32 %v3832_v58, %v3813_v45  ;;  %v3833_v6 = vmul.f32 0.044715, %v3830_v28  ;;  %p4803_p1 = scmp.lt.s32.totalorder %s4801_s13, %s4795_s12 }
0x19eb   : > { %v3840_v48 = vmul.f32 0.7978846, %v3837_v1 }
0x19ec   : > { %v3838_v55 = vmul.f32 0.7978846, %v3835_v2  ;;  %v3836_v7 = vadd.f32 %v3833_v6, %v3816_v27  ;;  %p4804_p2 = por %p4803_p1, %p4802_p0 }
0x19ed   : > { %4787 = vtanh.f32 %v3840_v48 }
0x19ee   : > { %4789 = vtanh.f32 %v3838_v55  ;;  %v3839_v32 = vmul.f32 0.7978846, %v3836_v7  ;;  %p4805_p3 = pnand %p4804_p2, %p4798_p13 }
0x19f0   : > { %4791 = vtanh.f32 %v3839_v32 }
0x19f7   : > { %v4788_v46 = vpop.eup %4787 }
0x19f8   : > { %v4790_v0 = vpop.eup %4789  ;;  %v3846_v34 = vadd.f32 1.0, %v4788_v46 }
0x19f9   : > { %v3844_v57 = vadd.f32 1.0, %v4790_v0 }
0x19fa   : > { %v4792_v38 = vpop.eup %4791  ;;  %v3849_v8 = vmul.f32 0.5, %v3846_v34 }
0x19fb   : > { %v3847_v9 = vmul.f32 0.5, %v3844_v57  ;;  %v3845_v3 = vadd.f32 1.0, %v4792_v38 }
0x19fc   : > { %v3852_v49 = vmul.f32 %v3849_v8, %v3821_v43 }
0x19fd   : > { %v3850_v10 = vmul.f32 %v3847_v9, %v3813_v45  ;;  %v3848_v47 = vmul.f32 0.5, %v3845_v3 }
0x19fe   : > { %v3856_v12 = vsel %vm3855_vm9, %v3852_v49, -inf }
0x19ff   : > { %v3851_v37 = vmul.f32 %v3848_v47, %v3816_v27  ;;  %v3853_v36 = vsel %vm1195_vm0, %v3850_v10, -inf }
0x1a01   : > { %v3854_v60 = vsel %vm1195_vm0, %v3851_v37, -inf }
0x1a02   : > { %v3857_v63 = vmax.f32 %v3853_v36, %v3854_v60 }
0x1a04   : > { %v3858_v13 = vmax.f32 %v3857_v63, %v3856_v12 }
0x1a06   : > { %v3859_v14 = vrot.slane %v3858_v13, 4 }
0x1a08   : > { %v3860_v15 = vmax.f32 %v3858_v13, %v3859_v14 }
0x1a0a   : > { %v3861_v33 = vrot.slane %v3860_v15, 2 }
0x1a0c   : > { %v3862_v16 = vmax.f32 %v3860_v15, %v3861_v33 }
0x1a0e   : > { %v3863_v5 = vrot.slane %v3862_v16, 1 }
0x1a10   : > { %v3864_v52 = vmax.f32 %v3862_v16, %v3863_v5 }
0x1a12   : > { %v3867_v59 = vsel %vm1195_vm0, %v3864_v52, 0.0 }
0x1a13   : > { %3868 = vadd.xlane.f32.xlu0 %v3867_v59 }
0x1aa0   : > { %v3869_v4 = vpop.xlane.xlu0 %3868 }
0x1aa1   : > { %v3871_v17 = vmul.f32 0.015625, %v3869_v4 }
0x1aa3   : > { %v3872_v19 = vsub.f32 %v3864_v52, %v3871_v17 }
0x1aa5   : > { %v3873_v11 = vmul.f32 %v3872_v19, %v3872_v19 }
0x1aa7   : > { %v3874_v21 = vsel %vm1195_vm0, %v3873_v11, 0.0 }
0x1aa8   : > { %3875 = vadd.xlane.f32.xlu1 %v3874_v21 }
0x1b35   : > { %v3876_v41 = vpop.xlane.xlu1 %3875 }
0x1b36   : > { %v3877_v43 = vmul.f32 0.015625, %v3876_v41 }
0x1b38   : > { %v3878_v44 = vadd.f32 1e-05, %v3877_v43 }
0x1b3a   : > { %4793 = vrsqrt.f32 %v3878_v44 }
0x1b44   : > { %v4794_v45 = vpop.eup %4793 }
0x1b45   : > { %v3880_v50 = vmul.f32 %v4794_v45, %v3872_v19 }
0x1b47   : > { %v3881_v62 = vmul.f32 %v3880_v50, %v3865_v29 }
0x1b49   : > { %v3882_v27 = vadd.f32 %v3881_v62, %v3866_v61 }
0x1b4b   : > { %v3892_v51 = vpack.c.bf16 %v3882_v27, %v3882_v27 }
0x1b4d   : > { %4476 = vmatmul.mubr.msk.bf16.vlgmr.msra.gmra.mrb[56].mxu1 %vm1195_vm0, %v3892_v51 }
0x1c20   : > { %v3934_v42 = vpop.f32.mrb[56].mxu1 }
0x1c21   : > { %v3935_v56 = vadd.f32 %v3934_v42, %v3891_v53  ;;  %v4477_v58 = vpop.f32.mrb[57].mxu1 }
0x1c22   : > { %v3937_v28 = vpop.f32.mrb[58].mxu1 }
0x1c23   : > { %3940 = vst [vmem:[%s1146_s8] sm:$0x1] %v3935_v56  ;;  %v4478_v1 = vpop.f32.mrb[59].mxu1 }
0x1c24   : > { %4808 = shalt.err (!%p4805_p3)
}
0x1c25   : > { %s4809_s8 = scalar_lea.hbm %s5869_s11, 16  ;;  %s4813_s5 = scalar_lea.hbm %s5107_s6, 32 }
0x1c26   : > { %p4810_p4 = scmp.ne.s32.totalorder %s5869_s11, %s4809_s8  ;;  %p4814_p9 = scmp.lt.u32.totalorder %s5869_s11, %s5107_s6 }
0x1c27   : > { %p4815_p10 = scmp.lt.u32.totalorder %s4813_s5, %s4809_s8  ;;  %p4817_p12 = scmp.lt.u32.totalorder %s4809_s8, %s5869_s11 }
0x1c28   : > { %p4811_p7 = pnand %p4810_p4, %p5147_p5 }
0x1c29   : > { %p4816_p11 = por %p4815_p10, %p4814_p9 }
0x1c2a   : > { %p4812_p8 = pneg %p4811_p7 }
0x1c2b   : > { %p4818_p0 = por %p4817_p12, %p4816_p11 }
0x1c2d   : > { %p4819_p13 = pnand %p4818_p0, %p4812_p8 }
0x1c2f   : > { %4822 = shalt.err (!%p4819_p13)
}
0x1c30   : > { %4495 = dma.vmem_to_hbm [thread:$0]  (%p5147_p5), %s5871_s9, 16, %s5869_s11, %s3942_s3  }
0x1c31 PF: > { %p4501_p1 = scmp.ge.s32.totalorder %s4857_s22, 2  ;;  %s3966_s13 = sand.u32 1, %s4845_s15  }
0x1c32   : > { %s3967_s12 = scalar_lea.sflag [#allocation3], %s3966_s13 }
0x1c33   : > { %p4498_p2 = pnand %p4501_p1, %p5151_p6 }
0x1c35   : > { %4840 = dma.done.wait (!%p4498_p2), %s3967_s12, 16  }
0x1c36   : > { %4842 = vsyncadd (!%p4498_p2), %s3967_s12, 4294967280  ;;  %p87_p3 = scmp.ge.s32.totalorder %s5134_s26, 4   ;;  %s6003_s15 = smov %s4849_s16 }
0x1c37   : > { %s6004_s16 = smov %s4853_s18  ;;  %s6005_s18 = smov %s5145_s2 }
0x1c38   : > { %s6006_s22 = smov %s5134_s26  ;;  %89 = sbr.rel (!%p87_p3) target bundleno = 83 (0x53), region = 245 }
0x1c3f   :  { %3971 = vsyncpa [#allocation3], 1 }
0x1c40   :  { %3973 = vsyncpa [#allocation3 + $0x1], 1 }

</bundles_post_ra>
